<compile_context>
chip_gen: v5e
topology: v5e:2x2
jax: 0.10.0
libtpu: 0.0.40
codegen_flags: <defaults>
</compile_context>

<pallas_src>
import functools
import math

import jax
import jax.numpy as jnp
from jax.experimental import pallas as pl
from jax.experimental.pallas import tpu as pltpu


def _round_up(v, m):
    return ((v + m - 1) // m) * m


# ----------------------------------------------------------------------------
# Pallas kernels: (M, N, K)-tiled MXU matmul + fused shift (+residual) (+ReLU)
# BN scale is pre-folded into the weight matrix, so the epilogue is cheap.
# ----------------------------------------------------------------------------
def _mm_kernel(x_ref, w_ref, shift_ref, o_ref, acc_ref, *, relu):
    @pl.when(pl.program_id(2) == 0)
    def _():
        acc_ref[...] = jnp.zeros_like(acc_ref)

    acc_ref[...] += jnp.dot(x_ref[...], w_ref[...],
                            preferred_element_type=jnp.float32)

    @pl.when(pl.program_id(2) == pl.num_programs(2) - 1)
    def _():
        y = acc_ref[...] + shift_ref[...]
        if relu:
            y = jnp.maximum(y, 0.0)
        o_ref[...] = y


def _mm_res_kernel(x_ref, w_ref, shift_ref, res_ref, o_ref, acc_ref):
    @pl.when(pl.program_id(2) == 0)
    def _():
        acc_ref[...] = jnp.zeros_like(acc_ref)

    acc_ref[...] += jnp.dot(x_ref[...], w_ref[...],
                            preferred_element_type=jnp.float32)

    @pl.when(pl.program_id(2) == pl.num_programs(2) - 1)
    def _():
        # bottleneck epilogue: relu(conv_bn + identity)
        o_ref[...] = jnp.maximum(
            acc_ref[...] + shift_ref[...] + res_ref[...], 0.0)


# ----------------------------------------------------------------------------
# Pallas wrapper
# ----------------------------------------------------------------------------
def fused_matmul(x, w, shift, residual=None, relu=True):
    """out = [relu]( x @ w + shift [+ residual] ).

    x: (M, K) bf16 im2col patches; w: (K, Cout) bf16 (BN scale pre-folded);
    shift / residual / output are f32.  Tiled over (M, N, K); K is the
    innermost "arbitrary" reduction axis with an f32 VMEM accumulator.
    """
    M, K = x.shape
    Cout = w.shape[1]

    # --- tile selection (kept small enough for v7x's 64 MiB VMEM; sweepable) -
    TM = 256 if M >= 256 else _round_up(M, 16)
    Mp = _round_up(M, TM)

    Np = _round_up(Cout, 128)                 # lane-dense output (>= 128)
    TN = 256 if Np % 256 == 0 else 128

    Kp = _round_up(K, 128)
    TK = 128
    for cand in (768, 640, 512, 384, 256, 128):
        if Kp % cand == 0:
            TK = cand
            break

    xp = jnp.pad(x, ((0, Mp - M), (0, Kp - K)))
    wp = jnp.pad(w, ((0, Kp - K), (0, Np - Cout)))
    shift2 = jnp.pad(shift.reshape(1, Cout).astype(jnp.float32),
                     ((0, 0), (0, Np - Cout)))
    if residual is not None:
        residual = jnp.pad(residual.astype(jnp.float32),
                           ((0, Mp - M), (0, Np - Cout)))

    grid = (Mp // TM, Np // TN, Kp // TK)
    x_spec = pl.BlockSpec((TM, TK), lambda i, j, k: (i, k))
    w_spec = pl.BlockSpec((TK, TN), lambda i, j, k: (k, j))
    s_spec = pl.BlockSpec((1, TN), lambda i, j, k: (0, j))
    o_spec = pl.BlockSpec((TM, TN), lambda i, j, k: (i, j))

    if residual is None:
        kernel = functools.partial(_mm_kernel, relu=relu)
        operands = (xp, wp, shift2)
        in_specs = [x_spec, w_spec, s_spec]
        res_bytes = 0
    else:
        kernel = _mm_res_kernel
        operands = (xp, wp, shift2, residual)
        in_specs = [x_spec, w_spec, s_spec, o_spec]
        res_bytes = Mp * Np * 4

    cost = pl.CostEstimate(
        flops=2 * Mp * Kp * Np,
        transcendentals=0,
        bytes_accessed=Mp * Kp * 2 + Kp * Np * 2 + Mp * Np * 4 + res_bytes)

    out = pl.pallas_call(
        kernel,
        out_shape=jax.ShapeDtypeStruct((Mp, Np), jnp.float32),
        grid_spec=pltpu.PrefetchScalarGridSpec(
            num_scalar_prefetch=0,
            grid=grid,
            in_specs=in_specs,
            out_specs=o_spec,
            scratch_shapes=[pltpu.VMEM((TM, TN), jnp.float32)]),
        compiler_params=pltpu.CompilerParams(
            dimension_semantics=("parallel", "parallel", "arbitrary"),
            vmem_limit_bytes=32 * 1024 * 1024),
        cost_estimate=cost,
    )(*operands)
    return out[:M, :Cout]


# ----------------------------------------------------------------------------
# Pooling (separable max over strided views -- no 9-tap HBM materialization)
# ----------------------------------------------------------------------------
def maxpool2d_3x3_s2_p1(x):
    """MaxPool2d(kernel=3, stride=2, padding=1) on NHWC input."""
    # TODO(synk): purely memory-bound; implemented as a plain-JAX separable
    #             max (rows then cols) to avoid re-reading 9x the feature map.
    N, H, W, C = x.shape
    Ho = (H + 2 - 3) // 2 + 1
    Wo = (W + 2 - 3) // 2 + 1
    xp = jnp.pad(x, ((0, 0), (1, 1), (1, 1), (0, 0)),
                 constant_values=-jnp.inf)
    r = jnp.maximum(jnp.maximum(xp[:, 0:2 * Ho - 1:2], xp[:, 1:2 * Ho:2]),
                    xp[:, 2:2 * Ho + 1:2])
    out = jnp.maximum(
        jnp.maximum(r[:, :, 0:2 * Wo - 1:2], r[:, :, 1:2 * Wo:2]),
        r[:, :, 2:2 * Wo + 1:2])
    return out


# ----------------------------------------------------------------------------
# Conv / ConvTranspose glue (im2col in plain JAX, matmul in Pallas)
# ----------------------------------------------------------------------------
def conv2d(x, w, scale, shift, stride, padding, relu, residual=None):
    """x: NHWC f32; w: PyTorch layout (Cout, Cin, kh, kw).  BN scale is folded
    into the weight matrix; the matmul runs in bf16 with an f32 accumulator."""
    N, H, W, Cin = x.shape
    Cout, _, kh, kw = w.shape
    Ho = (H + 2 * padding - kh) // stride + 1
    Wo = (W + 2 * padding - kw) // stride + 1
    xb = x.astype(jnp.bfloat16)
    if padding:
        xb = jnp.pad(xb, ((0, 0), (padding, padding), (padding, padding),
                          (0, 0)))
    cols = []
    for i in range(kh):
        for j in range(kw):
            cols.append(xb[:, i:i + (Ho - 1) * stride + 1:stride,
                           j:j + (Wo - 1) * stride + 1:stride, :])
    patches = jnp.concatenate(cols, axis=-1).reshape(N * Ho * Wo,
                                                     kh * kw * Cin)
    wmat = jnp.transpose(w, (2, 3, 1, 0)).reshape(kh * kw * Cin, Cout)
    wmat = (wmat * scale.reshape(1, Cout)).astype(jnp.bfloat16)
    res_flat = None
    if residual is not None:
        res_flat = residual.reshape(N * Ho * Wo, Cout)
    out = fused_matmul(patches, wmat, shift, residual=res_flat, relu=relu)
    return out.reshape(N, Ho, Wo, Cout)


def conv_transpose2d_s2(x, w_t, scale, shift, relu=True):
    """ConvTranspose2d(k=4, stride=2, pad=1, output_padding=0) via sub-pixel
    decomposition: out[2p+r, 2q+c] only depends on a 2x2 input window, so the
    op is four phase-specific 2x2 stride-1 convs (K = 4*Cin) interleaved.
    w_t: PyTorch layout (Cin, Cout, 4, 4)."""
    N, H, W, Cin = x.shape
    Cout = w_t.shape[1]
    xb = x.astype(jnp.bfloat16)
    xp = jnp.pad(xb, ((0, 0), (1, 1), (1, 1), (0, 0)))
    M = N * H * W
    scale2 = scale.reshape(1, Cout)
    row_phases = []
    for r in range(2):
        col_phases = []
        for c in range(2):
            win = xp[:, r:r + H + 1, c:c + W + 1, :]       # (N, H+1, W+1, Cin)
            cols = [win[:, a:a + H, b:b + W, :]
                    for a in range(2) for b in range(2)]
            patches = jnp.concatenate(cols, axis=-1).reshape(M, 4 * Cin)
            # out[2p+r, 2q+c] = sum_{a,b,ci} x[p+a-(1-r), q+b-(1-c), ci]
            #                    * W[ci, :, (3-r)-2a, (3-c)-2b]
            sub = w_t[:, :, 3 - r::-2, 3 - c::-2]          # (Cin, Cout, a, b)
            wmat = jnp.transpose(sub, (2, 3, 0, 1)).reshape(4 * Cin, Cout)
            wmat = (wmat * scale2).astype(jnp.bfloat16)
            out = fused_matmul(patches, wmat, shift, relu=relu)
            col_phases.append(out.reshape(N, H, W, Cout))
        row_phases.append(jnp.stack(col_phases, axis=3))   # (N, H, W, 2, C)
    full = jnp.stack(row_phases, axis=2)                   # (N, H, 2, W, 2, C)
    return full.reshape(N, 2 * H, 2 * W, Cout)


# ----------------------------------------------------------------------------
# Parameter init (deterministic, synthetic) and BN folding
# ----------------------------------------------------------------------------
class KeyGen:
    def __init__(self, key):
        self.key = key

    def __call__(self):
        self.key, sub = jax.random.split(self.key)
        return sub


def conv_w(key, cout, cin, k):
    fan_in = cin * k * k
    return jax.random.normal(key, (cout, cin, k, k), jnp.float32) * math.sqrt(
        2.0 / fan_in)


def init_bn(kg, c):
    return dict(
        gamma=1.0 + 0.1 * jax.random.normal(kg(), (c,), jnp.float32),
        beta=0.1 * jax.random.normal(kg(), (c,), jnp.float32),
        mean=0.1 * jax.random.normal(kg(), (c,), jnp.float32),
        var=1.0 + 0.1 * jnp.abs(jax.random.normal(kg(), (c,), jnp.float32)),
    )


def fold_bn(bn, bias=None, eps=1e-5):
    scale = bn['gamma'] / jnp.sqrt(bn['var'] + eps)
    shift = bn['beta'] - bn['mean'] * scale
    if bias is not None:
        shift = shift + bias * scale
    return scale, shift


def init_bottleneck(kg, inplanes, planes, stride, expansion):
    p = dict(stride=stride)
    p['conv1_w'] = conv_w(kg(), planes, inplanes, 1)
    p['bn1'] = init_bn(kg, planes)
    p['conv2_w'] = conv_w(kg(), planes, planes, 3)
    p['bn2'] = init_bn(kg, planes)
    p['conv3_w'] = conv_w(kg(), planes * expansion, planes, 1)
    p['bn3'] = init_bn(kg, planes * expansion)
    if stride != 1 or inplanes != planes * expansion:
        p['down_w'] = conv_w(kg(), planes * expansion, inplanes, 1)
        p['down_bn'] = init_bn(kg, planes * expansion)
    return p


def init_head(kg, cin, mid, cout):
    stages = []
    c = cin
    for _ in range(4):  # 4x (ConvTranspose2d + BN + ReLU)
        w = jax.random.normal(kg(), (c, mid, 4, 4), jnp.float32) * math.sqrt(
            2.0 / (c * 16))
        b = 0.01 * jax.random.normal(kg(), (mid,), jnp.float32)
        stages.append(dict(w=w, b=b, bn=init_bn(kg, mid)))
        c = mid
    fw = conv_w(kg(), cout, mid, 1)
    fb = 0.01 * jax.random.normal(kg(), (cout,), jnp.float32)
    return dict(stages=stages, final_w=fw, final_b=fb)


def init_model(key, cfg):
    kg = KeyGen(key)
    params = dict()
    params['conv1_w'] = conv_w(kg(), cfg['stem'], 3, 7)   # conv1: 7x7 s2 p3
    params['bn1'] = init_bn(kg, cfg['stem'])
    layers = []
    inplanes = cfg['stem']
    for planes, nblocks, stride in zip(cfg['planes'], cfg['blocks'],
                                       (1, 2, 2, 2)):
        blocks = []
        for b in range(nblocks):
            s = stride if b == 0 else 1
            blocks.append(
                init_bottleneck(kg, inplanes, planes, s, cfg['expansion']))
            inplanes = planes * cfg['expansion']
        layers.append(blocks)
    params['layers'] = layers
    params['upsample'] = init_head(kg, inplanes, cfg['head'],
                                   cfg['n_keypoints'])
    params['upsample_woff'] = init_head(kg, inplanes, cfg['head'],
                                        cfg['n_offs'])
    return params


# ----------------------------------------------------------------------------
# Forward pass (mirrors ResnetSimpleWoff.forward with full=False)
# ----------------------------------------------------------------------------
def bottleneck_forward(p, x):
    stride = p['stride']
    s1, b1 = fold_bn(p['bn1'])
    out = conv2d(x, p['conv1_w'], s1, b1, stride=1, padding=0, relu=True)
    s2, b2 = fold_bn(p['bn2'])
    out = conv2d(out, p['conv2_w'], s2, b2, stride=stride, padding=1,
                 relu=True)
    if 'down_w' in p:
        sd, bd = fold_bn(p['down_bn'])
        identity = conv2d(x, p['down_w'], sd, bd, stride=stride, padding=0,
                          relu=False)
    else:
        identity = x
    s3, b3 = fold_bn(p['bn3'])
    # relu(bn3(conv3(out)) + identity), fused in one Pallas kernel epilogue
    return conv2d(out, p['conv3_w'], s3, b3, stride=1, padding=0, relu=True,
                  residual=identity)


def head_forward(head, x):
    for st in head['stages']:
        scale, shift = fold_bn(st['bn'], bias=st['b'])
        x = conv_transpose2d_s2(x, st['w'], scale, shift, relu=True)
    cout = head['final_w'].shape[0]
    return conv2d(x, head['final_w'], jnp.ones((cout,), jnp.float32),
                  head['final_b'], stride=1, padding=0, relu=False)


def resnet_simple_woff_forward(params, x_nchw):
    x = jnp.transpose(x_nchw, (0, 2, 3, 1)).astype(jnp.float32)  # NCHW->NHWC
    # feat_extractor: conv1 -> bn1 -> relu -> maxpool -> layer1..4
    s, b = fold_bn(params['bn1'])
    x = conv2d(x, params['conv1_w'], s, b, stride=2, padding=3, relu=True)
    x = maxpool2d_3x3_s2_p1(x)
    for blocks in params['layers']:
        for blk in blocks:
            x = bottleneck_forward(blk, x)
    feat = x
    out1 = head_forward(params['upsample'], feat)
    out2 = head_forward(params['upsample_woff'], feat)
    to_nchw = lambda t: jnp.transpose(t, (0, 3, 1, 2))
    # full=False: third element is the (un-modified) backbone feature map
    return [to_nchw(out1), to_nchw(out2), to_nchw(feat)]


# ----------------------------------------------------------------------------
if __name__ == "__main__":
    # Reduced-size config (see TODO(synk) above). Full ResNet-101 would be:
    # stem=64, planes=(64,128,256,512), blocks=(3,4,23,3), head=256.
    CFG = dict(stem=4, planes=(4, 8, 16, 32), blocks=(2, 1, 1, 1),
               expansion=4, head=16, n_keypoints=7, n_offs=4)

    root = jax.random.PRNGKey(0)
    pkey, xkey = jax.random.split(root)
    params = init_model(pkey, CFG)

    x = jax.random.normal(xkey, (2, 3, 64, 64), jnp.float32)  # NCHW input

    fwd = jax.jit(lambda inp: resnet_simple_woff_forward(params, inp))
    out1, out2, feat = fwd(x)
    jax.block_until_ready((out1, out2, feat))

    assert out1.shape == (2, CFG['n_keypoints'], 32, 32), out1.shape
    assert out2.shape == (2, CFG['n_offs'], 32, 32), out2.shape
    assert feat.shape == (2, CFG['planes'][-1] * CFG['expansion'], 2, 2), feat.shape
    assert out1.dtype == out2.dtype == feat.dtype == jnp.float32
    assert jnp.all(jnp.isfinite(out1)) and jnp.all(jnp.isfinite(out2))

    print("KERNEL_OK")
</pallas_src>

<mosaic_0001>
module attributes {stable_mosaic.version = 11 : i64} {
  func.func @_mm_kernel(%arg0: i32, %arg1: i32, %arg2: i32, %arg3: memref<256x256xbf16, #tpu.memory_space<vmem>>, %arg4: memref<256x128xbf16, #tpu.memory_space<vmem>>, %arg5: memref<1x128xf32, #tpu.memory_space<vmem>>, %arg6: memref<256x128xf32, #tpu.memory_space<vmem>>, %arg7: memref<256x128xf32, #tpu.memory_space<vmem>>) attributes {dimension_semantics = [#tpu.dimension_semantics<parallel>, #tpu.dimension_semantics<parallel>, #tpu.dimension_semantics<arbitrary>], iteration_bounds = array<i64: 8, 1, 1>, scalar_prefetch = 0 : i64, scratch_operands = 1 : i64, tpu.core_type = #tpu.core_type<tc>, window_params = [{transform_indices = @transform_0, window_bounds = array<i64: 256, 256>}, {transform_indices = @transform_1, window_bounds = array<i64: 256, 128>}, {transform_indices = @transform_2, window_bounds = array<i64: 1, 128>}, {transform_indices = @transform_3, window_bounds = array<i64: 256, 128>}]} {
    %c0_i32 = arith.constant 0 : i32
    %0 = arith.cmpi eq, %arg2, %c0_i32 : i32
    %1 = arith.extui %0 : i1 to i32
    %c0_i32_0 = arith.constant 0 : i32
    %2 = arith.cmpi ne, %1, %c0_i32_0 : i32
    scf.if %2 {
      %cst_10 = arith.constant 0.000000e+00 : f32
      %12 = vector.broadcast %cst_10 : f32 to vector<256x128xf32>
      %c0_11 = arith.constant 0 : index
      %c0_12 = arith.constant 0 : index
      %13 = vector.load %arg7[%c0_11, %c0_12] : memref<256x128xf32, #tpu.memory_space<vmem>>, vector<256x128xf32>
      tpu.vector_store %arg7[%c0_11, %c0_12], %12 {strides = array<i32>} : memref<256x128xf32, #tpu.memory_space<vmem>>, vector<256x128xf32>,
    } else {
    }
    %c0 = arith.constant 0 : index
    %c0_1 = arith.constant 0 : index
    %3 = vector.load %arg7[%c0, %c0_1] : memref<256x128xf32, #tpu.memory_space<vmem>>, vector<256x128xf32>
    %c0_2 = arith.constant 0 : index
    %c0_3 = arith.constant 0 : index
    %4 = vector.load %arg3[%c0_2, %c0_3] : memref<256x256xbf16, #tpu.memory_space<vmem>>, vector<256x256xbf16>
    %c0_4 = arith.constant 0 : index
    %c0_5 = arith.constant 0 : index
    %5 = vector.load %arg4[%c0_4, %c0_5] : memref<256x128xbf16, #tpu.memory_space<vmem>>, vector<256x128xbf16>
    %cst = arith.constant dense<0.000000e+00> : vector<256x128xf32>
    %6 = tpu.matmul %4, %5, %cst {dimension_numbers = #tpu.dot_dimension_numbers<[1], [0], [0], [1], [0, 0, 1, 1], [], []>} : vector<256x256xbf16>, vector<256x128xbf16>, vector<256x128xf32> -> vector<256x128xf32>
    %7 = arith.addf %3, %6 : vector<256x128xf32>
    %c0_6 = arith.constant 0 : index
    %c0_7 = arith.constant 0 : index
    %8 = vector.load %arg7[%c0_6, %c0_7] : memref<256x128xf32, #tpu.memory_space<vmem>>, vector<256x128xf32>
    tpu.vector_store %arg7[%c0_6, %c0_7], %7 {strides = array<i32>} : memref<256x128xf32, #tpu.memory_space<vmem>>, vector<256x128xf32>,
    %c0_i32_8 = arith.constant 0 : i32
    %9 = arith.cmpi eq, %arg2, %c0_i32_8 : i32
    %10 = arith.extui %9 : i1 to i32
    %c0_i32_9 = arith.constant 0 : i32
    %11 = arith.cmpi ne, %10, %c0_i32_9 : i32
    scf.if %11 {
      %c0_10 = arith.constant 0 : index
      %c0_11 = arith.constant 0 : index
      %12 = vector.load %arg7[%c0_10, %c0_11] : memref<256x128xf32, #tpu.memory_space<vmem>>, vector<256x128xf32>
      %c0_12 = arith.constant 0 : index
      %c0_13 = arith.constant 0 : index
      %13 = vector.load %arg5[%c0_12, %c0_13] : memref<1x128xf32, #tpu.memory_space<vmem>>, vector<1x128xf32>
      %14 = vector.broadcast %13 : vector<1x128xf32> to vector<256x128xf32>
      %15 = arith.addf %12, %14 : vector<256x128xf32>
      %cst_14 = arith.constant 0.000000e+00 : f32
      %16 = vector.broadcast %cst_14 : f32 to vector<256x128xf32>
      %17 = arith.maximumf %15, %16 : vector<256x128xf32>
      %c0_15 = arith.constant 0 : index
      %c0_16 = arith.constant 0 : index
      %18 = vector.load %arg6[%c0_15, %c0_16] : memref<256x128xf32, #tpu.memory_space<vmem>>, vector<256x128xf32>
      tpu.vector_store %arg6[%c0_15, %c0_16], %17 {strides = array<i32>} : memref<256x128xf32, #tpu.memory_space<vmem>>, vector<256x128xf32>,
    } else {
    }
    return
  }
  func.func @transform_0(%arg0: i32, %arg1: i32, %arg2: i32) -> (i32, i32) {
    %c0_i32 = arith.constant 0 : i32
    return %arg0, %arg2 : i32, i32
  }
  func.func @transform_1(%arg0: i32, %arg1: i32, %arg2: i32) -> (i32, i32) {
    %c0_i32 = arith.constant 0 : i32
    return %arg2, %arg1 : i32, i32
  }
  func.func @transform_2(%arg0: i32, %arg1: i32, %arg2: i32) -> (i32, i32) {
    %c0_i32 = arith.constant 0 : i32
    %c0_i32_0 = arith.constant 0 : i32
    return %c0_i32, %arg1 : i32, i32
  }
  func.func @transform_3(%arg0: i32, %arg1: i32, %arg2: i32) -> (i32, i32) {
    %c0_i32 = arith.constant 0 : i32
    return %arg0, %arg1 : i32, i32
  }
}

module attributes {stable_mosaic.version = 11 : i64} {
  func.func @_mm_kernel(%arg0: i32, %arg1: i32, %arg2: i32, %arg3: memref<256x128xbf16, #tpu.memory_space<vmem>>, %arg4: memref<128x128xbf16, #tpu.memory_space<vmem>>, %arg5: memref<1x128xf32, #tpu.memory_space<vmem>>, %arg6: memref<256x128xf32, #tpu.memory_space<vmem>>, %arg7: memref<256x128xf32, #tpu.memory_space<vmem>>) attributes {dimension_semantics = [#tpu.dimension_semantics<parallel>, #tpu.dimension_semantics<parallel>, #tpu.dimension_semantics<arbitrary>], iteration_bounds = array<i64: 2, 1, 1>, scalar_prefetch = 0 : i64, scratch_operands = 1 : i64, tpu.core_type = #tpu.core_type<tc>, window_params = [{transform_indices = @transform_0, window_bounds = array<i64: 256, 128>}, {transform_indices = @transform_1, window_bounds = array<i64: 128, 128>}, {transform_indices = @transform_2, window_bounds = array<i64: 1, 128>}, {transform_indices = @transform_3, window_bounds = array<i64: 256, 128>}]} {
    %c0_i32 = arith.constant 0 : i32
    %0 = arith.cmpi eq, %arg2, %c0_i32 : i32
    %1 = arith.extui %0 : i1 to i32
    %c0_i32_0 = arith.constant 0 : i32
    %2 = arith.cmpi ne, %1, %c0_i32_0 : i32
    scf.if %2 {
      %cst_10 = arith.constant 0.000000e+00 : f32
      %12 = vector.broadcast %cst_10 : f32 to vector<256x128xf32>
      %c0_11 = arith.constant 0 : index
      %c0_12 = arith.constant 0 : index
      %13 = vector.load %arg7[%c0_11, %c0_12] : memref<256x128xf32, #tpu.memory_space<vmem>>, vector<256x128xf32>
      tpu.vector_store %arg7[%c0_11, %c0_12], %12 {strides = array<i32>} : memref<256x128xf32, #tpu.memory_space<vmem>>, vector<256x128xf32>,
    } else {
    }
    %c0 = arith.constant 0 : index
    %c0_1 = arith.constant 0 : index
    %3 = vector.load %arg7[%c0, %c0_1] : memref<256x128xf32, #tpu.memory_space<vmem>>, vector<256x128xf32>
    %c0_2 = arith.constant 0 : index
    %c0_3 = arith.constant 0 : index
    %4 = vector.load %arg3[%c0_2, %c0_3] : memref<256x128xbf16, #tpu.memory_space<vmem>>, vector<256x128xbf16>
    %c0_4 = arith.constant 0 : index
    %c0_5 = arith.constant 0 : index
    %5 = vector.load %arg4[%c0_4, %c0_5] : memref<128x128xbf16, #tpu.memory_space<vmem>>, vector<128x128xbf16>
    %cst = arith.constant dense<0.000000e+00> : vector<256x128xf32>
    %6 = tpu.matmul %4, %5, %cst {dimension_numbers = #tpu.dot_dimension_numbers<[1], [0], [0], [1], [0, 0, 1, 1], [], []>} : vector<256x128xbf16>, vector<128x128xbf16>, vector<256x128xf32> -> vector<256x128xf32>
    %7 = arith.addf %3, %6 : vector<256x128xf32>
    %c0_6 = arith.constant 0 : index
    %c0_7 = arith.constant 0 : index
    %8 = vector.load %arg7[%c0_6, %c0_7] : memref<256x128xf32, #tpu.memory_space<vmem>>, vector<256x128xf32>
    tpu.vector_store %arg7[%c0_6, %c0_7], %7 {strides = array<i32>} : memref<256x128xf32, #tpu.memory_space<vmem>>, vector<256x128xf32>,
    %c0_i32_8 = arith.constant 0 : i32
    %9 = arith.cmpi eq, %arg2, %c0_i32_8 : i32
    %10 = arith.extui %9 : i1 to i32
    %c0_i32_9 = arith.constant 0 : i32
    %11 = arith.cmpi ne, %10, %c0_i32_9 : i32
    scf.if %11 {
      %c0_10 = arith.constant 0 : index
      %c0_11 = arith.constant 0 : index
      %12 = vector.load %arg7[%c0_10, %c0_11] : memref<256x128xf32, #tpu.memory_space<vmem>>, vector<256x128xf32>
      %c0_12 = arith.constant 0 : index
      %c0_13 = arith.constant 0 : index
      %13 = vector.load %arg5[%c0_12, %c0_13] : memref<1x128xf32, #tpu.memory_space<vmem>>, vector<1x128xf32>
      %14 = vector.broadcast %13 : vector<1x128xf32> to vector<256x128xf32>
      %15 = arith.addf %12, %14 : vector<256x128xf32>
      %c0_14 = arith.constant 0 : index
      %c0_15 = arith.constant 0 : index
      %16 = vector.load %arg6[%c0_14, %c0_15] : memref<256x128xf32, #tpu.memory_space<vmem>>, vector<256x128xf32>
      tpu.vector_store %arg6[%c0_14, %c0_15], %15 {strides = array<i32>} : memref<256x128xf32, #tpu.memory_space<vmem>>, vector<256x128xf32>,
    } else {
    }
    return
  }
  func.func @transform_0(%arg0: i32, %arg1: i32, %arg2: i32) -> (i32, i32) {
    %c0_i32 = arith.constant 0 : i32
    return %arg0, %arg2 : i32, i32
  }
  func.func @transform_1(%arg0: i32, %arg1: i32, %arg2: i32) -> (i32, i32) {
    %c0_i32 = arith.constant 0 : i32
    return %arg2, %arg1 : i32, i32
  }
  func.func @transform_2(%arg0: i32, %arg1: i32, %arg2: i32) -> (i32, i32) {
    %c0_i32 = arith.constant 0 : i32
    %c0_i32_0 = arith.constant 0 : i32
    return %c0_i32, %arg1 : i32, i32
  }
  func.func @transform_3(%arg0: i32, %arg1: i32, %arg2: i32) -> (i32, i32) {
    %c0_i32 = arith.constant 0 : i32
    return %arg0, %arg1 : i32, i32
  }
}

module attributes {stable_mosaic.version = 11 : i64} {
  func.func @_mm_kernel(%arg0: i32, %arg1: i32, %arg2: i32, %arg3: memref<256x128xbf16, #tpu.memory_space<vmem>>, %arg4: memref<128x128xbf16, #tpu.memory_space<vmem>>, %arg5: memref<1x128xf32, #tpu.memory_space<vmem>>, %arg6: memref<256x128xf32, #tpu.memory_space<vmem>>, %arg7: memref<256x128xf32, #tpu.memory_space<vmem>>) attributes {dimension_semantics = [#tpu.dimension_semantics<parallel>, #tpu.dimension_semantics<parallel>, #tpu.dimension_semantics<arbitrary>], iteration_bounds = array<i64: 2, 1, 1>, scalar_prefetch = 0 : i64, scratch_operands = 1 : i64, tpu.core_type = #tpu.core_type<tc>, window_params = [{transform_indices = @transform_0, window_bounds = array<i64: 256, 128>}, {transform_indices = @transform_1, window_bounds = array<i64: 128, 128>}, {transform_indices = @transform_2, window_bounds = array<i64: 1, 128>}, {transform_indices = @transform_3, window_bounds = array<i64: 256, 128>}]} {
    %c0_i32 = arith.constant 0 : i32
    %0 = arith.cmpi eq, %arg2, %c0_i32 : i32
    %1 = arith.extui %0 : i1 to i32
    %c0_i32_0 = arith.constant 0 : i32
    %2 = arith.cmpi ne, %1, %c0_i32_0 : i32
    scf.if %2 {
      %cst_10 = arith.constant 0.000000e+00 : f32
      %12 = vector.broadcast %cst_10 : f32 to vector<256x128xf32>
      %c0_11 = arith.constant 0 : index
      %c0_12 = arith.constant 0 : index
      %13 = vector.load %arg7[%c0_11, %c0_12] : memref<256x128xf32, #tpu.memory_space<vmem>>, vector<256x128xf32>
      tpu.vector_store %arg7[%c0_11, %c0_12], %12 {strides = array<i32>} : memref<256x128xf32, #tpu.memory_space<vmem>>, vector<256x128xf32>,
    } else {
    }
    %c0 = arith.constant 0 : index
    %c0_1 = arith.constant 0 : index
    %3 = vector.load %arg7[%c0, %c0_1] : memref<256x128xf32, #tpu.memory_space<vmem>>, vector<256x128xf32>
    %c0_2 = arith.constant 0 : index
    %c0_3 = arith.constant 0 : index
    %4 = vector.load %arg3[%c0_2, %c0_3] : memref<256x128xbf16, #tpu.memory_space<vmem>>, vector<256x128xbf16>
    %c0_4 = arith.constant 0 : index
    %c0_5 = arith.constant 0 : index
    %5 = vector.load %arg4[%c0_4, %c0_5] : memref<128x128xbf16, #tpu.memory_space<vmem>>, vector<128x128xbf16>
    %cst = arith.constant dense<0.000000e+00> : vector<256x128xf32>
    %6 = tpu.matmul %4, %5, %cst {dimension_numbers = #tpu.dot_dimension_numbers<[1], [0], [0], [1], [0, 0, 1, 1], [], []>} : vector<256x128xbf16>, vector<128x128xbf16>, vector<256x128xf32> -> vector<256x128xf32>
    %7 = arith.addf %3, %6 : vector<256x128xf32>
    %c0_6 = arith.constant 0 : index
    %c0_7 = arith.constant 0 : index
    %8 = vector.load %arg7[%c0_6, %c0_7] : memref<256x128xf32, #tpu.memory_space<vmem>>, vector<256x128xf32>
    tpu.vector_store %arg7[%c0_6, %c0_7], %7 {strides = array<i32>} : memref<256x128xf32, #tpu.memory_space<vmem>>, vector<256x128xf32>,
    %c0_i32_8 = arith.constant 0 : i32
    %9 = arith.cmpi eq, %arg2, %c0_i32_8 : i32
    %10 = arith.extui %9 : i1 to i32
    %c0_i32_9 = arith.constant 0 : i32
    %11 = arith.cmpi ne, %10, %c0_i32_9 : i32
    scf.if %11 {
      %c0_10 = arith.constant 0 : index
      %c0_11 = arith.constant 0 : index
      %12 = vector.load %arg7[%c0_10, %c0_11] : memref<256x128xf32, #tpu.memory_space<vmem>>, vector<256x128xf32>
      %c0_12 = arith.constant 0 : index
      %c0_13 = arith.constant 0 : index
      %13 = vector.load %arg5[%c0_12, %c0_13] : memref<1x128xf32, #tpu.memory_space<vmem>>, vector<1x128xf32>
      %14 = vector.broadcast %13 : vector<1x128xf32> to vector<256x128xf32>
      %15 = arith.addf %12, %14 : vector<256x128xf32>
      %cst_14 = arith.constant 0.000000e+00 : f32
      %16 = vector.broadcast %cst_14 : f32 to vector<256x128xf32>
      %17 = arith.maximumf %15, %16 : vector<256x128xf32>
      %c0_15 = arith.constant 0 : index
      %c0_16 = arith.constant 0 : index
      %18 = vector.load %arg6[%c0_15, %c0_16] : memref<256x128xf32, #tpu.memory_space<vmem>>, vector<256x128xf32>
      tpu.vector_store %arg6[%c0_15, %c0_16], %17 {strides = array<i32>} : memref<256x128xf32, #tpu.memory_space<vmem>>, vector<256x128xf32>,
    } else {
    }
    return
  }
  func.func @transform_0(%arg0: i32, %arg1: i32, %arg2: i32) -> (i32, i32) {
    %c0_i32 = arith.constant 0 : i32
    return %arg0, %arg2 : i32, i32
  }
  func.func @transform_1(%arg0: i32, %arg1: i32, %arg2: i32) -> (i32, i32) {
    %c0_i32 = arith.constant 0 : i32
    return %arg2, %arg1 : i32, i32
  }
  func.func @transform_2(%arg0: i32, %arg1: i32, %arg2: i32) -> (i32, i32) {
    %c0_i32 = arith.constant 0 : i32
    %c0_i32_0 = arith.constant 0 : i32
    return %c0_i32, %arg1 : i32, i32
  }
  func.func @transform_3(%arg0: i32, %arg1: i32, %arg2: i32) -> (i32, i32) {
    %c0_i32 = arith.constant 0 : i32
    return %arg0, %arg1 : i32, i32
  }
}

module attributes {stable_mosaic.version = 11 : i64} {
  func.func @_mm_res_kernel(%arg0: i32, %arg1: i32, %arg2: i32, %arg3: memref<256x128xbf16, #tpu.memory_space<vmem>>, %arg4: memref<128x128xbf16, #tpu.memory_space<vmem>>, %arg5: memref<1x128xf32, #tpu.memory_space<vmem>>, %arg6: memref<256x128xf32, #tpu.memory_space<vmem>>, %arg7: memref<256x128xf32, #tpu.memory_space<vmem>>, %arg8: memref<256x128xf32, #tpu.memory_space<vmem>>) attributes {dimension_semantics = [#tpu.dimension_semantics<parallel>, #tpu.dimension_semantics<parallel>, #tpu.dimension_semantics<arbitrary>], iteration_bounds = array<i64: 2, 1, 1>, scalar_prefetch = 0 : i64, scratch_operands = 1 : i64, tpu.core_type = #tpu.core_type<tc>, window_params = [{transform_indices = @transform_0, window_bounds = array<i64: 256, 128>}, {transform_indices = @transform_1, window_bounds = array<i64: 128, 128>}, {transform_indices = @transform_2, window_bounds = array<i64: 1, 128>}, {transform_indices = @transform_3, window_bounds = array<i64: 256, 128>}, {transform_indices = @transform_4, window_bounds = array<i64: 256, 128>}]} {
    %c0_i32 = arith.constant 0 : i32
    %0 = arith.cmpi eq, %arg2, %c0_i32 : i32
    %1 = arith.extui %0 : i1 to i32
    %c0_i32_0 = arith.constant 0 : i32
    %2 = arith.cmpi ne, %1, %c0_i32_0 : i32
    scf.if %2 {
      %cst_10 = arith.constant 0.000000e+00 : f32
      %12 = vector.broadcast %cst_10 : f32 to vector<256x128xf32>
      %c0_11 = arith.constant 0 : index
      %c0_12 = arith.constant 0 : index
      %13 = vector.load %arg8[%c0_11, %c0_12] : memref<256x128xf32, #tpu.memory_space<vmem>>, vector<256x128xf32>
      tpu.vector_store %arg8[%c0_11, %c0_12], %12 {strides = array<i32>} : memref<256x128xf32, #tpu.memory_space<vmem>>, vector<256x128xf32>,
    } else {
    }
    %c0 = arith.constant 0 : index
    %c0_1 = arith.constant 0 : index
    %3 = vector.load %arg8[%c0, %c0_1] : memref<256x128xf32, #tpu.memory_space<vmem>>, vector<256x128xf32>
    %c0_2 = arith.constant 0 : index
    %c0_3 = arith.constant 0 : index
    %4 = vector.load %arg3[%c0_2, %c0_3] : memref<256x128xbf16, #tpu.memory_space<vmem>>, vector<256x128xbf16>
    %c0_4 = arith.constant 0 : index
    %c0_5 = arith.constant 0 : index
    %5 = vector.load %arg4[%c0_4, %c0_5] : memref<128x128xbf16, #tpu.memory_space<vmem>>, vector<128x128xbf16>
    %cst = arith.constant dense<0.000000e+00> : vector<256x128xf32>
    %6 = tpu.matmul %4, %5, %cst {dimension_numbers = #tpu.dot_dimension_numbers<[1], [0], [0], [1], [0, 0, 1, 1], [], []>} : vector<256x128xbf16>, vector<128x128xbf16>, vector<256x128xf32> -> vector<256x128xf32>
    %7 = arith.addf %3, %6 : vector<256x128xf32>
    %c0_6 = arith.constant 0 : index
    %c0_7 = arith.constant 0 : index
    %8 = vector.load %arg8[%c0_6, %c0_7] : memref<256x128xf32, #tpu.memory_space<vmem>>, vector<256x128xf32>
    tpu.vector_store %arg8[%c0_6, %c0_7], %7 {strides = array<i32>} : memref<256x128xf32, #tpu.memory_space<vmem>>, vector<256x128xf32>,
    %c0_i32_8 = arith.constant 0 : i32
    %9 = arith.cmpi eq, %arg2, %c0_i32_8 : i32
    %10 = arith.extui %9 : i1 to i32
    %c0_i32_9 = arith.constant 0 : i32
    %11 = arith.cmpi ne, %10, %c0_i32_9 : i32
    scf.if %11 {
      %c0_10 = arith.constant 0 : index
      %c0_11 = arith.constant 0 : index
      %12 = vector.load %arg8[%c0_10, %c0_11] : memref<256x128xf32, #tpu.memory_space<vmem>>, vector<256x128xf32>
      %c0_12 = arith.constant 0 : index
      %c0_13 = arith.constant 0 : index
      %13 = vector.load %arg5[%c0_12, %c0_13] : memref<1x128xf32, #tpu.memory_space<vmem>>, vector<1x128xf32>
      %14 = vector.broadcast %13 : vector<1x128xf32> to vector<256x128xf32>
      %15 = arith.addf %12, %14 : vector<256x128xf32>
      %c0_14 = arith.constant 0 : index
      %c0_15 = arith.constant 0 : index
      %16 = vector.load %arg6[%c0_14, %c0_15] : memref<256x128xf32, #tpu.memory_space<vmem>>, vector<256x128xf32>
      %17 = arith.addf %15, %16 : vector<256x128xf32>
      %cst_16 = arith.constant 0.000000e+00 : f32
      %18 = vector.broadcast %cst_16 : f32 to vector<256x128xf32>
      %19 = arith.maximumf %17, %18 : vector<256x128xf32>
      %c0_17 = arith.constant 0 : index
      %c0_18 = arith.constant 0 : index
      %20 = vector.load %arg7[%c0_17, %c0_18] : memref<256x128xf32, #tpu.memory_space<vmem>>, vector<256x128xf32>
      tpu.vector_store %arg7[%c0_17, %c0_18], %19 {strides = array<i32>} : memref<256x128xf32, #tpu.memory_space<vmem>>, vector<256x128xf32>,
    } else {
    }
    return
  }
  func.func @transform_0(%arg0: i32, %arg1: i32, %arg2: i32) -> (i32, i32) {
    %c0_i32 = arith.constant 0 : i32
    return %arg0, %arg2 : i32, i32
  }
  func.func @transform_1(%arg0: i32, %arg1: i32, %arg2: i32) -> (i32, i32) {
    %c0_i32 = arith.constant 0 : i32
    return %arg2, %arg1 : i32, i32
  }
  func.func @transform_2(%arg0: i32, %arg1: i32, %arg2: i32) -> (i32, i32) {
    %c0_i32 = arith.constant 0 : i32
    %c0_i32_0 = arith.constant 0 : i32
    return %c0_i32, %arg1 : i32, i32
  }
  func.func @transform_3(%arg0: i32, %arg1: i32, %arg2: i32) -> (i32, i32) {
    %c0_i32 = arith.constant 0 : i32
    return %arg0, %arg1 : i32, i32
  }
  func.func @transform_4(%arg0: i32, %arg1: i32, %arg2: i32) -> (i32, i32) {
    %c0_i32 = arith.constant 0 : i32
    return %arg0, %arg1 : i32, i32
  }
}

module attributes {stable_mosaic.version = 11 : i64} {
  func.func @_mm_kernel(%arg0: i32, %arg1: i32, %arg2: i32, %arg3: memref<128x128xbf16, #tpu.memory_space<vmem>>, %arg4: memref<128x128xbf16, #tpu.memory_space<vmem>>, %arg5: memref<1x128xf32, #tpu.memory_space<vmem>>, %arg6: memref<128x128xf32, #tpu.memory_space<vmem>>, %arg7: memref<128x128xf32, #tpu.memory_space<vmem>>) attributes {dimension_semantics = [#tpu.dimension_semantics<parallel>, #tpu.dimension_semantics<parallel>, #tpu.dimension_semantics<arbitrary>], iteration_bounds = array<i64: 1, 1, 1>, scalar_prefetch = 0 : i64, scratch_operands = 1 : i64, tpu.core_type = #tpu.core_type<tc>, window_params = [{transform_indices = @transform_0, window_bounds = array<i64: 128, 128>}, {transform_indices = @transform_1, window_bounds = array<i64: 128, 128>}, {transform_indices = @transform_2, window_bounds = array<i64: 1, 128>}, {transform_indices = @transform_3, window_bounds = array<i64: 128, 128>}]} {
    %c0_i32 = arith.constant 0 : i32
    %0 = arith.cmpi eq, %arg2, %c0_i32 : i32
    %1 = arith.extui %0 : i1 to i32
    %c0_i32_0 = arith.constant 0 : i32
    %2 = arith.cmpi ne, %1, %c0_i32_0 : i32
    scf.if %2 {
      %cst_10 = arith.constant 0.000000e+00 : f32
      %12 = vector.broadcast %cst_10 : f32 to vector<128x128xf32>
      %c0_11 = arith.constant 0 : index
      %c0_12 = arith.constant 0 : index
      %13 = vector.load %arg7[%c0_11, %c0_12] : memref<128x128xf32, #tpu.memory_space<vmem>>, vector<128x128xf32>
      tpu.vector_store %arg7[%c0_11, %c0_12], %12 {strides = array<i32>} : memref<128x128xf32, #tpu.memory_space<vmem>>, vector<128x128xf32>,
    } else {
    }
    %c0 = arith.constant 0 : index
    %c0_1 = arith.constant 0 : index
    %3 = vector.load %arg7[%c0, %c0_1] : memref<128x128xf32, #tpu.memory_space<vmem>>, vector<128x128xf32>
    %c0_2 = arith.constant 0 : index
    %c0_3 = arith.constant 0 : index
    %4 = vector.load %arg3[%c0_2, %c0_3] : memref<128x128xbf16, #tpu.memory_space<vmem>>, vector<128x128xbf16>
    %c0_4 = arith.constant 0 : index
    %c0_5 = arith.constant 0 : index
    %5 = vector.load %arg4[%c0_4, %c0_5] : memref<128x128xbf16, #tpu.memory_space<vmem>>, vector<128x128xbf16>
    %cst = arith.constant dense<0.000000e+00> : vector<128x128xf32>
    %6 = tpu.matmul %4, %5, %cst {dimension_numbers = #tpu.dot_dimension_numbers<[1], [0], [0], [1], [0, 0, 1, 1], [], []>} : vector<128x128xbf16>, vector<128x128xbf16>, vector<128x128xf32> -> vector<128x128xf32>
    %7 = arith.addf %3, %6 : vector<128x128xf32>
    %c0_6 = arith.constant 0 : index
    %c0_7 = arith.constant 0 : index
    %8 = vector.load %arg7[%c0_6, %c0_7] : memref<128x128xf32, #tpu.memory_space<vmem>>, vector<128x128xf32>
    tpu.vector_store %arg7[%c0_6, %c0_7], %7 {strides = array<i32>} : memref<128x128xf32, #tpu.memory_space<vmem>>, vector<128x128xf32>,
    %c0_i32_8 = arith.constant 0 : i32
    %9 = arith.cmpi eq, %arg2, %c0_i32_8 : i32
    %10 = arith.extui %9 : i1 to i32
    %c0_i32_9 = arith.constant 0 : i32
    %11 = arith.cmpi ne, %10, %c0_i32_9 : i32
    scf.if %11 {
      %c0_10 = arith.constant 0 : index
      %c0_11 = arith.constant 0 : index
      %12 = vector.load %arg7[%c0_10, %c0_11] : memref<128x128xf32, #tpu.memory_space<vmem>>, vector<128x128xf32>
      %c0_12 = arith.constant 0 : index
      %c0_13 = arith.constant 0 : index
      %13 = vector.load %arg5[%c0_12, %c0_13] : memref<1x128xf32, #tpu.memory_space<vmem>>, vector<1x128xf32>
      %14 = vector.broadcast %13 : vector<1x128xf32> to vector<128x128xf32>
      %15 = arith.addf %12, %14 : vector<128x128xf32>
      %c0_14 = arith.constant 0 : index
      %c0_15 = arith.constant 0 : index
      %16 = vector.load %arg6[%c0_14, %c0_15] : memref<128x128xf32, #tpu.memory_space<vmem>>, vector<128x128xf32>
      tpu.vector_store %arg6[%c0_14, %c0_15], %15 {strides = array<i32>} : memref<128x128xf32, #tpu.memory_space<vmem>>, vector<128x128xf32>,
    } else {
    }
    return
  }
  func.func @transform_0(%arg0: i32, %arg1: i32, %arg2: i32) -> (i32, i32) {
    %c0_i32 = arith.constant 0 : i32
    return %arg0, %arg2 : i32, i32
  }
  func.func @transform_1(%arg0: i32, %arg1: i32, %arg2: i32) -> (i32, i32) {
    %c0_i32 = arith.constant 0 : i32
    return %arg2, %arg1 : i32, i32
  }
  func.func @transform_2(%arg0: i32, %arg1: i32, %arg2: i32) -> (i32, i32) {
    %c0_i32 = arith.constant 0 : i32
    %c0_i32_0 = arith.constant 0 : i32
    return %c0_i32, %arg1 : i32, i32
  }
  func.func @transform_3(%arg0: i32, %arg1: i32, %arg2: i32) -> (i32, i32) {
    %c0_i32 = arith.constant 0 : i32
    return %arg0, %arg1 : i32, i32
  }
}

module attributes {stable_mosaic.version = 11 : i64} {
  func.func @_mm_res_kernel(%arg0: i32, %arg1: i32, %arg2: i32, %arg3: memref<128x128xbf16, #tpu.memory_space<vmem>>, %arg4: memref<128x128xbf16, #tpu.memory_space<vmem>>, %arg5: memref<1x128xf32, #tpu.memory_space<vmem>>, %arg6: memref<128x128xf32, #tpu.memory_space<vmem>>, %arg7: memref<128x128xf32, #tpu.memory_space<vmem>>, %arg8: memref<128x128xf32, #tpu.memory_space<vmem>>) attributes {dimension_semantics = [#tpu.dimension_semantics<parallel>, #tpu.dimension_semantics<parallel>, #tpu.dimension_semantics<arbitrary>], iteration_bounds = array<i64: 1, 1, 1>, scalar_prefetch = 0 : i64, scratch_operands = 1 : i64, tpu.core_type = #tpu.core_type<tc>, window_params = [{transform_indices = @transform_0, window_bounds = array<i64: 128, 128>}, {transform_indices = @transform_1, window_bounds = array<i64: 128, 128>}, {transform_indices = @transform_2, window_bounds = array<i64: 1, 128>}, {transform_indices = @transform_3, window_bounds = array<i64: 128, 128>}, {transform_indices = @transform_4, window_bounds = array<i64: 128, 128>}]} {
    %c0_i32 = arith.constant 0 : i32
    %0 = arith.cmpi eq, %arg2, %c0_i32 : i32
    %1 = arith.extui %0 : i1 to i32
    %c0_i32_0 = arith.constant 0 : i32
    %2 = arith.cmpi ne, %1, %c0_i32_0 : i32
    scf.if %2 {
      %cst_10 = arith.constant 0.000000e+00 : f32
      %12 = vector.broadcast %cst_10 : f32 to vector<128x128xf32>
      %c0_11 = arith.constant 0 : index
      %c0_12 = arith.constant 0 : index
      %13 = vector.load %arg8[%c0_11, %c0_12] : memref<128x128xf32, #tpu.memory_space<vmem>>, vector<128x128xf32>
      tpu.vector_store %arg8[%c0_11, %c0_12], %12 {strides = array<i32>} : memref<128x128xf32, #tpu.memory_space<vmem>>, vector<128x128xf32>,
    } else {
    }
    %c0 = arith.constant 0 : index
    %c0_1 = arith.constant 0 : index
    %3 = vector.load %arg8[%c0, %c0_1] : memref<128x128xf32, #tpu.memory_space<vmem>>, vector<128x128xf32>
    %c0_2 = arith.constant 0 : index
    %c0_3 = arith.constant 0 : index
    %4 = vector.load %arg3[%c0_2, %c0_3] : memref<128x128xbf16, #tpu.memory_space<vmem>>, vector<128x128xbf16>
    %c0_4 = arith.constant 0 : index
    %c0_5 = arith.constant 0 : index
    %5 = vector.load %arg4[%c0_4, %c0_5] : memref<128x128xbf16, #tpu.memory_space<vmem>>, vector<128x128xbf16>
    %cst = arith.constant dense<0.000000e+00> : vector<128x128xf32>
    %6 = tpu.matmul %4, %5, %cst {dimension_numbers = #tpu.dot_dimension_numbers<[1], [0], [0], [1], [0, 0, 1, 1], [], []>} : vector<128x128xbf16>, vector<128x128xbf16>, vector<128x128xf32> -> vector<128x128xf32>
    %7 = arith.addf %3, %6 : vector<128x128xf32>
    %c0_6 = arith.constant 0 : index
    %c0_7 = arith.constant 0 : index
    %8 = vector.load %arg8[%c0_6, %c0_7] : memref<128x128xf32, #tpu.memory_space<vmem>>, vector<128x128xf32>
    tpu.vector_store %arg8[%c0_6, %c0_7], %7 {strides = array<i32>} : memref<128x128xf32, #tpu.memory_space<vmem>>, vector<128x128xf32>,
    %c0_i32_8 = arith.constant 0 : i32
    %9 = arith.cmpi eq, %arg2, %c0_i32_8 : i32
    %10 = arith.extui %9 : i1 to i32
    %c0_i32_9 = arith.constant 0 : i32
    %11 = arith.cmpi ne, %10, %c0_i32_9 : i32
    scf.if %11 {
      %c0_10 = arith.constant 0 : index
      %c0_11 = arith.constant 0 : index
      %12 = vector.load %arg8[%c0_10, %c0_11] : memref<128x128xf32, #tpu.memory_space<vmem>>, vector<128x128xf32>
      %c0_12 = arith.constant 0 : index
      %c0_13 = arith.constant 0 : index
      %13 = vector.load %arg5[%c0_12, %c0_13] : memref<1x128xf32, #tpu.memory_space<vmem>>, vector<1x128xf32>
      %14 = vector.broadcast %13 : vector<1x128xf32> to vector<128x128xf32>
      %15 = arith.addf %12, %14 : vector<128x128xf32>
      %c0_14 = arith.constant 0 : index
      %c0_15 = arith.constant 0 : index
      %16 = vector.load %arg6[%c0_14, %c0_15] : memref<128x128xf32, #tpu.memory_space<vmem>>, vector<128x128xf32>
      %17 = arith.addf %15, %16 : vector<128x128xf32>
      %cst_16 = arith.constant 0.000000e+00 : f32
      %18 = vector.broadcast %cst_16 : f32 to vector<128x128xf32>
      %19 = arith.maximumf %17, %18 : vector<128x128xf32>
      %c0_17 = arith.constant 0 : index
      %c0_18 = arith.constant 0 : index
      %20 = vector.load %arg7[%c0_17, %c0_18] : memref<128x128xf32, #tpu.memory_space<vmem>>, vector<128x128xf32>
      tpu.vector_store %arg7[%c0_17, %c0_18], %19 {strides = array<i32>} : memref<128x128xf32, #tpu.memory_space<vmem>>, vector<128x128xf32>,
    } else {
    }
    return
  }
  func.func @transform_0(%arg0: i32, %arg1: i32, %arg2: i32) -> (i32, i32) {
    %c0_i32 = arith.constant 0 : i32
    return %arg0, %arg2 : i32, i32
  }
  func.func @transform_1(%arg0: i32, %arg1: i32, %arg2: i32) -> (i32, i32) {
    %c0_i32 = arith.constant 0 : i32
    return %arg2, %arg1 : i32, i32
  }
  func.func @transform_2(%arg0: i32, %arg1: i32, %arg2: i32) -> (i32, i32) {
    %c0_i32 = arith.constant 0 : i32
    %c0_i32_0 = arith.constant 0 : i32
    return %c0_i32, %arg1 : i32, i32
  }
  func.func @transform_3(%arg0: i32, %arg1: i32, %arg2: i32) -> (i32, i32) {
    %c0_i32 = arith.constant 0 : i32
    return %arg0, %arg1 : i32, i32
  }
  func.func @transform_4(%arg0: i32, %arg1: i32, %arg2: i32) -> (i32, i32) {
    %c0_i32 = arith.constant 0 : i32
    return %arg0, %arg1 : i32, i32
  }
}

module attributes {stable_mosaic.version = 11 : i64} {
  func.func @_mm_kernel(%arg0: i32, %arg1: i32, %arg2: i32, %arg3: memref<128x128xbf16, #tpu.memory_space<vmem>>, %arg4: memref<128x128xbf16, #tpu.memory_space<vmem>>, %arg5: memref<1x128xf32, #tpu.memory_space<vmem>>, %arg6: memref<128x128xf32, #tpu.memory_space<vmem>>, %arg7: memref<128x128xf32, #tpu.memory_space<vmem>>) attributes {dimension_semantics = [#tpu.dimension_semantics<parallel>, #tpu.dimension_semantics<parallel>, #tpu.dimension_semantics<arbitrary>], iteration_bounds = array<i64: 1, 1, 1>, scalar_prefetch = 0 : i64, scratch_operands = 1 : i64, tpu.core_type = #tpu.core_type<tc>, window_params = [{transform_indices = @transform_0, window_bounds = array<i64: 128, 128>}, {transform_indices = @transform_1, window_bounds = array<i64: 128, 128>}, {transform_indices = @transform_2, window_bounds = array<i64: 1, 128>}, {transform_indices = @transform_3, window_bounds = array<i64: 128, 128>}]} {
    %c0_i32 = arith.constant 0 : i32
    %0 = arith.cmpi eq, %arg2, %c0_i32 : i32
    %1 = arith.extui %0 : i1 to i32
    %c0_i32_0 = arith.constant 0 : i32
    %2 = arith.cmpi ne, %1, %c0_i32_0 : i32
    scf.if %2 {
      %cst_10 = arith.constant 0.000000e+00 : f32
      %12 = vector.broadcast %cst_10 : f32 to vector<128x128xf32>
      %c0_11 = arith.constant 0 : index
      %c0_12 = arith.constant 0 : index
      %13 = vector.load %arg7[%c0_11, %c0_12] : memref<128x128xf32, #tpu.memory_space<vmem>>, vector<128x128xf32>
      tpu.vector_store %arg7[%c0_11, %c0_12], %12 {strides = array<i32>} : memref<128x128xf32, #tpu.memory_space<vmem>>, vector<128x128xf32>,
    } else {
    }
    %c0 = arith.constant 0 : index
    %c0_1 = arith.constant 0 : index
    %3 = vector.load %arg7[%c0, %c0_1] : memref<128x128xf32, #tpu.memory_space<vmem>>, vector<128x128xf32>
    %c0_2 = arith.constant 0 : index
    %c0_3 = arith.constant 0 : index
    %4 = vector.load %arg3[%c0_2, %c0_3] : memref<128x128xbf16, #tpu.memory_space<vmem>>, vector<128x128xbf16>
    %c0_4 = arith.constant 0 : index
    %c0_5 = arith.constant 0 : index
    %5 = vector.load %arg4[%c0_4, %c0_5] : memref<128x128xbf16, #tpu.memory_space<vmem>>, vector<128x128xbf16>
    %cst = arith.constant dense<0.000000e+00> : vector<128x128xf32>
    %6 = tpu.matmul %4, %5, %cst {dimension_numbers = #tpu.dot_dimension_numbers<[1], [0], [0], [1], [0, 0, 1, 1], [], []>} : vector<128x128xbf16>, vector<128x128xbf16>, vector<128x128xf32> -> vector<128x128xf32>
    %7 = arith.addf %3, %6 : vector<128x128xf32>
    %c0_6 = arith.constant 0 : index
    %c0_7 = arith.constant 0 : index
    %8 = vector.load %arg7[%c0_6, %c0_7] : memref<128x128xf32, #tpu.memory_space<vmem>>, vector<128x128xf32>
    tpu.vector_store %arg7[%c0_6, %c0_7], %7 {strides = array<i32>} : memref<128x128xf32, #tpu.memory_space<vmem>>, vector<128x128xf32>,
    %c0_i32_8 = arith.constant 0 : i32
    %9 = arith.cmpi eq, %arg2, %c0_i32_8 : i32
    %10 = arith.extui %9 : i1 to i32
    %c0_i32_9 = arith.constant 0 : i32
    %11 = arith.cmpi ne, %10, %c0_i32_9 : i32
    scf.if %11 {
      %c0_10 = arith.constant 0 : index
      %c0_11 = arith.constant 0 : index
      %12 = vector.load %arg7[%c0_10, %c0_11] : memref<128x128xf32, #tpu.memory_space<vmem>>, vector<128x128xf32>
      %c0_12 = arith.constant 0 : index
      %c0_13 = arith.constant 0 : index
      %13 = vector.load %arg5[%c0_12, %c0_13] : memref<1x128xf32, #tpu.memory_space<vmem>>, vector<1x128xf32>
      %14 = vector.broadcast %13 : vector<1x128xf32> to vector<128x128xf32>
      %15 = arith.addf %12, %14 : vector<128x128xf32>
      %cst_14 = arith.constant 0.000000e+00 : f32
      %16 = vector.broadcast %cst_14 : f32 to vector<128x128xf32>
      %17 = arith.maximumf %15, %16 : vector<128x128xf32>
      %c0_15 = arith.constant 0 : index
      %c0_16 = arith.constant 0 : index
      %18 = vector.load %arg6[%c0_15, %c0_16] : memref<128x128xf32, #tpu.memory_space<vmem>>, vector<128x128xf32>
      tpu.vector_store %arg6[%c0_15, %c0_16], %17 {strides = array<i32>} : memref<128x128xf32, #tpu.memory_space<vmem>>, vector<128x128xf32>,
    } else {
    }
    return
  }
  func.func @transform_0(%arg0: i32, %arg1: i32, %arg2: i32) -> (i32, i32) {
    %c0_i32 = arith.constant 0 : i32
    return %arg0, %arg2 : i32, i32
  }
  func.func @transform_1(%arg0: i32, %arg1: i32, %arg2: i32) -> (i32, i32) {
    %c0_i32 = arith.constant 0 : i32
    return %arg2, %arg1 : i32, i32
  }
  func.func @transform_2(%arg0: i32, %arg1: i32, %arg2: i32) -> (i32, i32) {
    %c0_i32 = arith.constant 0 : i32
    %c0_i32_0 = arith.constant 0 : i32
    return %c0_i32, %arg1 : i32, i32
  }
  func.func @transform_3(%arg0: i32, %arg1: i32, %arg2: i32) -> (i32, i32) {
    %c0_i32 = arith.constant 0 : i32
    return %arg0, %arg1 : i32, i32
  }
}

module attributes {stable_mosaic.version = 11 : i64} {
  func.func @_mm_kernel(%arg0: i32, %arg1: i32, %arg2: i32, %arg3: memref<32x128xbf16, #tpu.memory_space<vmem>>, %arg4: memref<128x128xbf16, #tpu.memory_space<vmem>>, %arg5: memref<1x128xf32, #tpu.memory_space<vmem>>, %arg6: memref<32x128xf32, #tpu.memory_space<vmem>>, %arg7: memref<32x128xf32, #tpu.memory_space<vmem>>) attributes {dimension_semantics = [#tpu.dimension_semantics<parallel>, #tpu.dimension_semantics<parallel>, #tpu.dimension_semantics<arbitrary>], iteration_bounds = array<i64: 1, 1, 1>, scalar_prefetch = 0 : i64, scratch_operands = 1 : i64, tpu.core_type = #tpu.core_type<tc>, window_params = [{transform_indices = @transform_0, window_bounds = array<i64: 32, 128>}, {transform_indices = @transform_1, window_bounds = array<i64: 128, 128>}, {transform_indices = @transform_2, window_bounds = array<i64: 1, 128>}, {transform_indices = @transform_3, window_bounds = array<i64: 32, 128>}]} {
    %c0_i32 = arith.constant 0 : i32
    %0 = arith.cmpi eq, %arg2, %c0_i32 : i32
    %1 = arith.extui %0 : i1 to i32
    %c0_i32_0 = arith.constant 0 : i32
    %2 = arith.cmpi ne, %1, %c0_i32_0 : i32
    scf.if %2 {
      %cst_10 = arith.constant 0.000000e+00 : f32
      %12 = vector.broadcast %cst_10 : f32 to vector<32x128xf32>
      %c0_11 = arith.constant 0 : index
      %c0_12 = arith.constant 0 : index
      %13 = vector.load %arg7[%c0_11, %c0_12] : memref<32x128xf32, #tpu.memory_space<vmem>>, vector<32x128xf32>
      tpu.vector_store %arg7[%c0_11, %c0_12], %12 {strides = array<i32>} : memref<32x128xf32, #tpu.memory_space<vmem>>, vector<32x128xf32>,
    } else {
    }
    %c0 = arith.constant 0 : index
    %c0_1 = arith.constant 0 : index
    %3 = vector.load %arg7[%c0, %c0_1] : memref<32x128xf32, #tpu.memory_space<vmem>>, vector<32x128xf32>
    %c0_2 = arith.constant 0 : index
    %c0_3 = arith.constant 0 : index
    %4 = vector.load %arg3[%c0_2, %c0_3] : memref<32x128xbf16, #tpu.memory_space<vmem>>, vector<32x128xbf16>
    %c0_4 = arith.constant 0 : index
    %c0_5 = arith.constant 0 : index
    %5 = vector.load %arg4[%c0_4, %c0_5] : memref<128x128xbf16, #tpu.memory_space<vmem>>, vector<128x128xbf16>
    %cst = arith.constant dense<0.000000e+00> : vector<32x128xf32>
    %6 = tpu.matmul %4, %5, %cst {dimension_numbers = #tpu.dot_dimension_numbers<[1], [0], [0], [1], [0, 0, 1, 1], [], []>} : vector<32x128xbf16>, vector<128x128xbf16>, vector<32x128xf32> -> vector<32x128xf32>
    %7 = arith.addf %3, %6 : vector<32x128xf32>
    %c0_6 = arith.constant 0 : index
    %c0_7 = arith.constant 0 : index
    %8 = vector.load %arg7[%c0_6, %c0_7] : memref<32x128xf32, #tpu.memory_space<vmem>>, vector<32x128xf32>
    tpu.vector_store %arg7[%c0_6, %c0_7], %7 {strides = array<i32>} : memref<32x128xf32, #tpu.memory_space<vmem>>, vector<32x128xf32>,
    %c0_i32_8 = arith.constant 0 : i32
    %9 = arith.cmpi eq, %arg2, %c0_i32_8 : i32
    %10 = arith.extui %9 : i1 to i32
    %c0_i32_9 = arith.constant 0 : i32
    %11 = arith.cmpi ne, %10, %c0_i32_9 : i32
    scf.if %11 {
      %c0_10 = arith.constant 0 : index
      %c0_11 = arith.constant 0 : index
      %12 = vector.load %arg7[%c0_10, %c0_11] : memref<32x128xf32, #tpu.memory_space<vmem>>, vector<32x128xf32>
      %c0_12 = arith.constant 0 : index
      %c0_13 = arith.constant 0 : index
      %13 = vector.load %arg5[%c0_12, %c0_13] : memref<1x128xf32, #tpu.memory_space<vmem>>, vector<1x128xf32>
      %14 = vector.broadcast %13 : vector<1x128xf32> to vector<32x128xf32>
      %15 = arith.addf %12, %14 : vector<32x128xf32>
      %c0_14 = arith.constant 0 : index
      %c0_15 = arith.constant 0 : index
      %16 = vector.load %arg6[%c0_14, %c0_15] : memref<32x128xf32, #tpu.memory_space<vmem>>, vector<32x128xf32>
      tpu.vector_store %arg6[%c0_14, %c0_15], %15 {strides = array<i32>} : memref<32x128xf32, #tpu.memory_space<vmem>>, vector<32x128xf32>,
    } else {
    }
    return
  }
  func.func @transform_0(%arg0: i32, %arg1: i32, %arg2: i32) -> (i32, i32) {
    %c0_i32 = arith.constant 0 : i32
    return %arg0, %arg2 : i32, i32
  }
  func.func @transform_1(%arg0: i32, %arg1: i32, %arg2: i32) -> (i32, i32) {
    %c0_i32 = arith.constant 0 : i32
    return %arg2, %arg1 : i32, i32
  }
  func.func @transform_2(%arg0: i32, %arg1: i32, %arg2: i32) -> (i32, i32) {
    %c0_i32 = arith.constant 0 : i32
    %c0_i32_0 = arith.constant 0 : i32
    return %c0_i32, %arg1 : i32, i32
  }
  func.func @transform_3(%arg0: i32, %arg1: i32, %arg2: i32) -> (i32, i32) {
    %c0_i32 = arith.constant 0 : i32
    return %arg0, %arg1 : i32, i32
  }
}

module attributes {stable_mosaic.version = 11 : i64} {
  func.func @_mm_kernel(%arg0: i32, %arg1: i32, %arg2: i32, %arg3: memref<128x128xbf16, #tpu.memory_space<vmem>>, %arg4: memref<128x128xbf16, #tpu.memory_space<vmem>>, %arg5: memref<1x128xf32, #tpu.memory_space<vmem>>, %arg6: memref<128x128xf32, #tpu.memory_space<vmem>>, %arg7: memref<128x128xf32, #tpu.memory_space<vmem>>) attributes {dimension_semantics = [#tpu.dimension_semantics<parallel>, #tpu.dimension_semantics<parallel>, #tpu.dimension_semantics<arbitrary>], iteration_bounds = array<i64: 1, 1, 1>, scalar_prefetch = 0 : i64, scratch_operands = 1 : i64, tpu.core_type = #tpu.core_type<tc>, window_params = [{transform_indices = @transform_0, window_bounds = array<i64: 128, 128>}, {transform_indices = @transform_1, window_bounds = array<i64: 128, 128>}, {transform_indices = @transform_2, window_bounds = array<i64: 1, 128>}, {transform_indices = @transform_3, window_bounds = array<i64: 128, 128>}]} {
    %c0_i32 = arith.constant 0 : i32
    %0 = arith.cmpi eq, %arg2, %c0_i32 : i32
    %1 = arith.extui %0 : i1 to i32
    %c0_i32_0 = arith.constant 0 : i32
    %2 = arith.cmpi ne, %1, %c0_i32_0 : i32
    scf.if %2 {
      %cst_10 = arith.constant 0.000000e+00 : f32
      %12 = vector.broadcast %cst_10 : f32 to vector<128x128xf32>
      %c0_11 = arith.constant 0 : index
      %c0_12 = arith.constant 0 : index
      %13 = vector.load %arg7[%c0_11, %c0_12] : memref<128x128xf32, #tpu.memory_space<vmem>>, vector<128x128xf32>
      tpu.vector_store %arg7[%c0_11, %c0_12], %12 {strides = array<i32>} : memref<128x128xf32, #tpu.memory_space<vmem>>, vector<128x128xf32>,
    } else {
    }
    %c0 = arith.constant 0 : index
    %c0_1 = arith.constant 0 : index
    %3 = vector.load %arg7[%c0, %c0_1] : memref<128x128xf32, #tpu.memory_space<vmem>>, vector<128x128xf32>
    %c0_2 = arith.constant 0 : index
    %c0_3 = arith.constant 0 : index
    %4 = vector.load %arg3[%c0_2, %c0_3] : memref<128x128xbf16, #tpu.memory_space<vmem>>, vector<128x128xbf16>
    %c0_4 = arith.constant 0 : index
    %c0_5 = arith.constant 0 : index
    %5 = vector.load %arg4[%c0_4, %c0_5] : memref<128x128xbf16, #tpu.memory_space<vmem>>, vector<128x128xbf16>
    %cst = arith.constant dense<0.000000e+00> : vector<128x128xf32>
    %6 = tpu.matmul %4, %5, %cst {dimension_numbers = #tpu.dot_dimension_numbers<[1], [0], [0], [1], [0, 0, 1, 1], [], []>} : vector<128x128xbf16>, vector<128x128xbf16>, vector<128x128xf32> -> vector<128x128xf32>
    %7 = arith.addf %3, %6 : vector<128x128xf32>
    %c0_6 = arith.constant 0 : index
    %c0_7 = arith.constant 0 : index
    %8 = vector.load %arg7[%c0_6, %c0_7] : memref<128x128xf32, #tpu.memory_space<vmem>>, vector<128x128xf32>
    tpu.vector_store %arg7[%c0_6, %c0_7], %7 {strides = array<i32>} : memref<128x128xf32, #tpu.memory_space<vmem>>, vector<128x128xf32>,
    %c0_i32_8 = arith.constant 0 : i32
    %9 = arith.cmpi eq, %arg2, %c0_i32_8 : i32
    %10 = arith.extui %9 : i1 to i32
    %c0_i32_9 = arith.constant 0 : i32
    %11 = arith.cmpi ne, %10, %c0_i32_9 : i32
    scf.if %11 {
      %c0_10 = arith.constant 0 : index
      %c0_11 = arith.constant 0 : index
      %12 = vector.load %arg7[%c0_10, %c0_11] : memref<128x128xf32, #tpu.memory_space<vmem>>, vector<128x128xf32>
      %c0_12 = arith.constant 0 : index
      %c0_13 = arith.constant 0 : index
      %13 = vector.load %arg5[%c0_12, %c0_13] : memref<1x128xf32, #tpu.memory_space<vmem>>, vector<1x128xf32>
      %14 = vector.broadcast %13 : vector<1x128xf32> to vector<128x128xf32>
      %15 = arith.addf %12, %14 : vector<128x128xf32>
      %cst_14 = arith.constant 0.000000e+00 : f32
      %16 = vector.broadcast %cst_14 : f32 to vector<128x128xf32>
      %17 = arith.maximumf %15, %16 : vector<128x128xf32>
      %c0_15 = arith.constant 0 : index
      %c0_16 = arith.constant 0 : index
      %18 = vector.load %arg6[%c0_15, %c0_16] : memref<128x128xf32, #tpu.memory_space<vmem>>, vector<128x128xf32>
      tpu.vector_store %arg6[%c0_15, %c0_16], %17 {strides = array<i32>} : memref<128x128xf32, #tpu.memory_space<vmem>>, vector<128x128xf32>,
    } else {
    }
    return
  }
  func.func @transform_0(%arg0: i32, %arg1: i32, %arg2: i32) -> (i32, i32) {
    %c0_i32 = arith.constant 0 : i32
    return %arg0, %arg2 : i32, i32
  }
  func.func @transform_1(%arg0: i32, %arg1: i32, %arg2: i32) -> (i32, i32) {
    %c0_i32 = arith.constant 0 : i32
    return %arg2, %arg1 : i32, i32
  }
  func.func @transform_2(%arg0: i32, %arg1: i32, %arg2: i32) -> (i32, i32) {
    %c0_i32 = arith.constant 0 : i32
    %c0_i32_0 = arith.constant 0 : i32
    return %c0_i32, %arg1 : i32, i32
  }
  func.func @transform_3(%arg0: i32, %arg1: i32, %arg2: i32) -> (i32, i32) {
    %c0_i32 = arith.constant 0 : i32
    return %arg0, %arg1 : i32, i32
  }
}

module attributes {stable_mosaic.version = 11 : i64} {
  func.func @_mm_res_kernel(%arg0: i32, %arg1: i32, %arg2: i32, %arg3: memref<32x128xbf16, #tpu.memory_space<vmem>>, %arg4: memref<128x128xbf16, #tpu.memory_space<vmem>>, %arg5: memref<1x128xf32, #tpu.memory_space<vmem>>, %arg6: memref<32x128xf32, #tpu.memory_space<vmem>>, %arg7: memref<32x128xf32, #tpu.memory_space<vmem>>, %arg8: memref<32x128xf32, #tpu.memory_space<vmem>>) attributes {dimension_semantics = [#tpu.dimension_semantics<parallel>, #tpu.dimension_semantics<parallel>, #tpu.dimension_semantics<arbitrary>], iteration_bounds = array<i64: 1, 1, 1>, scalar_prefetch = 0 : i64, scratch_operands = 1 : i64, tpu.core_type = #tpu.core_type<tc>, window_params = [{transform_indices = @transform_0, window_bounds = array<i64: 32, 128>}, {transform_indices = @transform_1, window_bounds = array<i64: 128, 128>}, {transform_indices = @transform_2, window_bounds = array<i64: 1, 128>}, {transform_indices = @transform_3, window_bounds = array<i64: 32, 128>}, {transform_indices = @transform_4, window_bounds = array<i64: 32, 128>}]} {
    %c0_i32 = arith.constant 0 : i32
    %0 = arith.cmpi eq, %arg2, %c0_i32 : i32
    %1 = arith.extui %0 : i1 to i32
    %c0_i32_0 = arith.constant 0 : i32
    %2 = arith.cmpi ne, %1, %c0_i32_0 : i32
    scf.if %2 {
      %cst_10 = arith.constant 0.000000e+00 : f32
      %12 = vector.broadcast %cst_10 : f32 to vector<32x128xf32>
      %c0_11 = arith.constant 0 : index
      %c0_12 = arith.constant 0 : index
      %13 = vector.load %arg8[%c0_11, %c0_12] : memref<32x128xf32, #tpu.memory_space<vmem>>, vector<32x128xf32>
      tpu.vector_store %arg8[%c0_11, %c0_12], %12 {strides = array<i32>} : memref<32x128xf32, #tpu.memory_space<vmem>>, vector<32x128xf32>,
    } else {
    }
    %c0 = arith.constant 0 : index
    %c0_1 = arith.constant 0 : index
    %3 = vector.load %arg8[%c0, %c0_1] : memref<32x128xf32, #tpu.memory_space<vmem>>, vector<32x128xf32>
    %c0_2 = arith.constant 0 : index
    %c0_3 = arith.constant 0 : index
    %4 = vector.load %arg3[%c0_2, %c0_3] : memref<32x128xbf16, #tpu.memory_space<vmem>>, vector<32x128xbf16>
    %c0_4 = arith.constant 0 : index
    %c0_5 = arith.constant 0 : index
    %5 = vector.load %arg4[%c0_4, %c0_5] : memref<128x128xbf16, #tpu.memory_space<vmem>>, vector<128x128xbf16>
    %cst = arith.constant dense<0.000000e+00> : vector<32x128xf32>
    %6 = tpu.matmul %4, %5, %cst {dimension_numbers = #tpu.dot_dimension_numbers<[1], [0], [0], [1], [0, 0, 1, 1], [], []>} : vector<32x128xbf16>, vector<128x128xbf16>, vector<32x128xf32> -> vector<32x128xf32>
    %7 = arith.addf %3, %6 : vector<32x128xf32>
    %c0_6 = arith.constant 0 : index
    %c0_7 = arith.constant 0 : index
    %8 = vector.load %arg8[%c0_6, %c0_7] : memref<32x128xf32, #tpu.memory_space<vmem>>, vector<32x128xf32>
    tpu.vector_store %arg8[%c0_6, %c0_7], %7 {strides = array<i32>} : memref<32x128xf32, #tpu.memory_space<vmem>>, vector<32x128xf32>,
    %c0_i32_8 = arith.constant 0 : i32
    %9 = arith.cmpi eq, %arg2, %c0_i32_8 : i32
    %10 = arith.extui %9 : i1 to i32
    %c0_i32_9 = arith.constant 0 : i32
    %11 = arith.cmpi ne, %10, %c0_i32_9 : i32
    scf.if %11 {
      %c0_10 = arith.constant 0 : index
      %c0_11 = arith.constant 0 : index
      %12 = vector.load %arg8[%c0_10, %c0_11] : memref<32x128xf32, #tpu.memory_space<vmem>>, vector<32x128xf32>
      %c0_12 = arith.constant 0 : index
      %c0_13 = arith.constant 0 : index
      %13 = vector.load %arg5[%c0_12, %c0_13] : memref<1x128xf32, #tpu.memory_space<vmem>>, vector<1x128xf32>
      %14 = vector.broadcast %13 : vector<1x128xf32> to vector<32x128xf32>
      %15 = arith.addf %12, %14 : vector<32x128xf32>
      %c0_14 = arith.constant 0 : index
      %c0_15 = arith.constant 0 : index
      %16 = vector.load %arg6[%c0_14, %c0_15] : memref<32x128xf32, #tpu.memory_space<vmem>>, vector<32x128xf32>
      %17 = arith.addf %15, %16 : vector<32x128xf32>
      %cst_16 = arith.constant 0.000000e+00 : f32
      %18 = vector.broadcast %cst_16 : f32 to vector<32x128xf32>
      %19 = arith.maximumf %17, %18 : vector<32x128xf32>
      %c0_17 = arith.constant 0 : index
      %c0_18 = arith.constant 0 : index
      %20 = vector.load %arg7[%c0_17, %c0_18] : memref<32x128xf32, #tpu.memory_space<vmem>>, vector<32x128xf32>
      tpu.vector_store %arg7[%c0_17, %c0_18], %19 {strides = array<i32>} : memref<32x128xf32, #tpu.memory_space<vmem>>, vector<32x128xf32>,
    } else {
    }
    return
  }
  func.func @transform_0(%arg0: i32, %arg1: i32, %arg2: i32) -> (i32, i32) {
    %c0_i32 = arith.constant 0 : i32
    return %arg0, %arg2 : i32, i32
  }
  func.func @transform_1(%arg0: i32, %arg1: i32, %arg2: i32) -> (i32, i32) {
    %c0_i32 = arith.constant 0 : i32
    return %arg2, %arg1 : i32, i32
  }
  func.func @transform_2(%arg0: i32, %arg1: i32, %arg2: i32) -> (i32, i32) {
    %c0_i32 = arith.constant 0 : i32
    %c0_i32_0 = arith.constant 0 : i32
    return %c0_i32, %arg1 : i32, i32
  }
  func.func @transform_3(%arg0: i32, %arg1: i32, %arg2: i32) -> (i32, i32) {
    %c0_i32 = arith.constant 0 : i32
    return %arg0, %arg1 : i32, i32
  }
  func.func @transform_4(%arg0: i32, %arg1: i32, %arg2: i32) -> (i32, i32) {
    %c0_i32 = arith.constant 0 : i32
    return %arg0, %arg1 : i32, i32
  }
}

module attributes {stable_mosaic.version = 11 : i64} {
  func.func @_mm_kernel(%arg0: i32, %arg1: i32, %arg2: i32, %arg3: memref<32x256xbf16, #tpu.memory_space<vmem>>, %arg4: memref<256x128xbf16, #tpu.memory_space<vmem>>, %arg5: memref<1x128xf32, #tpu.memory_space<vmem>>, %arg6: memref<32x128xf32, #tpu.memory_space<vmem>>, %arg7: memref<32x128xf32, #tpu.memory_space<vmem>>) attributes {dimension_semantics = [#tpu.dimension_semantics<parallel>, #tpu.dimension_semantics<parallel>, #tpu.dimension_semantics<arbitrary>], iteration_bounds = array<i64: 1, 1, 1>, scalar_prefetch = 0 : i64, scratch_operands = 1 : i64, tpu.core_type = #tpu.core_type<tc>, window_params = [{transform_indices = @transform_0, window_bounds = array<i64: 32, 256>}, {transform_indices = @transform_1, window_bounds = array<i64: 256, 128>}, {transform_indices = @transform_2, window_bounds = array<i64: 1, 128>}, {transform_indices = @transform_3, window_bounds = array<i64: 32, 128>}]} {
    %c0_i32 = arith.constant 0 : i32
    %0 = arith.cmpi eq, %arg2, %c0_i32 : i32
    %1 = arith.extui %0 : i1 to i32
    %c0_i32_0 = arith.constant 0 : i32
    %2 = arith.cmpi ne, %1, %c0_i32_0 : i32
    scf.if %2 {
      %cst_10 = arith.constant 0.000000e+00 : f32
      %12 = vector.broadcast %cst_10 : f32 to vector<32x128xf32>
      %c0_11 = arith.constant 0 : index
      %c0_12 = arith.constant 0 : index
      %13 = vector.load %arg7[%c0_11, %c0_12] : memref<32x128xf32, #tpu.memory_space<vmem>>, vector<32x128xf32>
      tpu.vector_store %arg7[%c0_11, %c0_12], %12 {strides = array<i32>} : memref<32x128xf32, #tpu.memory_space<vmem>>, vector<32x128xf32>,
    } else {
    }
    %c0 = arith.constant 0 : index
    %c0_1 = arith.constant 0 : index
    %3 = vector.load %arg7[%c0, %c0_1] : memref<32x128xf32, #tpu.memory_space<vmem>>, vector<32x128xf32>
    %c0_2 = arith.constant 0 : index
    %c0_3 = arith.constant 0 : index
    %4 = vector.load %arg3[%c0_2, %c0_3] : memref<32x256xbf16, #tpu.memory_space<vmem>>, vector<32x256xbf16>
    %c0_4 = arith.constant 0 : index
    %c0_5 = arith.constant 0 : index
    %5 = vector.load %arg4[%c0_4, %c0_5] : memref<256x128xbf16, #tpu.memory_space<vmem>>, vector<256x128xbf16>
    %cst = arith.constant dense<0.000000e+00> : vector<32x128xf32>
    %6 = tpu.matmul %4, %5, %cst {dimension_numbers = #tpu.dot_dimension_numbers<[1], [0], [0], [1], [0, 0, 1, 1], [], []>} : vector<32x256xbf16>, vector<256x128xbf16>, vector<32x128xf32> -> vector<32x128xf32>
    %7 = arith.addf %3, %6 : vector<32x128xf32>
    %c0_6 = arith.constant 0 : index
    %c0_7 = arith.constant 0 : index
    %8 = vector.load %arg7[%c0_6, %c0_7] : memref<32x128xf32, #tpu.memory_space<vmem>>, vector<32x128xf32>
    tpu.vector_store %arg7[%c0_6, %c0_7], %7 {strides = array<i32>} : memref<32x128xf32, #tpu.memory_space<vmem>>, vector<32x128xf32>,
    %c0_i32_8 = arith.constant 0 : i32
    %9 = arith.cmpi eq, %arg2, %c0_i32_8 : i32
    %10 = arith.extui %9 : i1 to i32
    %c0_i32_9 = arith.constant 0 : i32
    %11 = arith.cmpi ne, %10, %c0_i32_9 : i32
    scf.if %11 {
      %c0_10 = arith.constant 0 : index
      %c0_11 = arith.constant 0 : index
      %12 = vector.load %arg7[%c0_10, %c0_11] : memref<32x128xf32, #tpu.memory_space<vmem>>, vector<32x128xf32>
      %c0_12 = arith.constant 0 : index
      %c0_13 = arith.constant 0 : index
      %13 = vector.load %arg5[%c0_12, %c0_13] : memref<1x128xf32, #tpu.memory_space<vmem>>, vector<1x128xf32>
      %14 = vector.broadcast %13 : vector<1x128xf32> to vector<32x128xf32>
      %15 = arith.addf %12, %14 : vector<32x128xf32>
      %cst_14 = arith.constant 0.000000e+00 : f32
      %16 = vector.broadcast %cst_14 : f32 to vector<32x128xf32>
      %17 = arith.maximumf %15, %16 : vector<32x128xf32>
      %c0_15 = arith.constant 0 : index
      %c0_16 = arith.constant 0 : index
      %18 = vector.load %arg6[%c0_15, %c0_16] : memref<32x128xf32, #tpu.memory_space<vmem>>, vector<32x128xf32>
      tpu.vector_store %arg6[%c0_15, %c0_16], %17 {strides = array<i32>} : memref<32x128xf32, #tpu.memory_space<vmem>>, vector<32x128xf32>,
    } else {
    }
    return
  }
  func.func @transform_0(%arg0: i32, %arg1: i32, %arg2: i32) -> (i32, i32) {
    %c0_i32 = arith.constant 0 : i32
    return %arg0, %arg2 : i32, i32
  }
  func.func @transform_1(%arg0: i32, %arg1: i32, %arg2: i32) -> (i32, i32) {
    %c0_i32 = arith.constant 0 : i32
    return %arg2, %arg1 : i32, i32
  }
  func.func @transform_2(%arg0: i32, %arg1: i32, %arg2: i32) -> (i32, i32) {
    %c0_i32 = arith.constant 0 : i32
    %c0_i32_0 = arith.constant 0 : i32
    return %c0_i32, %arg1 : i32, i32
  }
  func.func @transform_3(%arg0: i32, %arg1: i32, %arg2: i32) -> (i32, i32) {
    %c0_i32 = arith.constant 0 : i32
    return %arg0, %arg1 : i32, i32
  }
}

module attributes {stable_mosaic.version = 11 : i64} {
  func.func @_mm_kernel(%arg0: i32, %arg1: i32, %arg2: i32, %arg3: memref<32x128xbf16, #tpu.memory_space<vmem>>, %arg4: memref<128x128xbf16, #tpu.memory_space<vmem>>, %arg5: memref<1x128xf32, #tpu.memory_space<vmem>>, %arg6: memref<32x128xf32, #tpu.memory_space<vmem>>, %arg7: memref<32x128xf32, #tpu.memory_space<vmem>>) attributes {dimension_semantics = [#tpu.dimension_semantics<parallel>, #tpu.dimension_semantics<parallel>, #tpu.dimension_semantics<arbitrary>], iteration_bounds = array<i64: 1, 1, 1>, scalar_prefetch = 0 : i64, scratch_operands = 1 : i64, tpu.core_type = #tpu.core_type<tc>, window_params = [{transform_indices = @transform_0, window_bounds = array<i64: 32, 128>}, {transform_indices = @transform_1, window_bounds = array<i64: 128, 128>}, {transform_indices = @transform_2, window_bounds = array<i64: 1, 128>}, {transform_indices = @transform_3, window_bounds = array<i64: 32, 128>}]} {
    %c0_i32 = arith.constant 0 : i32
    %0 = arith.cmpi eq, %arg2, %c0_i32 : i32
    %1 = arith.extui %0 : i1 to i32
    %c0_i32_0 = arith.constant 0 : i32
    %2 = arith.cmpi ne, %1, %c0_i32_0 : i32
    scf.if %2 {
      %cst_10 = arith.constant 0.000000e+00 : f32
      %12 = vector.broadcast %cst_10 : f32 to vector<32x128xf32>
      %c0_11 = arith.constant 0 : index
      %c0_12 = arith.constant 0 : index
      %13 = vector.load %arg7[%c0_11, %c0_12] : memref<32x128xf32, #tpu.memory_space<vmem>>, vector<32x128xf32>
      tpu.vector_store %arg7[%c0_11, %c0_12], %12 {strides = array<i32>} : memref<32x128xf32, #tpu.memory_space<vmem>>, vector<32x128xf32>,
    } else {
    }
    %c0 = arith.constant 0 : index
    %c0_1 = arith.constant 0 : index
    %3 = vector.load %arg7[%c0, %c0_1] : memref<32x128xf32, #tpu.memory_space<vmem>>, vector<32x128xf32>
    %c0_2 = arith.constant 0 : index
    %c0_3 = arith.constant 0 : index
    %4 = vector.load %arg3[%c0_2, %c0_3] : memref<32x128xbf16, #tpu.memory_space<vmem>>, vector<32x128xbf16>
    %c0_4 = arith.constant 0 : index
    %c0_5 = arith.constant 0 : index
    %5 = vector.load %arg4[%c0_4, %c0_5] : memref<128x128xbf16, #tpu.memory_space<vmem>>, vector<128x128xbf16>
    %cst = arith.constant dense<0.000000e+00> : vector<32x128xf32>
    %6 = tpu.matmul %4, %5, %cst {dimension_numbers = #tpu.dot_dimension_numbers<[1], [0], [0], [1], [0, 0, 1, 1], [], []>} : vector<32x128xbf16>, vector<128x128xbf16>, vector<32x128xf32> -> vector<32x128xf32>
    %7 = arith.addf %3, %6 : vector<32x128xf32>
    %c0_6 = arith.constant 0 : index
    %c0_7 = arith.constant 0 : index
    %8 = vector.load %arg7[%c0_6, %c0_7] : memref<32x128xf32, #tpu.memory_space<vmem>>, vector<32x128xf32>
    tpu.vector_store %arg7[%c0_6, %c0_7], %7 {strides = array<i32>} : memref<32x128xf32, #tpu.memory_space<vmem>>, vector<32x128xf32>,
    %c0_i32_8 = arith.constant 0 : i32
    %9 = arith.cmpi eq, %arg2, %c0_i32_8 : i32
    %10 = arith.extui %9 : i1 to i32
    %c0_i32_9 = arith.constant 0 : i32
    %11 = arith.cmpi ne, %10, %c0_i32_9 : i32
    scf.if %11 {
      %c0_10 = arith.constant 0 : index
      %c0_11 = arith.constant 0 : index
      %12 = vector.load %arg7[%c0_10, %c0_11] : memref<32x128xf32, #tpu.memory_space<vmem>>, vector<32x128xf32>
      %c0_12 = arith.constant 0 : index
      %c0_13 = arith.constant 0 : index
      %13 = vector.load %arg5[%c0_12, %c0_13] : memref<1x128xf32, #tpu.memory_space<vmem>>, vector<1x128xf32>
      %14 = vector.broadcast %13 : vector<1x128xf32> to vector<32x128xf32>
      %15 = arith.addf %12, %14 : vector<32x128xf32>
      %cst_14 = arith.constant 0.000000e+00 : f32
      %16 = vector.broadcast %cst_14 : f32 to vector<32x128xf32>
      %17 = arith.maximumf %15, %16 : vector<32x128xf32>
      %c0_15 = arith.constant 0 : index
      %c0_16 = arith.constant 0 : index
      %18 = vector.load %arg6[%c0_15, %c0_16] : memref<32x128xf32, #tpu.memory_space<vmem>>, vector<32x128xf32>
      tpu.vector_store %arg6[%c0_15, %c0_16], %17 {strides = array<i32>} : memref<32x128xf32, #tpu.memory_space<vmem>>, vector<32x128xf32>,
    } else {
    }
    return
  }
  func.func @transform_0(%arg0: i32, %arg1: i32, %arg2: i32) -> (i32, i32) {
    %c0_i32 = arith.constant 0 : i32
    return %arg0, %arg2 : i32, i32
  }
  func.func @transform_1(%arg0: i32, %arg1: i32, %arg2: i32) -> (i32, i32) {
    %c0_i32 = arith.constant 0 : i32
    return %arg2, %arg1 : i32, i32
  }
  func.func @transform_2(%arg0: i32, %arg1: i32, %arg2: i32) -> (i32, i32) {
    %c0_i32 = arith.constant 0 : i32
    %c0_i32_0 = arith.constant 0 : i32
    return %c0_i32, %arg1 : i32, i32
  }
  func.func @transform_3(%arg0: i32, %arg1: i32, %arg2: i32) -> (i32, i32) {
    %c0_i32 = arith.constant 0 : i32
    return %arg0, %arg1 : i32, i32
  }
}

module attributes {stable_mosaic.version = 11 : i64} {
  func.func @_mm_kernel(%arg0: i32, %arg1: i32, %arg2: i32, %arg3: memref<16x128xbf16, #tpu.memory_space<vmem>>, %arg4: memref<128x128xbf16, #tpu.memory_space<vmem>>, %arg5: memref<1x128xf32, #tpu.memory_space<vmem>>, %arg6: memref<16x128xf32, #tpu.memory_space<vmem>>, %arg7: memref<16x128xf32, #tpu.memory_space<vmem>>) attributes {dimension_semantics = [#tpu.dimension_semantics<parallel>, #tpu.dimension_semantics<parallel>, #tpu.dimension_semantics<arbitrary>], iteration_bounds = array<i64: 1, 1, 1>, scalar_prefetch = 0 : i64, scratch_operands = 1 : i64, tpu.core_type = #tpu.core_type<tc>, window_params = [{transform_indices = @transform_0, window_bounds = array<i64: 16, 128>}, {transform_indices = @transform_1, window_bounds = array<i64: 128, 128>}, {transform_indices = @transform_2, window_bounds = array<i64: 1, 128>}, {transform_indices = @transform_3, window_bounds = array<i64: 16, 128>}]} {
    %c0_i32 = arith.constant 0 : i32
    %0 = arith.cmpi eq, %arg2, %c0_i32 : i32
    %1 = arith.extui %0 : i1 to i32
    %c0_i32_0 = arith.constant 0 : i32
    %2 = arith.cmpi ne, %1, %c0_i32_0 : i32
    scf.if %2 {
      %cst_10 = arith.constant 0.000000e+00 : f32
      %12 = vector.broadcast %cst_10 : f32 to vector<16x128xf32>
      %c0_11 = arith.constant 0 : index
      %c0_12 = arith.constant 0 : index
      %13 = vector.load %arg7[%c0_11, %c0_12] : memref<16x128xf32, #tpu.memory_space<vmem>>, vector<16x128xf32>
      tpu.vector_store %arg7[%c0_11, %c0_12], %12 {strides = array<i32>} : memref<16x128xf32, #tpu.memory_space<vmem>>, vector<16x128xf32>,
    } else {
    }
    %c0 = arith.constant 0 : index
    %c0_1 = arith.constant 0 : index
    %3 = vector.load %arg7[%c0, %c0_1] : memref<16x128xf32, #tpu.memory_space<vmem>>, vector<16x128xf32>
    %c0_2 = arith.constant 0 : index
    %c0_3 = arith.constant 0 : index
    %4 = vector.load %arg3[%c0_2, %c0_3] : memref<16x128xbf16, #tpu.memory_space<vmem>>, vector<16x128xbf16>
    %c0_4 = arith.constant 0 : index
    %c0_5 = arith.constant 0 : index
    %5 = vector.load %arg4[%c0_4, %c0_5] : memref<128x128xbf16, #tpu.memory_space<vmem>>, vector<128x128xbf16>
    %cst = arith.constant dense<0.000000e+00> : vector<16x128xf32>
    %6 = tpu.matmul %4, %5, %cst {dimension_numbers = #tpu.dot_dimension_numbers<[1], [0], [0], [1], [0, 0, 1, 1], [], []>} : vector<16x128xbf16>, vector<128x128xbf16>, vector<16x128xf32> -> vector<16x128xf32>
    %7 = arith.addf %3, %6 : vector<16x128xf32>
    %c0_6 = arith.constant 0 : index
    %c0_7 = arith.constant 0 : index
    %8 = vector.load %arg7[%c0_6, %c0_7] : memref<16x128xf32, #tpu.memory_space<vmem>>, vector<16x128xf32>
    tpu.vector_store %arg7[%c0_6, %c0_7], %7 {strides = array<i32>} : memref<16x128xf32, #tpu.memory_space<vmem>>, vector<16x128xf32>,
    %c0_i32_8 = arith.constant 0 : i32
    %9 = arith.cmpi eq, %arg2, %c0_i32_8 : i32
    %10 = arith.extui %9 : i1 to i32
    %c0_i32_9 = arith.constant 0 : i32
    %11 = arith.cmpi ne, %10, %c0_i32_9 : i32
    scf.if %11 {
      %c0_10 = arith.constant 0 : index
      %c0_11 = arith.constant 0 : index
      %12 = vector.load %arg7[%c0_10, %c0_11] : memref<16x128xf32, #tpu.memory_space<vmem>>, vector<16x128xf32>
      %c0_12 = arith.constant 0 : index
      %c0_13 = arith.constant 0 : index
      %13 = vector.load %arg5[%c0_12, %c0_13] : memref<1x128xf32, #tpu.memory_space<vmem>>, vector<1x128xf32>
      %14 = vector.broadcast %13 : vector<1x128xf32> to vector<16x128xf32>
      %15 = arith.addf %12, %14 : vector<16x128xf32>
      %c0_14 = arith.constant 0 : index
      %c0_15 = arith.constant 0 : index
      %16 = vector.load %arg6[%c0_14, %c0_15] : memref<16x128xf32, #tpu.memory_space<vmem>>, vector<16x128xf32>
      tpu.vector_store %arg6[%c0_14, %c0_15], %15 {strides = array<i32>} : memref<16x128xf32, #tpu.memory_space<vmem>>, vector<16x128xf32>,
    } else {
    }
    return
  }
  func.func @transform_0(%arg0: i32, %arg1: i32, %arg2: i32) -> (i32, i32) {
    %c0_i32 = arith.constant 0 : i32
    return %arg0, %arg2 : i32, i32
  }
  func.func @transform_1(%arg0: i32, %arg1: i32, %arg2: i32) -> (i32, i32) {
    %c0_i32 = arith.constant 0 : i32
    return %arg2, %arg1 : i32, i32
  }
  func.func @transform_2(%arg0: i32, %arg1: i32, %arg2: i32) -> (i32, i32) {
    %c0_i32 = arith.constant 0 : i32
    %c0_i32_0 = arith.constant 0 : i32
    return %c0_i32, %arg1 : i32, i32
  }
  func.func @transform_3(%arg0: i32, %arg1: i32, %arg2: i32) -> (i32, i32) {
    %c0_i32 = arith.constant 0 : i32
    return %arg0, %arg1 : i32, i32
  }
}

module attributes {stable_mosaic.version = 11 : i64} {
  func.func @_mm_kernel(%arg0: i32, %arg1: i32, %arg2: i32, %arg3: memref<16x384xbf16, #tpu.memory_space<vmem>>, %arg4: memref<384x128xbf16, #tpu.memory_space<vmem>>, %arg5: memref<1x128xf32, #tpu.memory_space<vmem>>, %arg6: memref<16x128xf32, #tpu.memory_space<vmem>>, %arg7: memref<16x128xf32, #tpu.memory_space<vmem>>) attributes {dimension_semantics = [#tpu.dimension_semantics<parallel>, #tpu.dimension_semantics<parallel>, #tpu.dimension_semantics<arbitrary>], iteration_bounds = array<i64: 1, 1, 1>, scalar_prefetch = 0 : i64, scratch_operands = 1 : i64, tpu.core_type = #tpu.core_type<tc>, window_params = [{transform_indices = @transform_0, window_bounds = array<i64: 16, 384>}, {transform_indices = @transform_1, window_bounds = array<i64: 384, 128>}, {transform_indices = @transform_2, window_bounds = array<i64: 1, 128>}, {transform_indices = @transform_3, window_bounds = array<i64: 16, 128>}]} {
    %c0_i32 = arith.constant 0 : i32
    %0 = arith.cmpi eq, %arg2, %c0_i32 : i32
    %1 = arith.extui %0 : i1 to i32
    %c0_i32_0 = arith.constant 0 : i32
    %2 = arith.cmpi ne, %1, %c0_i32_0 : i32
    scf.if %2 {
      %cst_10 = arith.constant 0.000000e+00 : f32
      %12 = vector.broadcast %cst_10 : f32 to vector<16x128xf32>
      %c0_11 = arith.constant 0 : index
      %c0_12 = arith.constant 0 : index
      %13 = vector.load %arg7[%c0_11, %c0_12] : memref<16x128xf32, #tpu.memory_space<vmem>>, vector<16x128xf32>
      tpu.vector_store %arg7[%c0_11, %c0_12], %12 {strides = array<i32>} : memref<16x128xf32, #tpu.memory_space<vmem>>, vector<16x128xf32>,
    } else {
    }
    %c0 = arith.constant 0 : index
    %c0_1 = arith.constant 0 : index
    %3 = vector.load %arg7[%c0, %c0_1] : memref<16x128xf32, #tpu.memory_space<vmem>>, vector<16x128xf32>
    %c0_2 = arith.constant 0 : index
    %c0_3 = arith.constant 0 : index
    %4 = vector.load %arg3[%c0_2, %c0_3] : memref<16x384xbf16, #tpu.memory_space<vmem>>, vector<16x384xbf16>
    %c0_4 = arith.constant 0 : index
    %c0_5 = arith.constant 0 : index
    %5 = vector.load %arg4[%c0_4, %c0_5] : memref<384x128xbf16, #tpu.memory_space<vmem>>, vector<384x128xbf16>
    %cst = arith.constant dense<0.000000e+00> : vector<16x128xf32>
    %6 = tpu.matmul %4, %5, %cst {dimension_numbers = #tpu.dot_dimension_numbers<[1], [0], [0], [1], [0, 0, 1, 1], [], []>} : vector<16x384xbf16>, vector<384x128xbf16>, vector<16x128xf32> -> vector<16x128xf32>
    %7 = arith.addf %3, %6 : vector<16x128xf32>
    %c0_6 = arith.constant 0 : index
    %c0_7 = arith.constant 0 : index
    %8 = vector.load %arg7[%c0_6, %c0_7] : memref<16x128xf32, #tpu.memory_space<vmem>>, vector<16x128xf32>
    tpu.vector_store %arg7[%c0_6, %c0_7], %7 {strides = array<i32>} : memref<16x128xf32, #tpu.memory_space<vmem>>, vector<16x128xf32>,
    %c0_i32_8 = arith.constant 0 : i32
    %9 = arith.cmpi eq, %arg2, %c0_i32_8 : i32
    %10 = arith.extui %9 : i1 to i32
    %c0_i32_9 = arith.constant 0 : i32
    %11 = arith.cmpi ne, %10, %c0_i32_9 : i32
    scf.if %11 {
      %c0_10 = arith.constant 0 : index
      %c0_11 = arith.constant 0 : index
      %12 = vector.load %arg7[%c0_10, %c0_11] : memref<16x128xf32, #tpu.memory_space<vmem>>, vector<16x128xf32>
      %c0_12 = arith.constant 0 : index
      %c0_13 = arith.constant 0 : index
      %13 = vector.load %arg5[%c0_12, %c0_13] : memref<1x128xf32, #tpu.memory_space<vmem>>, vector<1x128xf32>
      %14 = vector.broadcast %13 : vector<1x128xf32> to vector<16x128xf32>
      %15 = arith.addf %12, %14 : vector<16x128xf32>
      %cst_14 = arith.constant 0.000000e+00 : f32
      %16 = vector.broadcast %cst_14 : f32 to vector<16x128xf32>
      %17 = arith.maximumf %15, %16 : vector<16x128xf32>
      %c0_15 = arith.constant 0 : index
      %c0_16 = arith.constant 0 : index
      %18 = vector.load %arg6[%c0_15, %c0_16] : memref<16x128xf32, #tpu.memory_space<vmem>>, vector<16x128xf32>
      tpu.vector_store %arg6[%c0_15, %c0_16], %17 {strides = array<i32>} : memref<16x128xf32, #tpu.memory_space<vmem>>, vector<16x128xf32>,
    } else {
    }
    return
  }
  func.func @transform_0(%arg0: i32, %arg1: i32, %arg2: i32) -> (i32, i32) {
    %c0_i32 = arith.constant 0 : i32
    return %arg0, %arg2 : i32, i32
  }
  func.func @transform_1(%arg0: i32, %arg1: i32, %arg2: i32) -> (i32, i32) {
    %c0_i32 = arith.constant 0 : i32
    return %arg2, %arg1 : i32, i32
  }
  func.func @transform_2(%arg0: i32, %arg1: i32, %arg2: i32) -> (i32, i32) {
    %c0_i32 = arith.constant 0 : i32
    %c0_i32_0 = arith.constant 0 : i32
    return %c0_i32, %arg1 : i32, i32
  }
  func.func @transform_3(%arg0: i32, %arg1: i32, %arg2: i32) -> (i32, i32) {
    %c0_i32 = arith.constant 0 : i32
    return %arg0, %arg1 : i32, i32
  }
}

module attributes {stable_mosaic.version = 11 : i64} {
  func.func @_mm_res_kernel(%arg0: i32, %arg1: i32, %arg2: i32, %arg3: memref<16x128xbf16, #tpu.memory_space<vmem>>, %arg4: memref<128x128xbf16, #tpu.memory_space<vmem>>, %arg5: memref<1x128xf32, #tpu.memory_space<vmem>>, %arg6: memref<16x128xf32, #tpu.memory_space<vmem>>, %arg7: memref<16x128xf32, #tpu.memory_space<vmem>>, %arg8: memref<16x128xf32, #tpu.memory_space<vmem>>) attributes {dimension_semantics = [#tpu.dimension_semantics<parallel>, #tpu.dimension_semantics<parallel>, #tpu.dimension_semantics<arbitrary>], iteration_bounds = array<i64: 1, 1, 1>, scalar_prefetch = 0 : i64, scratch_operands = 1 : i64, tpu.core_type = #tpu.core_type<tc>, window_params = [{transform_indices = @transform_0, window_bounds = array<i64: 16, 128>}, {transform_indices = @transform_1, window_bounds = array<i64: 128, 128>}, {transform_indices = @transform_2, window_bounds = array<i64: 1, 128>}, {transform_indices = @transform_3, window_bounds = array<i64: 16, 128>}, {transform_indices = @transform_4, window_bounds = array<i64: 16, 128>}]} {
    %c0_i32 = arith.constant 0 : i32
    %0 = arith.cmpi eq, %arg2, %c0_i32 : i32
    %1 = arith.extui %0 : i1 to i32
    %c0_i32_0 = arith.constant 0 : i32
    %2 = arith.cmpi ne, %1, %c0_i32_0 : i32
    scf.if %2 {
      %cst_10 = arith.constant 0.000000e+00 : f32
      %12 = vector.broadcast %cst_10 : f32 to vector<16x128xf32>
      %c0_11 = arith.constant 0 : index
      %c0_12 = arith.constant 0 : index
      %13 = vector.load %arg8[%c0_11, %c0_12] : memref<16x128xf32, #tpu.memory_space<vmem>>, vector<16x128xf32>
      tpu.vector_store %arg8[%c0_11, %c0_12], %12 {strides = array<i32>} : memref<16x128xf32, #tpu.memory_space<vmem>>, vector<16x128xf32>,
    } else {
    }
    %c0 = arith.constant 0 : index
    %c0_1 = arith.constant 0 : index
    %3 = vector.load %arg8[%c0, %c0_1] : memref<16x128xf32, #tpu.memory_space<vmem>>, vector<16x128xf32>
    %c0_2 = arith.constant 0 : index
    %c0_3 = arith.constant 0 : index
    %4 = vector.load %arg3[%c0_2, %c0_3] : memref<16x128xbf16, #tpu.memory_space<vmem>>, vector<16x128xbf16>
    %c0_4 = arith.constant 0 : index
    %c0_5 = arith.constant 0 : index
    %5 = vector.load %arg4[%c0_4, %c0_5] : memref<128x128xbf16, #tpu.memory_space<vmem>>, vector<128x128xbf16>
    %cst = arith.constant dense<0.000000e+00> : vector<16x128xf32>
    %6 = tpu.matmul %4, %5, %cst {dimension_numbers = #tpu.dot_dimension_numbers<[1], [0], [0], [1], [0, 0, 1, 1], [], []>} : vector<16x128xbf16>, vector<128x128xbf16>, vector<16x128xf32> -> vector<16x128xf32>
    %7 = arith.addf %3, %6 : vector<16x128xf32>
    %c0_6 = arith.constant 0 : index
    %c0_7 = arith.constant 0 : index
    %8 = vector.load %arg8[%c0_6, %c0_7] : memref<16x128xf32, #tpu.memory_space<vmem>>, vector<16x128xf32>
    tpu.vector_store %arg8[%c0_6, %c0_7], %7 {strides = array<i32>} : memref<16x128xf32, #tpu.memory_space<vmem>>, vector<16x128xf32>,
    %c0_i32_8 = arith.constant 0 : i32
    %9 = arith.cmpi eq, %arg2, %c0_i32_8 : i32
    %10 = arith.extui %9 : i1 to i32
    %c0_i32_9 = arith.constant 0 : i32
    %11 = arith.cmpi ne, %10, %c0_i32_9 : i32
    scf.if %11 {
      %c0_10 = arith.constant 0 : index
      %c0_11 = arith.constant 0 : index
      %12 = vector.load %arg8[%c0_10, %c0_11] : memref<16x128xf32, #tpu.memory_space<vmem>>, vector<16x128xf32>
      %c0_12 = arith.constant 0 : index
      %c0_13 = arith.constant 0 : index
      %13 = vector.load %arg5[%c0_12, %c0_13] : memref<1x128xf32, #tpu.memory_space<vmem>>, vector<1x128xf32>
      %14 = vector.broadcast %13 : vector<1x128xf32> to vector<16x128xf32>
      %15 = arith.addf %12, %14 : vector<16x128xf32>
      %c0_14 = arith.constant 0 : index
      %c0_15 = arith.constant 0 : index
      %16 = vector.load %arg6[%c0_14, %c0_15] : memref<16x128xf32, #tpu.memory_space<vmem>>, vector<16x128xf32>
      %17 = arith.addf %15, %16 : vector<16x128xf32>
      %cst_16 = arith.constant 0.000000e+00 : f32
      %18 = vector.broadcast %cst_16 : f32 to vector<16x128xf32>
      %19 = arith.maximumf %17, %18 : vector<16x128xf32>
      %c0_17 = arith.constant 0 : index
      %c0_18 = arith.constant 0 : index
      %20 = vector.load %arg7[%c0_17, %c0_18] : memref<16x128xf32, #tpu.memory_space<vmem>>, vector<16x128xf32>
      tpu.vector_store %arg7[%c0_17, %c0_18], %19 {strides = array<i32>} : memref<16x128xf32, #tpu.memory_space<vmem>>, vector<16x128xf32>,
    } else {
    }
    return
  }
  func.func @transform_0(%arg0: i32, %arg1: i32, %arg2: i32) -> (i32, i32) {
    %c0_i32 = arith.constant 0 : i32
    return %arg0, %arg2 : i32, i32
  }
  func.func @transform_1(%arg0: i32, %arg1: i32, %arg2: i32) -> (i32, i32) {
    %c0_i32 = arith.constant 0 : i32
    return %arg2, %arg1 : i32, i32
  }
  func.func @transform_2(%arg0: i32, %arg1: i32, %arg2: i32) -> (i32, i32) {
    %c0_i32 = arith.constant 0 : i32
    %c0_i32_0 = arith.constant 0 : i32
    return %c0_i32, %arg1 : i32, i32
  }
  func.func @transform_3(%arg0: i32, %arg1: i32, %arg2: i32) -> (i32, i32) {
    %c0_i32 = arith.constant 0 : i32
    return %arg0, %arg1 : i32, i32
  }
  func.func @transform_4(%arg0: i32, %arg1: i32, %arg2: i32) -> (i32, i32) {
    %c0_i32 = arith.constant 0 : i32
    return %arg0, %arg1 : i32, i32
  }
}

module attributes {stable_mosaic.version = 11 : i64} {
  func.func @_mm_kernel(%arg0: i32, %arg1: i32, %arg2: i32, %arg3: memref<16x512xbf16, #tpu.memory_space<vmem>>, %arg4: memref<512x128xbf16, #tpu.memory_space<vmem>>, %arg5: memref<1x128xf32, #tpu.memory_space<vmem>>, %arg6: memref<16x128xf32, #tpu.memory_space<vmem>>, %arg7: memref<16x128xf32, #tpu.memory_space<vmem>>) attributes {dimension_semantics = [#tpu.dimension_semantics<parallel>, #tpu.dimension_semantics<parallel>, #tpu.dimension_semantics<arbitrary>], iteration_bounds = array<i64: 1, 1, 1>, scalar_prefetch = 0 : i64, scratch_operands = 1 : i64, tpu.core_type = #tpu.core_type<tc>, window_params = [{transform_indices = @transform_0, window_bounds = array<i64: 16, 512>}, {transform_indices = @transform_1, window_bounds = array<i64: 512, 128>}, {transform_indices = @transform_2, window_bounds = array<i64: 1, 128>}, {transform_indices = @transform_3, window_bounds = array<i64: 16, 128>}]} {
    %c0_i32 = arith.constant 0 : i32
    %0 = arith.cmpi eq, %arg2, %c0_i32 : i32
    %1 = arith.extui %0 : i1 to i32
    %c0_i32_0 = arith.constant 0 : i32
    %2 = arith.cmpi ne, %1, %c0_i32_0 : i32
    scf.if %2 {
      %cst_10 = arith.constant 0.000000e+00 : f32
      %12 = vector.broadcast %cst_10 : f32 to vector<16x128xf32>
      %c0_11 = arith.constant 0 : index
      %c0_12 = arith.constant 0 : index
      %13 = vector.load %arg7[%c0_11, %c0_12] : memref<16x128xf32, #tpu.memory_space<vmem>>, vector<16x128xf32>
      tpu.vector_store %arg7[%c0_11, %c0_12], %12 {strides = array<i32>} : memref<16x128xf32, #tpu.memory_space<vmem>>, vector<16x128xf32>,
    } else {
    }
    %c0 = arith.constant 0 : index
    %c0_1 = arith.constant 0 : index
    %3 = vector.load %arg7[%c0, %c0_1] : memref<16x128xf32, #tpu.memory_space<vmem>>, vector<16x128xf32>
    %c0_2 = arith.constant 0 : index
    %c0_3 = arith.constant 0 : index
    %4 = vector.load %arg3[%c0_2, %c0_3] : memref<16x512xbf16, #tpu.memory_space<vmem>>, vector<16x512xbf16>
    %c0_4 = arith.constant 0 : index
    %c0_5 = arith.constant 0 : index
    %5 = vector.load %arg4[%c0_4, %c0_5] : memref<512x128xbf16, #tpu.memory_space<vmem>>, vector<512x128xbf16>
    %cst = arith.constant dense<0.000000e+00> : vector<16x128xf32>
    %6 = tpu.matmul %4, %5, %cst {dimension_numbers = #tpu.dot_dimension_numbers<[1], [0], [0], [1], [0, 0, 1, 1], [], []>} : vector<16x512xbf16>, vector<512x128xbf16>, vector<16x128xf32> -> vector<16x128xf32>
    %7 = arith.addf %3, %6 : vector<16x128xf32>
    %c0_6 = arith.constant 0 : index
    %c0_7 = arith.constant 0 : index
    %8 = vector.load %arg7[%c0_6, %c0_7] : memref<16x128xf32, #tpu.memory_space<vmem>>, vector<16x128xf32>
    tpu.vector_store %arg7[%c0_6, %c0_7], %7 {strides = array<i32>} : memref<16x128xf32, #tpu.memory_space<vmem>>, vector<16x128xf32>,
    %c0_i32_8 = arith.constant 0 : i32
    %9 = arith.cmpi eq, %arg2, %c0_i32_8 : i32
    %10 = arith.extui %9 : i1 to i32
    %c0_i32_9 = arith.constant 0 : i32
    %11 = arith.cmpi ne, %10, %c0_i32_9 : i32
    scf.if %11 {
      %c0_10 = arith.constant 0 : index
      %c0_11 = arith.constant 0 : index
      %12 = vector.load %arg7[%c0_10, %c0_11] : memref<16x128xf32, #tpu.memory_space<vmem>>, vector<16x128xf32>
      %c0_12 = arith.constant 0 : index
      %c0_13 = arith.constant 0 : index
      %13 = vector.load %arg5[%c0_12, %c0_13] : memref<1x128xf32, #tpu.memory_space<vmem>>, vector<1x128xf32>
      %14 = vector.broadcast %13 : vector<1x128xf32> to vector<16x128xf32>
      %15 = arith.addf %12, %14 : vector<16x128xf32>
      %cst_14 = arith.constant 0.000000e+00 : f32
      %16 = vector.broadcast %cst_14 : f32 to vector<16x128xf32>
      %17 = arith.maximumf %15, %16 : vector<16x128xf32>
      %c0_15 = arith.constant 0 : index
      %c0_16 = arith.constant 0 : index
      %18 = vector.load %arg6[%c0_15, %c0_16] : memref<16x128xf32, #tpu.memory_space<vmem>>, vector<16x128xf32>
      tpu.vector_store %arg6[%c0_15, %c0_16], %17 {strides = array<i32>} : memref<16x128xf32, #tpu.memory_space<vmem>>, vector<16x128xf32>,
    } else {
    }
    return
  }
  func.func @transform_0(%arg0: i32, %arg1: i32, %arg2: i32) -> (i32, i32) {
    %c0_i32 = arith.constant 0 : i32
    return %arg0, %arg2 : i32, i32
  }
  func.func @transform_1(%arg0: i32, %arg1: i32, %arg2: i32) -> (i32, i32) {
    %c0_i32 = arith.constant 0 : i32
    return %arg2, %arg1 : i32, i32
  }
  func.func @transform_2(%arg0: i32, %arg1: i32, %arg2: i32) -> (i32, i32) {
    %c0_i32 = arith.constant 0 : i32
    %c0_i32_0 = arith.constant 0 : i32
    return %c0_i32, %arg1 : i32, i32
  }
  func.func @transform_3(%arg0: i32, %arg1: i32, %arg2: i32) -> (i32, i32) {
    %c0_i32 = arith.constant 0 : i32
    return %arg0, %arg1 : i32, i32
  }
}

module attributes {stable_mosaic.version = 11 : i64} {
  func.func @_mm_kernel(%arg0: i32, %arg1: i32, %arg2: i32, %arg3: memref<256x128xbf16, #tpu.memory_space<vmem>>, %arg4: memref<128x128xbf16, #tpu.memory_space<vmem>>, %arg5: memref<1x128xf32, #tpu.memory_space<vmem>>, %arg6: memref<256x128xf32, #tpu.memory_space<vmem>>, %arg7: memref<256x128xf32, #tpu.memory_space<vmem>>) attributes {dimension_semantics = [#tpu.dimension_semantics<parallel>, #tpu.dimension_semantics<parallel>, #tpu.dimension_semantics<arbitrary>], iteration_bounds = array<i64: 8, 1, 1>, scalar_prefetch = 0 : i64, scratch_operands = 1 : i64, tpu.core_type = #tpu.core_type<tc>, window_params = [{transform_indices = @transform_0, window_bounds = array<i64: 256, 128>}, {transform_indices = @transform_1, window_bounds = array<i64: 128, 128>}, {transform_indices = @transform_2, window_bounds = array<i64: 1, 128>}, {transform_indices = @transform_3, window_bounds = array<i64: 256, 128>}]} {
    %c0_i32 = arith.constant 0 : i32
    %0 = arith.cmpi eq, %arg2, %c0_i32 : i32
    %1 = arith.extui %0 : i1 to i32
    %c0_i32_0 = arith.constant 0 : i32
    %2 = arith.cmpi ne, %1, %c0_i32_0 : i32
    scf.if %2 {
      %cst_10 = arith.constant 0.000000e+00 : f32
      %12 = vector.broadcast %cst_10 : f32 to vector<256x128xf32>
      %c0_11 = arith.constant 0 : index
      %c0_12 = arith.constant 0 : index
      %13 = vector.load %arg7[%c0_11, %c0_12] : memref<256x128xf32, #tpu.memory_space<vmem>>, vector<256x128xf32>
      tpu.vector_store %arg7[%c0_11, %c0_12], %12 {strides = array<i32>} : memref<256x128xf32, #tpu.memory_space<vmem>>, vector<256x128xf32>,
    } else {
    }
    %c0 = arith.constant 0 : index
    %c0_1 = arith.constant 0 : index
    %3 = vector.load %arg7[%c0, %c0_1] : memref<256x128xf32, #tpu.memory_space<vmem>>, vector<256x128xf32>
    %c0_2 = arith.constant 0 : index
    %c0_3 = arith.constant 0 : index
    %4 = vector.load %arg3[%c0_2, %c0_3] : memref<256x128xbf16, #tpu.memory_space<vmem>>, vector<256x128xbf16>
    %c0_4 = arith.constant 0 : index
    %c0_5 = arith.constant 0 : index
    %5 = vector.load %arg4[%c0_4, %c0_5] : memref<128x128xbf16, #tpu.memory_space<vmem>>, vector<128x128xbf16>
    %cst = arith.constant dense<0.000000e+00> : vector<256x128xf32>
    %6 = tpu.matmul %4, %5, %cst {dimension_numbers = #tpu.dot_dimension_numbers<[1], [0], [0], [1], [0, 0, 1, 1], [], []>} : vector<256x128xbf16>, vector<128x128xbf16>, vector<256x128xf32> -> vector<256x128xf32>
    %7 = arith.addf %3, %6 : vector<256x128xf32>
    %c0_6 = arith.constant 0 : index
    %c0_7 = arith.constant 0 : index
    %8 = vector.load %arg7[%c0_6, %c0_7] : memref<256x128xf32, #tpu.memory_space<vmem>>, vector<256x128xf32>
    tpu.vector_store %arg7[%c0_6, %c0_7], %7 {strides = array<i32>} : memref<256x128xf32, #tpu.memory_space<vmem>>, vector<256x128xf32>,
    %c0_i32_8 = arith.constant 0 : i32
    %9 = arith.cmpi eq, %arg2, %c0_i32_8 : i32
    %10 = arith.extui %9 : i1 to i32
    %c0_i32_9 = arith.constant 0 : i32
    %11 = arith.cmpi ne, %10, %c0_i32_9 : i32
    scf.if %11 {
      %c0_10 = arith.constant 0 : index
      %c0_11 = arith.constant 0 : index
      %12 = vector.load %arg7[%c0_10, %c0_11] : memref<256x128xf32, #tpu.memory_space<vmem>>, vector<256x128xf32>
      %c0_12 = arith.constant 0 : index
      %c0_13 = arith.constant 0 : index
      %13 = vector.load %arg5[%c0_12, %c0_13] : memref<1x128xf32, #tpu.memory_space<vmem>>, vector<1x128xf32>
      %14 = vector.broadcast %13 : vector<1x128xf32> to vector<256x128xf32>
      %15 = arith.addf %12, %14 : vector<256x128xf32>
      %c0_14 = arith.constant 0 : index
      %c0_15 = arith.constant 0 : index
      %16 = vector.load %arg6[%c0_14, %c0_15] : memref<256x128xf32, #tpu.memory_space<vmem>>, vector<256x128xf32>
      tpu.vector_store %arg6[%c0_14, %c0_15], %15 {strides = array<i32>} : memref<256x128xf32, #tpu.memory_space<vmem>>, vector<256x128xf32>,
    } else {
    }
    return
  }
  func.func @transform_0(%arg0: i32, %arg1: i32, %arg2: i32) -> (i32, i32) {
    %c0_i32 = arith.constant 0 : i32
    return %arg0, %arg2 : i32, i32
  }
  func.func @transform_1(%arg0: i32, %arg1: i32, %arg2: i32) -> (i32, i32) {
    %c0_i32 = arith.constant 0 : i32
    return %arg2, %arg1 : i32, i32
  }
  func.func @transform_2(%arg0: i32, %arg1: i32, %arg2: i32) -> (i32, i32) {
    %c0_i32 = arith.constant 0 : i32
    %c0_i32_0 = arith.constant 0 : i32
    return %c0_i32, %arg1 : i32, i32
  }
  func.func @transform_3(%arg0: i32, %arg1: i32, %arg2: i32) -> (i32, i32) {
    %c0_i32 = arith.constant 0 : i32
    return %arg0, %arg1 : i32, i32
  }
}

</mosaic_0001>

<bundles_post_ra>
// kernel: _lambda_.54
= control target key start
LH: loop header
LB: loop body
LE: loop exit
PB: predicated region body
PF: predicated region fallthrough
CT: control target
= control target key end

     0   :  { %s1486_s12 = smov 0   ;;  %s1488_s13 = smov 0   ;;  %s1714_s0 = inlined_call_operand.vmem [shape: bf16[2048,256], index: 0, kind: input, shape index: {}]   ;;  %s1715_s1 = inlined_call_operand.vmem [shape: bf16[256,128], index: 1, kind: input, shape index: {}]   ;;  %s1716_s2 = inlined_call_operand.vmem [shape: f32[1,128], index: 2, kind: input, shape index: {}]   ;;  %s1717_s3 = inlined_call_operand.vmem [shape: f32[2048,128], index: 3, kind: output, shape index: {}]  }
   0x1   :  { %s1490_s14 = smov 0  }
   0x2 LB: > { %s32_s15 = sadd.s32 1, %s1460_s13  ;;  %p1152_p0 = scmp.ge.s32.totalorder %s1464_s14, 1  ;;  %s1464_s14 = sphi %s1490_s14, %s13_s14   ;;  %s1460_s13 = sphi %s1488_s13, %s1719_s13   ;;  %s1456_s12 = sphi %s1486_s12, %s1718_s12  }
   0x3   : > { %p34_p1 = scmp.ge.s32.totalorder %s32_s15, 8  ;;  %p191_p2 = scmp.lt.s32.totalorder %s1464_s14, 9 }
   0x5   : > { %s1721_s15 = smov (%p34_p1, %s32_s15), 0  ;;  %p192_p3 = pnand %p1152_p0, %p191_p2 }
   0x6   : > { %s1153_s28 = sshll.u32 (!%p192_p3), %s1456_s12, 5 }
   0x7   : > { %195 = sbr.rel (%p192_p3) target bundleno = 304 (0x130), region = 32  ;;  %p236_p4 = scmp.lt.s32.totalorder (!%p192_p3), %s1153_s28, 255 }
   0xc   : > { %v1392_v0 = vld [vmem:[%s1715_s1 + $0x38] sm:$0xff]  ;;  %v1391_v2 = vld [vmem:[%s1715_s1 + $0x30] sm:$0xff]  ;;  %v1390_v4 = vld [vmem:[%s1715_s1 + $0x28] sm:$0xff]  ;;  %s1723_s28 = smov (!%p236_p4, %s1153_s28), 255 }
   0xd   : > { %v1400_v1 = vld [vmem:[%s1715_s1 + $0x78] sm:$0xff]  ;;  %655 = vmatpush.bf16.msra.mxu0 %v1392_v0  ;;  %1401 = vmatpush.bf16.msra.mxu2 %v1392_v0  ;;  %v1399_v3 = vld [vmem:[%s1715_s1 + $0x70] sm:$0xff]  ;;  %v1398_v5 = vld [vmem:[%s1715_s1 + $0x68] sm:$0xff]  ;;  %s1352_s17 = sshll.u32 %s1723_s28, 3 }
   0xe   : > { %744 = vmatpush.bf16.msra.mxu1 %v1400_v1  ;;  %1409 = vmatpush.bf16.msra.mxu3 %v1400_v1  ;;  %v1389_v6 = vld [vmem:[%s1715_s1 + $0x20] sm:$0xff]  ;;  %v1388_v8 = vld [vmem:[%s1715_s1 + $0x18] sm:$0xff]  ;;  %v1387_v10 = vld [vmem:[%s1715_s1 + $0x10] sm:$0xff]  ;;  %s1554_s22 = scalar_lea.vmem %s1714_s0, %s1352_s17  ;;  %s1640_s7 = scalar_lea.vmem %s1717_s3, %s1352_s17 }
   0xf   : > { %v1397_v7 = vld [vmem:[%s1715_s1 + $0x60] sm:$0xff]  ;;  %v1396_v9 = vld [vmem:[%s1715_s1 + $0x58] sm:$0xff]  ;;  %v1395_v11 = vld [vmem:[%s1715_s1 + $0x50] sm:$0xff] }
  0x10   : > { %v1386_v12 = vld [vmem:[%s1715_s1 + $0x8] sm:$0xff]  ;;  %v1385_v14 = vld [vmem:[%s1715_s1] sm:$0xff]  ;;  %v1168_v28 = vld [vmem:[%s1554_s22 + $0x10] sm:$0xf] }
  0x11   : > { %656 = vmatpush.bf16.msra.mxu0 %v1391_v2  ;;  %1402 = vmatpush.bf16.msra.mxu2 %v1391_v2  ;;  %v1394_v13 = vld [vmem:[%s1715_s1 + $0x48] sm:$0xff]  ;;  %v1393_v15 = vld [vmem:[%s1715_s1 + $0x40] sm:$0xff]  ;;  %v1356_v29 = vld [vmem:[%s1554_s22 + $0x14] sm:$0xf0] }
  0x12   : > { %745 = vmatpush.bf16.msra.mxu1 %v1399_v3  ;;  %1410 = vmatpush.bf16.msra.mxu3 %v1399_v3  ;;  %v1160_v16 = vld [vmem:[%s1554_s22] sm:$0xf]  ;;  %v1354_v17 = vld [vmem:[%s1554_s22 + $0x4] sm:$0xf0]  ;;  %v1353_v20 = vld [vmem:[%s1554_s22 + $0x4] sm:$0xf]  ;;  %v1169_v36 = vor.u32 %v1356_v29, %v1168_v28 }
  0x13   : > { %v1224_v18 = vld [vmem:[%s1554_s22 + $0x80] sm:$0xf]  ;;  %v1370_v19 = vld [vmem:[%s1554_s22 + $0x84] sm:$0xf0]  ;;  %v1162_v21 = vld [vmem:[%s1554_s22 + $0x8] sm:$0xf0]  ;;  %v1161_v24 = vor.u32 %v1354_v17, %v1160_v16 }
  0x14   : > { %v1369_v22 = vld [vmem:[%s1554_s22 + $0x84] sm:$0xf]  ;;  %v1226_v23 = vld [vmem:[%s1554_s22 + $0x88] sm:$0xf0]  ;;  %v1225_v25 = vor.u32 %v1370_v19, %v1224_v18  ;;  %v1165_v26 = vor.u32 %v1353_v20, %v1162_v21  ;;  %v1232_v30 = vld [vmem:[%s1554_s22 + $0x90] sm:$0xf] }
  0x15   : > { %657 = vmatpush.bf16.msra.mxu0 %v1390_v4  ;;  %1403 = vmatpush.bf16.msra.mxu2 %v1390_v4  ;;  %v1229_v27 = vor.u32 %v1369_v22, %v1226_v23  ;;  %v1372_v31 = vld [vmem:[%s1554_s22 + $0x94] sm:$0xf0]  ;;  %v1355_v32 = vld [vmem:[%s1554_s22 + $0x14] sm:$0xf]  ;;  %v1170_v33 = vld [vmem:[%s1554_s22 + $0x18] sm:$0xf0] }
  0x16   : > { %746 = vmatpush.bf16.msra.mxu1 %v1398_v5  ;;  %1411 = vmatpush.bf16.msra.mxu3 %v1398_v5  ;;  %v1371_v34 = vld [vmem:[%s1554_s22 + $0x94] sm:$0xf]  ;;  %v1234_v35 = vld [vmem:[%s1554_s22 + $0x98] sm:$0xf0]  ;;  %v1233_v37 = vor.u32 %v1372_v31, %v1232_v30  ;;  %v1173_v38 = vor.u32 %v1355_v32, %v1170_v33  ;;  %v1176_v40 = vld [vmem:[%s1554_s22 + $0x20] sm:$0xf] }
  0x17   : > { %v1237_v39 = vor.u32 %v1371_v34, %v1234_v35  ;;  %v1358_v41 = vld [vmem:[%s1554_s22 + $0x24] sm:$0xf0]  ;;  %v1240_v42 = vld [vmem:[%s1554_s22 + $0xa0] sm:$0xf]  ;;  %v1357_v44 = vld [vmem:[%s1554_s22 + $0x24] sm:$0xf] }
  0x18   : > { %v1374_v43 = vld [vmem:[%s1554_s22 + $0xa4] sm:$0xf0]  ;;  %v1178_v45 = vld [vmem:[%s1554_s22 + $0x28] sm:$0xf0]  ;;  %v1373_v46 = vld [vmem:[%s1554_s22 + $0xa4] sm:$0xf]  ;;  %v1177_v48 = vor.u32 %v1358_v41, %v1176_v40 }
  0x19   : > { %658 = vmatpush.bf16.msra.mxu0 %v1389_v6  ;;  %1404 = vmatpush.bf16.msra.mxu2 %v1389_v6  ;;  %v1242_v47 = vld [vmem:[%s1554_s22 + $0xa8] sm:$0xf0]  ;;  %v1241_v49 = vor.u32 %v1374_v43, %v1240_v42  ;;  %v1181_v50 = vor.u32 %v1357_v44, %v1178_v45  ;;  %v1184_v52 = vld [vmem:[%s1554_s22 + $0x30] sm:$0xf]  ;;  %v1360_v53 = vld [vmem:[%s1554_s22 + $0x34] sm:$0xf0] }
  0x1a   : > { %747 = vmatpush.bf16.msra.mxu1 %v1397_v7  ;;  %1412 = vmatpush.bf16.msra.mxu3 %v1397_v7  ;;  %v1245_v51 = vor.u32 %v1373_v46, %v1242_v47  ;;  %v1248_v54 = vld [vmem:[%s1554_s22 + $0xb0] sm:$0xf]  ;;  %v1376_v55 = vld [vmem:[%s1554_s22 + $0xb4] sm:$0xf0]  ;;  %v1359_v56 = vld [vmem:[%s1554_s22 + $0x34] sm:$0xf]  ;;  %v1185_v60 = vor.u32 %v1360_v53, %v1184_v52 }
  0x1b   : > { %v1186_v57 = vld [vmem:[%s1554_s22 + $0x38] sm:$0xf0]  ;;  %v1375_v58 = vld [vmem:[%s1554_s22 + $0xb4] sm:$0xf]  ;;  %v1249_v61 = vor.u32 %v1376_v55, %v1248_v54  ;;  %v1192_v0 = vld [vmem:[%s1554_s22 + $0x40] sm:$0xf] }
  0x1c   : > { %v1250_v59 = vld [vmem:[%s1554_s22 + $0xb8] sm:$0xf0]  ;;  %v1189_v62 = vor.u32 %v1359_v56, %v1186_v57  ;;  %v1362_v1 = vld [vmem:[%s1554_s22 + $0x44] sm:$0xf0]  ;;  %v1256_v2 = vld [vmem:[%s1554_s22 + $0xc0] sm:$0xf] }
  0x1d   : > { %659 = vmatpush.bf16.msra.mxu0 %v1388_v8  ;;  %1405 = vmatpush.bf16.msra.mxu2 %v1388_v8  ;;  %v1253_v63 = vor.u32 %v1375_v58, %v1250_v59  ;;  %v1378_v3 = vld [vmem:[%s1554_s22 + $0xc4] sm:$0xf0]  ;;  %v1361_v4 = vld [vmem:[%s1554_s22 + $0x44] sm:$0xf]  ;;  %v1194_v5 = vld [vmem:[%s1554_s22 + $0x48] sm:$0xf0]  ;;  %v1193_v8 = vor.u32 %v1362_v1, %v1192_v0 }
  0x1e   : > { %748 = vmatpush.bf16.msra.mxu1 %v1396_v9  ;;  %1413 = vmatpush.bf16.msra.mxu3 %v1396_v9  ;;  %v1377_v6 = vld [vmem:[%s1554_s22 + $0xc4] sm:$0xf]  ;;  %v1258_v7 = vld [vmem:[%s1554_s22 + $0xc8] sm:$0xf0]  ;;  %v1257_v9 = vor.u32 %v1378_v3, %v1256_v2  ;;  %v1363_v16 = vld [vmem:[%s1554_s22 + $0x54] sm:$0xf] }
  0x1f   : > { %v1202_v17 = vld [vmem:[%s1554_s22 + $0x58] sm:$0xf0]  ;;  %v1379_v18 = vld [vmem:[%s1554_s22 + $0xd4] sm:$0xf]  ;;  %v1365_v28 = vld [vmem:[%s1554_s22 + $0x64] sm:$0xf] }
  0x20   : > { %v1266_v19 = vld [vmem:[%s1554_s22 + $0xd8] sm:$0xf0]  ;;  %v1205_v22 = vor.u32 %v1363_v16, %v1202_v17  ;;  %v1210_v29 = vld [vmem:[%s1554_s22 + $0x68] sm:$0xf0]  ;;  %v1381_v30 = vld [vmem:[%s1554_s22 + $0xe4] sm:$0xf] }
  0x21   : > { %660 = vmatpush.bf16.msra.mxu0 %v1387_v10  ;;  %1406 = vmatpush.bf16.msra.mxu2 %v1387_v10  ;;  %v1197_v10 = vor.u32 %v1361_v4, %v1194_v5  ;;  %v1269_v23 = vor.u32 %v1379_v18, %v1266_v19  ;;  %v1274_v31 = vld [vmem:[%s1554_s22 + $0xe8] sm:$0xf0]  ;;  %v1213_v34 = vor.u32 %v1365_v28, %v1210_v29  ;;  %v1367_v40 = vld [vmem:[%s1554_s22 + $0x74] sm:$0xf]  ;;  %v1218_v41 = vld [vmem:[%s1554_s22 + $0x78] sm:$0xf0] }
  0x22   : > { %749 = vmatpush.bf16.msra.mxu1 %v1395_v11  ;;  %1414 = vmatpush.bf16.msra.mxu3 %v1395_v11  ;;  %v1261_v11 = vor.u32 %v1377_v6, %v1258_v7  ;;  %v1277_v35 = vor.u32 %v1381_v30, %v1274_v31  ;;  %v1383_v42 = vld [vmem:[%s1554_s22 + $0xf4] sm:$0xf]  ;;  %v1282_v43 = vld [vmem:[%s1554_s22 + $0xf8] sm:$0xf0]  ;;  %v1221_v46 = vor.u32 %v1367_v40, %v1218_v41 }
  0x23   : > { %v1285_v47 = vor.u32 %v1383_v42, %v1282_v43 }
  0x25   : > { %661 = vmatpush.bf16.msra.mxu0 %v1386_v12  ;;  %1407 = vmatpush.bf16.msra.mxu2 %v1386_v12  ;;  %v1200_v12 = vld [vmem:[%s1554_s22 + $0x50] sm:$0xf] }
  0x26   : > { %750 = vmatpush.bf16.msra.mxu1 %v1394_v13  ;;  %1415 = vmatpush.bf16.msra.mxu3 %v1394_v13  ;;  %v1364_v13 = vld [vmem:[%s1554_s22 + $0x54] sm:$0xf0] }
  0x27   : > { %v1201_v20 = vor.u32 %v1364_v13, %v1200_v12 }
  0x29   : > { %662 = vmatpush.bf16.msra.mxu0 %v1385_v14  ;;  %1408 = vmatpush.bf16.msra.mxu2 %v1385_v14  ;;  %v1264_v14 = vld [vmem:[%s1554_s22 + $0xd0] sm:$0xf] }
  0x2a   : > { %751 = vmatpush.bf16.msra.mxu1 %v1393_v15  ;;  %1416 = vmatpush.bf16.msra.mxu3 %v1393_v15  ;;  %v1380_v15 = vld [vmem:[%s1554_s22 + $0xd4] sm:$0xf0] }
  0x2b   : > { %v1265_v21 = vor.u32 %v1380_v15, %v1264_v14 }
  0x2c   : > { %663 = vmatmul.bf16.vlgmr.msra.gmra.mxu0 %v1161_v24  ;;  %703 = vmatmul.bf16.vlgmr.msra.gmra.mxu2 %v1225_v25  ;;  %v1208_v24 = vld [vmem:[%s1554_s22 + $0x60] sm:$0xf]  ;;  %v1366_v25 = vld [vmem:[%s1554_s22 + $0x64] sm:$0xf0] }
  0x2d   : > { %752 = vmatmul.bf16.vlgmr.msra.gmra.mxu1 %v1165_v26  ;;  %792 = vmatmul.bf16.vlgmr.msra.gmra.mxu3 %v1229_v27  ;;  %v1272_v26 = vld [vmem:[%s1554_s22 + $0xe0] sm:$0xf]  ;;  %v1382_v27 = vld [vmem:[%s1554_s22 + $0xe4] sm:$0xf0]  ;;  %v1209_v32 = vor.u32 %v1366_v25, %v1208_v24 }
  0x2e   : > { %v1273_v33 = vor.u32 %v1382_v27, %v1272_v26 }
  0x3c   : > { %668 = vmatmul.bf16.gmra.mxu0 %v1169_v36  ;;  %708 = vmatmul.bf16.gmra.mxu2 %v1233_v37  ;;  %v1216_v36 = vld [vmem:[%s1554_s22 + $0x70] sm:$0xf]  ;;  %v1368_v37 = vld [vmem:[%s1554_s22 + $0x74] sm:$0xf0] }
  0x3d   : > { %757 = vmatmul.bf16.gmra.mxu1 %v1173_v38  ;;  %797 = vmatmul.bf16.gmra.mxu3 %v1237_v39  ;;  %v1280_v38 = vld [vmem:[%s1554_s22 + $0xf0] sm:$0xf]  ;;  %v1384_v39 = vld [vmem:[%s1554_s22 + $0xf4] sm:$0xf0]  ;;  %v1217_v44 = vor.u32 %v1368_v37, %v1216_v36 }
  0x3e   : > { %v1281_v45 = vor.u32 %v1384_v39, %v1280_v38 }
  0x4c   : > { %673 = vmatmul.bf16.gmra.mxu0 %v1177_v48  ;;  %713 = vmatmul.bf16.gmra.mxu2 %v1241_v49  ;;  %v1632_v49 = vld [vmem:[%s1716_s2] ss:$0 sm:$0xff] }
  0x4d   : > { %762 = vmatmul.bf16.gmra.mxu1 %v1181_v50  ;;  %802 = vmatmul.bf16.gmra.mxu3 %v1245_v51 }
  0x5c   : > { %678 = vmatmul.bf16.gmra.mxu0 %v1185_v60  ;;  %718 = vmatmul.bf16.gmra.mxu2 %v1249_v61 }
  0x5d   : > { %767 = vmatmul.bf16.gmra.mxu1 %v1189_v62  ;;  %807 = vmatmul.bf16.gmra.mxu3 %v1253_v63 }
  0x6c   : > { %683 = vmatmul.bf16.gmra.mxu0 %v1193_v8  ;;  %723 = vmatmul.bf16.gmra.mxu2 %v1257_v9 }
  0x6d   : > { %772 = vmatmul.bf16.gmra.mxu1 %v1197_v10  ;;  %812 = vmatmul.bf16.gmra.mxu3 %v1261_v11 }
  0x7c   : > { %688 = vmatmul.bf16.gmra.mxu0 %v1201_v20  ;;  %728 = vmatmul.bf16.gmra.mxu2 %v1265_v21 }
  0x7d   : > { %777 = vmatmul.bf16.gmra.mxu1 %v1205_v22  ;;  %817 = vmatmul.bf16.gmra.mxu3 %v1269_v23 }
  0x8c   : > { %693 = vmatmul.bf16.gmra.mxu0 %v1209_v32  ;;  %733 = vmatmul.bf16.gmra.mxu2 %v1273_v33 }
  0x8d   : > { %782 = vmatmul.bf16.gmra.mxu1 %v1213_v34  ;;  %822 = vmatmul.bf16.gmra.mxu3 %v1277_v35 }
  0x9c   : > { %698 = vmatmul.bf16.gmra.mxu0 %v1217_v44  ;;  %738 = vmatmul.bf16.gmra.mxu2 %v1281_v45 }
  0x9d   : > { %787 = vmatmul.bf16.gmra.mxu1 %v1221_v46  ;;  %827 = vmatmul.bf16.gmra.mxu3 %v1285_v47 }
  0xa9   : > { %v664_v48 = vpop.f32.mrf.mxu0 }
  0xaa   : > { %v753_v50 = vpop.f32.mrf.mxu1 }
  0xab   : > { %v754_v51 = vadd.f32 %v753_v50, %v664_v48 }
  0xad   : > { %v936_v52 = vadd.f32 %v1632_v49, %v754_v51 }
  0xaf   : > { %v968_v53 = vmax.f32 %v936_v52, 0.0  ;;  %v704_v54 = vpop.f32.mrf.mxu2 }
  0xb0   : > { %v793_v55 = vpop.f32.mrf.mxu3 }
  0xb1   : > { %1000 = vst [vmem:[%s1640_s7] sm:$0xff] %v968_v53  ;;  %v794_v56 = vadd.f32 %v793_v55, %v704_v54  ;;  %v666_v57 = vpop.f32.mrf.mxu0 }
  0xb2   : > { %v755_v58 = vpop.f32.mrf.mxu1 }
  0xb3   : > { %v952_v59 = vadd.f32 %v1632_v49, %v794_v56  ;;  %v756_v60 = vadd.f32 %v755_v58, %v666_v57 }
  0xb5   : > { %v984_v61 = vmax.f32 %v952_v59, 0.0  ;;  %v937_v62 = vadd.f32 %v1632_v49, %v756_v60 }
  0xb7   : > { %1016 = vst [vmem:[%s1640_s7 + $0x80] sm:$0xff] %v984_v61  ;;  %v969_v63 = vmax.f32 %v937_v62, 0.0  ;;  %v706_v0 = vpop.f32.mrf.mxu2 }
  0xb8   : > { %v795_v1 = vpop.f32.mrf.mxu3 }
  0xb9   : > { %1001 = vst [vmem:[%s1640_s7 + $0x8] sm:$0xff] %v969_v63  ;;  %v796_v2 = vadd.f32 %v795_v1, %v706_v0  ;;  %v669_v3 = vpop.f32.mrf.mxu0 }
  0xba   : > { %v758_v4 = vpop.f32.mrf.mxu1 }
  0xbb   : > { %v953_v5 = vadd.f32 %v1632_v49, %v796_v2  ;;  %v759_v6 = vadd.f32 %v758_v4, %v669_v3 }
  0xbd   : > { %v985_v7 = vmax.f32 %v953_v5, 0.0  ;;  %v938_v8 = vadd.f32 %v1632_v49, %v759_v6 }
  0xbf   : > { %1017 = vst [vmem:[%s1640_s7 + $0x88] sm:$0xff] %v985_v7  ;;  %v970_v9 = vmax.f32 %v938_v8, 0.0  ;;  %v709_v10 = vpop.f32.mrf.mxu2 }
  0xc0   : > { %v798_v11 = vpop.f32.mrf.mxu3 }
  0xc1   : > { %1002 = vst [vmem:[%s1640_s7 + $0x10] sm:$0xff] %v970_v9  ;;  %v799_v12 = vadd.f32 %v798_v11, %v709_v10  ;;  %v671_v13 = vpop.f32.mrf.mxu0 }
  0xc2   : > { %v760_v14 = vpop.f32.mrf.mxu1 }
  0xc3   : > { %v954_v15 = vadd.f32 %v1632_v49, %v799_v12  ;;  %v761_v16 = vadd.f32 %v760_v14, %v671_v13 }
  0xc5   : > { %v986_v17 = vmax.f32 %v954_v15, 0.0  ;;  %v939_v18 = vadd.f32 %v1632_v49, %v761_v16 }
  0xc7   : > { %1018 = vst [vmem:[%s1640_s7 + $0x90] sm:$0xff] %v986_v17  ;;  %v971_v19 = vmax.f32 %v939_v18, 0.0  ;;  %v711_v20 = vpop.f32.mrf.mxu2 }
  0xc8   : > { %v800_v21 = vpop.f32.mrf.mxu3 }
  0xc9   : > { %1003 = vst [vmem:[%s1640_s7 + $0x18] sm:$0xff] %v971_v19  ;;  %v801_v22 = vadd.f32 %v800_v21, %v711_v20  ;;  %v674_v23 = vpop.f32.mrf.mxu0 }
  0xca   : > { %v763_v24 = vpop.f32.mrf.mxu1 }
  0xcb   : > { %v955_v25 = vadd.f32 %v1632_v49, %v801_v22  ;;  %v764_v26 = vadd.f32 %v763_v24, %v674_v23 }
  0xcd   : > { %v987_v27 = vmax.f32 %v955_v25, 0.0  ;;  %v940_v28 = vadd.f32 %v1632_v49, %v764_v26 }
  0xcf   : > { %1019 = vst [vmem:[%s1640_s7 + $0x98] sm:$0xff] %v987_v27  ;;  %v972_v29 = vmax.f32 %v940_v28, 0.0  ;;  %v714_v30 = vpop.f32.mrf.mxu2 }
  0xd0   : > { %v803_v31 = vpop.f32.mrf.mxu3 }
  0xd1   : > { %1004 = vst [vmem:[%s1640_s7 + $0x20] sm:$0xff] %v972_v29  ;;  %v804_v32 = vadd.f32 %v803_v31, %v714_v30  ;;  %v676_v33 = vpop.f32.mrf.mxu0 }
  0xd2   : > { %v765_v34 = vpop.f32.mrf.mxu1 }
  0xd3   : > { %v956_v35 = vadd.f32 %v1632_v49, %v804_v32  ;;  %v766_v36 = vadd.f32 %v765_v34, %v676_v33 }
  0xd5   : > { %v988_v37 = vmax.f32 %v956_v35, 0.0  ;;  %v941_v38 = vadd.f32 %v1632_v49, %v766_v36 }
  0xd7   : > { %1020 = vst [vmem:[%s1640_s7 + $0xa0] sm:$0xff] %v988_v37  ;;  %v973_v39 = vmax.f32 %v941_v38, 0.0  ;;  %v716_v40 = vpop.f32.mrf.mxu2 }
  0xd8   : > { %v805_v41 = vpop.f32.mrf.mxu3 }
  0xd9   : > { %1005 = vst [vmem:[%s1640_s7 + $0x28] sm:$0xff] %v973_v39  ;;  %v806_v42 = vadd.f32 %v805_v41, %v716_v40  ;;  %v679_v43 = vpop.f32.mrf.mxu0 }
  0xda   : > { %v768_v44 = vpop.f32.mrf.mxu1 }
  0xdb   : > { %v957_v45 = vadd.f32 %v1632_v49, %v806_v42  ;;  %v769_v46 = vadd.f32 %v768_v44, %v679_v43 }
  0xdd   : > { %v989_v47 = vmax.f32 %v957_v45, 0.0  ;;  %v942_v48 = vadd.f32 %v1632_v49, %v769_v46 }
  0xdf   : > { %1021 = vst [vmem:[%s1640_s7 + $0xa8] sm:$0xff] %v989_v47  ;;  %v974_v50 = vmax.f32 %v942_v48, 0.0  ;;  %v719_v51 = vpop.f32.mrf.mxu2 }
  0xe0   : > { %v808_v52 = vpop.f32.mrf.mxu3 }
  0xe1   : > { %1006 = vst [vmem:[%s1640_s7 + $0x30] sm:$0xff] %v974_v50  ;;  %v809_v53 = vadd.f32 %v808_v52, %v719_v51  ;;  %v681_v54 = vpop.f32.mrf.mxu0 }
  0xe2   : > { %v770_v55 = vpop.f32.mrf.mxu1 }
  0xe3   : > { %v958_v56 = vadd.f32 %v1632_v49, %v809_v53  ;;  %v771_v57 = vadd.f32 %v770_v55, %v681_v54 }
  0xe5   : > { %v990_v58 = vmax.f32 %v958_v56, 0.0  ;;  %v943_v59 = vadd.f32 %v1632_v49, %v771_v57 }
  0xe7   : > { %1022 = vst [vmem:[%s1640_s7 + $0xb0] sm:$0xff] %v990_v58  ;;  %v975_v60 = vmax.f32 %v943_v59, 0.0  ;;  %v721_v61 = vpop.f32.mrf.mxu2 }
  0xe8   : > { %v810_v62 = vpop.f32.mrf.mxu3 }
  0xe9   : > { %1007 = vst [vmem:[%s1640_s7 + $0x38] sm:$0xff] %v975_v60  ;;  %v811_v63 = vadd.f32 %v810_v62, %v721_v61  ;;  %v684_v0 = vpop.f32.mrf.mxu0 }
  0xea   : > { %v773_v1 = vpop.f32.mrf.mxu1 }
  0xeb   : > { %v959_v2 = vadd.f32 %v1632_v49, %v811_v63  ;;  %v774_v3 = vadd.f32 %v773_v1, %v684_v0 }
  0xed   : > { %v991_v4 = vmax.f32 %v959_v2, 0.0  ;;  %v944_v5 = vadd.f32 %v1632_v49, %v774_v3 }
  0xef   : > { %1023 = vst [vmem:[%s1640_s7 + $0xb8] sm:$0xff] %v991_v4  ;;  %v976_v6 = vmax.f32 %v944_v5, 0.0  ;;  %v724_v7 = vpop.f32.mrf.mxu2 }
  0xf0   : > { %v813_v8 = vpop.f32.mrf.mxu3 }
  0xf1   : > { %1008 = vst [vmem:[%s1640_s7 + $0x40] sm:$0xff] %v976_v6  ;;  %v814_v9 = vadd.f32 %v813_v8, %v724_v7  ;;  %v686_v10 = vpop.f32.mrf.mxu0 }
  0xf2   : > { %v775_v11 = vpop.f32.mrf.mxu1 }
  0xf3   : > { %v960_v12 = vadd.f32 %v1632_v49, %v814_v9  ;;  %v776_v13 = vadd.f32 %v775_v11, %v686_v10 }
  0xf5   : > { %v992_v14 = vmax.f32 %v960_v12, 0.0  ;;  %v945_v15 = vadd.f32 %v1632_v49, %v776_v13 }
  0xf7   : > { %1024 = vst [vmem:[%s1640_s7 + $0xc0] sm:$0xff] %v992_v14  ;;  %v977_v16 = vmax.f32 %v945_v15, 0.0  ;;  %v726_v17 = vpop.f32.mrf.mxu2 }
  0xf8   : > { %v815_v18 = vpop.f32.mrf.mxu3 }
  0xf9   : > { %1009 = vst [vmem:[%s1640_s7 + $0x48] sm:$0xff] %v977_v16  ;;  %v816_v19 = vadd.f32 %v815_v18, %v726_v17  ;;  %v689_v20 = vpop.f32.mrf.mxu0 }
  0xfa   : > { %v778_v21 = vpop.f32.mrf.mxu1 }
  0xfb   : > { %v961_v22 = vadd.f32 %v1632_v49, %v816_v19  ;;  %v779_v23 = vadd.f32 %v778_v21, %v689_v20 }
  0xfd   : > { %v993_v24 = vmax.f32 %v961_v22, 0.0  ;;  %v946_v25 = vadd.f32 %v1632_v49, %v779_v23 }
  0xff   : > { %1025 = vst [vmem:[%s1640_s7 + $0xc8] sm:$0xff] %v993_v24  ;;  %v978_v26 = vmax.f32 %v946_v25, 0.0  ;;  %v729_v27 = vpop.f32.mrf.mxu2 }
 0x100   : > { %v818_v28 = vpop.f32.mrf.mxu3 }
 0x101   : > { %1010 = vst [vmem:[%s1640_s7 + $0x50] sm:$0xff] %v978_v26  ;;  %v819_v29 = vadd.f32 %v818_v28, %v729_v27  ;;  %v691_v30 = vpop.f32.mrf.mxu0 }
 0x102   : > { %v780_v31 = vpop.f32.mrf.mxu1 }
 0x103   : > { %v962_v32 = vadd.f32 %v1632_v49, %v819_v29  ;;  %v781_v33 = vadd.f32 %v780_v31, %v691_v30 }
 0x105   : > { %v994_v34 = vmax.f32 %v962_v32, 0.0  ;;  %v947_v35 = vadd.f32 %v1632_v49, %v781_v33 }
 0x107   : > { %1026 = vst [vmem:[%s1640_s7 + $0xd0] sm:$0xff] %v994_v34  ;;  %v979_v36 = vmax.f32 %v947_v35, 0.0  ;;  %v731_v37 = vpop.f32.mrf.mxu2 }
 0x108   : > { %v820_v38 = vpop.f32.mrf.mxu3 }
 0x109   : > { %1011 = vst [vmem:[%s1640_s7 + $0x58] sm:$0xff] %v979_v36  ;;  %v821_v39 = vadd.f32 %v820_v38, %v731_v37  ;;  %v694_v40 = vpop.f32.mrf.mxu0 }
 0x10a   : > { %v783_v41 = vpop.f32.mrf.mxu1 }
 0x10b   : > { %v963_v42 = vadd.f32 %v1632_v49, %v821_v39  ;;  %v784_v43 = vadd.f32 %v783_v41, %v694_v40 }
 0x10d   : > { %v995_v44 = vmax.f32 %v963_v42, 0.0  ;;  %v948_v45 = vadd.f32 %v1632_v49, %v784_v43 }
 0x10f   : > { %1027 = vst [vmem:[%s1640_s7 + $0xd8] sm:$0xff] %v995_v44  ;;  %v980_v46 = vmax.f32 %v948_v45, 0.0  ;;  %v734_v47 = vpop.f32.mrf.mxu2 }
 0x110   : > { %v823_v48 = vpop.f32.mrf.mxu3 }
 0x111   : > { %1012 = vst [vmem:[%s1640_s7 + $0x60] sm:$0xff] %v980_v46  ;;  %v824_v50 = vadd.f32 %v823_v48, %v734_v47  ;;  %v696_v51 = vpop.f32.mrf.mxu0 }
 0x112   : > { %v785_v52 = vpop.f32.mrf.mxu1 }
 0x113   : > { %v964_v53 = vadd.f32 %v1632_v49, %v824_v50  ;;  %v786_v54 = vadd.f32 %v785_v52, %v696_v51 }
 0x115   : > { %v996_v55 = vmax.f32 %v964_v53, 0.0  ;;  %v949_v56 = vadd.f32 %v1632_v49, %v786_v54 }
 0x117   : > { %1028 = vst [vmem:[%s1640_s7 + $0xe0] sm:$0xff] %v996_v55  ;;  %v981_v57 = vmax.f32 %v949_v56, 0.0  ;;  %v736_v58 = vpop.f32.mrf.mxu2 }
 0x118   : > { %v825_v59 = vpop.f32.mrf.mxu3 }
 0x119   : > { %1013 = vst [vmem:[%s1640_s7 + $0x68] sm:$0xff] %v981_v57  ;;  %v826_v60 = vadd.f32 %v825_v59, %v736_v58  ;;  %v699_v61 = vpop.f32.mrf.mxu0 }
 0x11a   : > { %v788_v62 = vpop.f32.mrf.mxu1 }
 0x11b   : > { %v965_v63 = vadd.f32 %v1632_v49, %v826_v60  ;;  %v789_v0 = vadd.f32 %v788_v62, %v699_v61 }
 0x11d   : > { %v997_v1 = vmax.f32 %v965_v63, 0.0  ;;  %v950_v2 = vadd.f32 %v1632_v49, %v789_v0 }
 0x11f   : > { %1029 = vst [vmem:[%s1640_s7 + $0xe8] sm:$0xff] %v997_v1  ;;  %v982_v3 = vmax.f32 %v950_v2, 0.0  ;;  %v739_v4 = vpop.f32.mrf.mxu2 }
 0x120   : > { %v828_v5 = vpop.f32.mrf.mxu3 }
 0x121   : > { %1014 = vst [vmem:[%s1640_s7 + $0x70] sm:$0xff] %v982_v3  ;;  %v829_v6 = vadd.f32 %v828_v5, %v739_v4  ;;  %v701_v7 = vpop.f32.mrf.mxu0 }
 0x122   : > { %v790_v8 = vpop.f32.mrf.mxu1 }
 0x123   : > { %v966_v9 = vadd.f32 %v1632_v49, %v829_v6  ;;  %v791_v10 = vadd.f32 %v790_v8, %v701_v7 }
 0x125   : > { %v998_v11 = vmax.f32 %v966_v9, 0.0  ;;  %v951_v12 = vadd.f32 %v1632_v49, %v791_v10 }
 0x127   : > { %1030 = vst [vmem:[%s1640_s7 + $0xf0] sm:$0xff] %v998_v11  ;;  %v983_v13 = vmax.f32 %v951_v12, 0.0  ;;  %v741_v14 = vpop.f32.mrf.mxu2 }
 0x128   : > { %v830_v15 = vpop.f32.mrf.mxu3 }
 0x129   : > { %1015 = vst [vmem:[%s1640_s7 + $0x78] sm:$0xff] %v983_v13  ;;  %v831_v16 = vadd.f32 %v830_v15, %v741_v14 }
 0x12b   : > { %v967_v17 = vadd.f32 %v1632_v49, %v831_v16 }
 0x12d   : > { %v999_v18 = vmax.f32 %v967_v17, 0.0 }
 0x12f   : > { %1031 = vst [vmem:[%s1640_s7 + $0xf8] sm:$0xff] %v999_v18 }
 0x130 PF: > { %s13_s14 = sadd.s32 1, %s1464_s14   ;;  %s1718_s12 = smov %s1460_s13 }
 0x131   : > { %p10_p5 = scmp.ge.s32.totalorder %s13_s14, 10   ;;  %s1719_s13 = smov %s1721_s15 }
 0x133   :  { %12 = sbr.rel (!%p10_p5) target bundleno = 2 (0x2), region = 76 }

// kernel: _lambda_.57
= control target key start
LH: loop header
LB: loop body
LE: loop exit
PB: predicated region body
PF: predicated region fallthrough
CT: control target
= control target key end

     0   :  { %s1112_s12 = smov 0   ;;  %s1114_s13 = smov 0   ;;  %s1265_s0 = inlined_call_operand.vmem [shape: bf16[512,128], index: 0, kind: input, shape index: {}]   ;;  %s1266_s1 = inlined_call_operand.vmem [shape: bf16[128,128], index: 1, kind: input, shape index: {}]   ;;  %s1267_s2 = inlined_call_operand.vmem [shape: f32[1,128], index: 2, kind: input, shape index: {}]   ;;  %s1268_s3 = inlined_call_operand.vmem [shape: f32[512,128], index: 3, kind: output, shape index: {}]  }
   0x1   :  { %s1116_s14 = smov 0  }
   0x2 LB: > { %s32_s15 = sadd.s32 1, %s1086_s13  ;;  %p892_p0 = scmp.ge.s32.totalorder %s1090_s14, 1  ;;  %s1090_s14 = sphi %s1116_s14, %s13_s14   ;;  %s1086_s13 = sphi %s1114_s13, %s1270_s13   ;;  %s1082_s12 = sphi %s1112_s12, %s1269_s12  }
   0x3   : > { %p34_p1 = scmp.ge.s32.totalorder %s32_s15, 2  ;;  %p188_p2 = scmp.lt.s32.totalorder %s1090_s14, 3 }
   0x5   : > { %s1272_s15 = smov (%p34_p1, %s32_s15), 0  ;;  %p189_p3 = pnand %p892_p0, %p188_p2 }
   0x6   : > { %s893_s24 = sshll.u32 (!%p189_p3), %s1082_s12, 5 }
   0x7   : > { %192 = sbr.rel (%p189_p3) target bundleno = 237 (0xed), region = 32  ;;  %p230_p4 = scmp.lt.s32.totalorder (!%p189_p3), %s893_s24, 63 }
   0xc   : > { %v1018_v0 = vld [vmem:[%s1266_s1 + $0x38] sm:$0xff]  ;;  %v1017_v1 = vld [vmem:[%s1266_s1 + $0x30] sm:$0xff]  ;;  %v1016_v2 = vld [vmem:[%s1266_s1 + $0x28] sm:$0xff]  ;;  %s1274_s24 = smov (!%p230_p4, %s893_s24), 63 }
   0xd   : > { %519 = vmatpush.bf16.msra.mxu0 %v1018_v0  ;;  %1019 = vmatpush.bf16.msra.mxu1 %v1018_v0  ;;  %v1015_v3 = vld [vmem:[%s1266_s1 + $0x20] sm:$0xff]  ;;  %v1014_v4 = vld [vmem:[%s1266_s1 + $0x18] sm:$0xff]  ;;  %v1013_v5 = vld [vmem:[%s1266_s1 + $0x10] sm:$0xff]  ;;  %s894_s4 = sshll.u32 %s1274_s24, 2  ;;  %s896_s10 = sshll.u32 %s1274_s24, 3 }
   0xe   : > { %1020 = vmatpush.bf16.msra.mxu2 %v1018_v0  ;;  %1021 = vmatpush.bf16.msra.mxu3 %v1018_v0  ;;  %v1012_v6 = vld [vmem:[%s1266_s1 + $0x8] sm:$0xff]  ;;  %v1011_v7 = vld [vmem:[%s1266_s1] sm:$0xff]  ;;  %s1163_s9 = scalar_lea.vmem %s1265_s0, %s894_s4  ;;  %s1190_s18 = scalar_lea.vmem %s1268_s3, %s896_s10 }
   0xf   : > { %v995_v8 = vld [vmem:[%s1163_s9] sm:$0xff]  ;;  %v996_v12 = vld [vmem:[%s1163_s9 + $0x8] sm:$0xff]  ;;  %v997_v16 = vld [vmem:[%s1163_s9 + $0x10] sm:$0xff] }
  0x10   : > { %v999_v9 = vld [vmem:[%s1163_s9 + $0x20] sm:$0xff]  ;;  %v1000_v13 = vld [vmem:[%s1163_s9 + $0x28] sm:$0xff]  ;;  %v1001_v17 = vld [vmem:[%s1163_s9 + $0x30] sm:$0xff] }
  0x11   : > { %520 = vmatpush.bf16.msra.mxu0 %v1017_v1  ;;  %1022 = vmatpush.bf16.msra.mxu1 %v1017_v1  ;;  %v1003_v10 = vld [vmem:[%s1163_s9 + $0x40] sm:$0xff]  ;;  %v1004_v14 = vld [vmem:[%s1163_s9 + $0x48] sm:$0xff]  ;;  %v1005_v18 = vld [vmem:[%s1163_s9 + $0x50] sm:$0xff] }
  0x12   : > { %1023 = vmatpush.bf16.msra.mxu2 %v1017_v1  ;;  %1024 = vmatpush.bf16.msra.mxu3 %v1017_v1  ;;  %v1007_v11 = vld [vmem:[%s1163_s9 + $0x60] sm:$0xff]  ;;  %v1008_v15 = vld [vmem:[%s1163_s9 + $0x68] sm:$0xff]  ;;  %v1009_v19 = vld [vmem:[%s1163_s9 + $0x70] sm:$0xff] }
  0x13   : > { %v998_v20 = vld [vmem:[%s1163_s9 + $0x18] sm:$0xff]  ;;  %v1185_v24 = vld [vmem:[%s1267_s2] ss:$0 sm:$0xff] }
  0x14   : > { %v1002_v21 = vld [vmem:[%s1163_s9 + $0x38] sm:$0xff] }
  0x15   : > { %521 = vmatpush.bf16.msra.mxu0 %v1016_v2  ;;  %1025 = vmatpush.bf16.msra.mxu1 %v1016_v2  ;;  %v1006_v22 = vld [vmem:[%s1163_s9 + $0x58] sm:$0xff] }
  0x16   : > { %1026 = vmatpush.bf16.msra.mxu2 %v1016_v2  ;;  %1027 = vmatpush.bf16.msra.mxu3 %v1016_v2  ;;  %v1010_v23 = vld [vmem:[%s1163_s9 + $0x78] sm:$0xff] }
  0x19   : > { %522 = vmatpush.bf16.msra.mxu0 %v1015_v3  ;;  %1028 = vmatpush.bf16.msra.mxu1 %v1015_v3 }
  0x1a   : > { %1029 = vmatpush.bf16.msra.mxu2 %v1015_v3  ;;  %1030 = vmatpush.bf16.msra.mxu3 %v1015_v3 }
  0x1d   : > { %523 = vmatpush.bf16.msra.mxu0 %v1014_v4  ;;  %1031 = vmatpush.bf16.msra.mxu1 %v1014_v4 }
  0x1e   : > { %1032 = vmatpush.bf16.msra.mxu2 %v1014_v4  ;;  %1033 = vmatpush.bf16.msra.mxu3 %v1014_v4 }
  0x21   : > { %524 = vmatpush.bf16.msra.mxu0 %v1013_v5  ;;  %1034 = vmatpush.bf16.msra.mxu1 %v1013_v5 }
  0x22   : > { %1035 = vmatpush.bf16.msra.mxu2 %v1013_v5  ;;  %1036 = vmatpush.bf16.msra.mxu3 %v1013_v5 }
  0x25   : > { %525 = vmatpush.bf16.msra.mxu0 %v1012_v6  ;;  %1037 = vmatpush.bf16.msra.mxu1 %v1012_v6 }
  0x26   : > { %1038 = vmatpush.bf16.msra.mxu2 %v1012_v6  ;;  %1039 = vmatpush.bf16.msra.mxu3 %v1012_v6 }
  0x29   : > { %526 = vmatpush.bf16.msra.mxu0 %v1011_v7  ;;  %1040 = vmatpush.bf16.msra.mxu1 %v1011_v7 }
  0x2a   : > { %1041 = vmatpush.bf16.msra.mxu2 %v1011_v7  ;;  %1042 = vmatpush.bf16.msra.mxu3 %v1011_v7 }
  0x2c   : > { %527 = vmatmul.bf16.vlgmr.msra.gmra.mxu0 %v995_v8  ;;  %547 = vmatmul.bf16.vlgmr.msra.gmra.mxu1 %v999_v9 }
  0x2d   : > { %567 = vmatmul.bf16.vlgmr.msra.gmra.mxu2 %v1003_v10  ;;  %587 = vmatmul.bf16.vlgmr.msra.gmra.mxu3 %v1007_v11 }
  0x3c   : > { %532 = vmatmul.bf16.gmra.mxu0 %v996_v12  ;;  %552 = vmatmul.bf16.gmra.mxu1 %v1000_v13 }
  0x3d   : > { %572 = vmatmul.bf16.gmra.mxu2 %v1004_v14  ;;  %592 = vmatmul.bf16.gmra.mxu3 %v1008_v15 }
  0x4c   : > { %537 = vmatmul.bf16.gmra.mxu0 %v997_v16  ;;  %557 = vmatmul.bf16.gmra.mxu1 %v1001_v17 }
  0x4d   : > { %577 = vmatmul.bf16.gmra.mxu2 %v1005_v18  ;;  %597 = vmatmul.bf16.gmra.mxu3 %v1009_v19 }
  0x5c   : > { %542 = vmatmul.bf16.gmra.mxu0 %v998_v20  ;;  %562 = vmatmul.bf16.gmra.mxu1 %v1002_v21 }
  0x5d   : > { %582 = vmatmul.bf16.gmra.mxu2 %v1006_v22  ;;  %602 = vmatmul.bf16.gmra.mxu3 %v1010_v23 }
  0xa9   : > { %v528_v25 = vpop.f32.mrf.mxu0  ;;  %v548_v26 = vpop.f32.mrf.mxu1 }
  0xaa   : > { %v711_v27 = vadd.f32 %v1185_v24, %v528_v25  ;;  %v719_v28 = vadd.f32 %v1185_v24, %v548_v26 }
  0xac   : > { %743 = vst [vmem:[%s1190_s18] sm:$0xff] %v711_v27 }
  0xad   : > { %751 = vst [vmem:[%s1190_s18 + $0x40] sm:$0xff] %v719_v28 }
  0xb0   : > { %v568_v29 = vpop.f32.mrf.mxu2  ;;  %v588_v30 = vpop.f32.mrf.mxu3 }
  0xb1   : > { %v727_v31 = vadd.f32 %v1185_v24, %v568_v29  ;;  %v735_v32 = vadd.f32 %v1185_v24, %v588_v30  ;;  %v530_v33 = vpop.f32.mrf.mxu0  ;;  %v550_v34 = vpop.f32.mrf.mxu1 }
  0xb2   : > { %v712_v35 = vadd.f32 %v1185_v24, %v530_v33  ;;  %v720_v36 = vadd.f32 %v1185_v24, %v550_v34 }
  0xb3   : > { %759 = vst [vmem:[%s1190_s18 + $0x80] sm:$0xff] %v727_v31 }
  0xb4   : > { %767 = vst [vmem:[%s1190_s18 + $0xc0] sm:$0xff] %v735_v32 }
  0xb5   : > { %744 = vst [vmem:[%s1190_s18 + $0x8] sm:$0xff] %v712_v35 }
  0xb6   : > { %752 = vst [vmem:[%s1190_s18 + $0x48] sm:$0xff] %v720_v36 }
  0xb8   : > { %v570_v37 = vpop.f32.mrf.mxu2  ;;  %v590_v38 = vpop.f32.mrf.mxu3 }
  0xb9   : > { %v728_v39 = vadd.f32 %v1185_v24, %v570_v37  ;;  %v736_v40 = vadd.f32 %v1185_v24, %v590_v38  ;;  %v533_v41 = vpop.f32.mrf.mxu0  ;;  %v553_v42 = vpop.f32.mrf.mxu1 }
  0xba   : > { %v713_v43 = vadd.f32 %v1185_v24, %v533_v41  ;;  %v721_v44 = vadd.f32 %v1185_v24, %v553_v42 }
  0xbb   : > { %760 = vst [vmem:[%s1190_s18 + $0x88] sm:$0xff] %v728_v39 }
  0xbc   : > { %768 = vst [vmem:[%s1190_s18 + $0xc8] sm:$0xff] %v736_v40 }
  0xbd   : > { %745 = vst [vmem:[%s1190_s18 + $0x10] sm:$0xff] %v713_v43 }
  0xbe   : > { %753 = vst [vmem:[%s1190_s18 + $0x50] sm:$0xff] %v721_v44 }
  0xc0   : > { %v573_v45 = vpop.f32.mrf.mxu2  ;;  %v593_v46 = vpop.f32.mrf.mxu3 }
  0xc1   : > { %v729_v47 = vadd.f32 %v1185_v24, %v573_v45  ;;  %v737_v48 = vadd.f32 %v1185_v24, %v593_v46  ;;  %v535_v49 = vpop.f32.mrf.mxu0  ;;  %v555_v50 = vpop.f32.mrf.mxu1 }
  0xc2   : > { %v714_v51 = vadd.f32 %v1185_v24, %v535_v49  ;;  %v722_v52 = vadd.f32 %v1185_v24, %v555_v50 }
  0xc3   : > { %761 = vst [vmem:[%s1190_s18 + $0x90] sm:$0xff] %v729_v47 }
  0xc4   : > { %769 = vst [vmem:[%s1190_s18 + $0xd0] sm:$0xff] %v737_v48 }
  0xc5   : > { %746 = vst [vmem:[%s1190_s18 + $0x18] sm:$0xff] %v714_v51 }
  0xc6   : > { %754 = vst [vmem:[%s1190_s18 + $0x58] sm:$0xff] %v722_v52 }
  0xc8   : > { %v575_v53 = vpop.f32.mrf.mxu2  ;;  %v595_v54 = vpop.f32.mrf.mxu3 }
  0xc9   : > { %v730_v55 = vadd.f32 %v1185_v24, %v575_v53  ;;  %v738_v56 = vadd.f32 %v1185_v24, %v595_v54  ;;  %v538_v57 = vpop.f32.mrf.mxu0  ;;  %v558_v58 = vpop.f32.mrf.mxu1 }
  0xca   : > { %v715_v59 = vadd.f32 %v1185_v24, %v538_v57  ;;  %v723_v60 = vadd.f32 %v1185_v24, %v558_v58 }
  0xcb   : > { %762 = vst [vmem:[%s1190_s18 + $0x98] sm:$0xff] %v730_v55 }
  0xcc   : > { %770 = vst [vmem:[%s1190_s18 + $0xd8] sm:$0xff] %v738_v56 }
  0xcd   : > { %747 = vst [vmem:[%s1190_s18 + $0x20] sm:$0xff] %v715_v59 }
  0xce   : > { %755 = vst [vmem:[%s1190_s18 + $0x60] sm:$0xff] %v723_v60 }
  0xd0   : > { %v578_v61 = vpop.f32.mrf.mxu2  ;;  %v598_v62 = vpop.f32.mrf.mxu3 }
  0xd1   : > { %v731_v63 = vadd.f32 %v1185_v24, %v578_v61  ;;  %v739_v0 = vadd.f32 %v1185_v24, %v598_v62  ;;  %v540_v1 = vpop.f32.mrf.mxu0  ;;  %v560_v2 = vpop.f32.mrf.mxu1 }
  0xd2   : > { %v716_v3 = vadd.f32 %v1185_v24, %v540_v1  ;;  %v724_v4 = vadd.f32 %v1185_v24, %v560_v2 }
  0xd3   : > { %763 = vst [vmem:[%s1190_s18 + $0xa0] sm:$0xff] %v731_v63 }
  0xd4   : > { %771 = vst [vmem:[%s1190_s18 + $0xe0] sm:$0xff] %v739_v0 }
  0xd5   : > { %748 = vst [vmem:[%s1190_s18 + $0x28] sm:$0xff] %v716_v3 }
  0xd6   : > { %756 = vst [vmem:[%s1190_s18 + $0x68] sm:$0xff] %v724_v4 }
  0xd8   : > { %v580_v5 = vpop.f32.mrf.mxu2  ;;  %v600_v6 = vpop.f32.mrf.mxu3 }
  0xd9   : > { %v732_v7 = vadd.f32 %v1185_v24, %v580_v5  ;;  %v740_v8 = vadd.f32 %v1185_v24, %v600_v6  ;;  %v543_v9 = vpop.f32.mrf.mxu0  ;;  %v563_v10 = vpop.f32.mrf.mxu1 }
  0xda   : > { %v717_v11 = vadd.f32 %v1185_v24, %v543_v9  ;;  %v725_v12 = vadd.f32 %v1185_v24, %v563_v10 }
  0xdb   : > { %764 = vst [vmem:[%s1190_s18 + $0xa8] sm:$0xff] %v732_v7 }
  0xdc   : > { %772 = vst [vmem:[%s1190_s18 + $0xe8] sm:$0xff] %v740_v8 }
  0xdd   : > { %749 = vst [vmem:[%s1190_s18 + $0x30] sm:$0xff] %v717_v11 }
  0xde   : > { %757 = vst [vmem:[%s1190_s18 + $0x70] sm:$0xff] %v725_v12 }
  0xe0   : > { %v583_v13 = vpop.f32.mrf.mxu2  ;;  %v603_v14 = vpop.f32.mrf.mxu3 }
  0xe1   : > { %v733_v15 = vadd.f32 %v1185_v24, %v583_v13  ;;  %v741_v16 = vadd.f32 %v1185_v24, %v603_v14  ;;  %v545_v17 = vpop.f32.mrf.mxu0  ;;  %v565_v18 = vpop.f32.mrf.mxu1 }
  0xe2   : > { %v718_v19 = vadd.f32 %v1185_v24, %v545_v17  ;;  %v726_v20 = vadd.f32 %v1185_v24, %v565_v18 }
  0xe3   : > { %765 = vst [vmem:[%s1190_s18 + $0xb0] sm:$0xff] %v733_v15 }
  0xe4   : > { %773 = vst [vmem:[%s1190_s18 + $0xf0] sm:$0xff] %v741_v16 }
  0xe5   : > { %750 = vst [vmem:[%s1190_s18 + $0x38] sm:$0xff] %v718_v19 }
  0xe6   : > { %758 = vst [vmem:[%s1190_s18 + $0x78] sm:$0xff] %v726_v20 }
  0xe8   : > { %v585_v21 = vpop.f32.mrf.mxu2  ;;  %v605_v22 = vpop.f32.mrf.mxu3 }
  0xe9   : > { %v734_v23 = vadd.f32 %v1185_v24, %v585_v21  ;;  %v742_v25 = vadd.f32 %v1185_v24, %v605_v22 }
  0xeb   : > { %766 = vst [vmem:[%s1190_s18 + $0xb8] sm:$0xff] %v734_v23 }
  0xec   : > { %774 = vst [vmem:[%s1190_s18 + $0xf8] sm:$0xff] %v742_v25 }
  0xed PF: > { %s13_s14 = sadd.s32 1, %s1090_s14   ;;  %s1269_s12 = smov %s1086_s13 }
  0xee   : > { %p10_p5 = scmp.ge.s32.totalorder %s13_s14, 4   ;;  %s1270_s13 = smov %s1272_s15 }
  0xf0   :  { %12 = sbr.rel (!%p10_p5) target bundleno = 2 (0x2), region = 76 }

// kernel: _lambda_.55
= control target key start
LH: loop header
LB: loop body
LE: loop exit
PB: predicated region body
PF: predicated region fallthrough
CT: control target
= control target key end

     0   :  { %s1144_s12 = smov 0   ;;  %s1146_s13 = smov 0   ;;  %s1297_s0 = inlined_call_operand.vmem [shape: bf16[512,128], index: 0, kind: input, shape index: {}]   ;;  %s1298_s1 = inlined_call_operand.vmem [shape: bf16[128,128], index: 1, kind: input, shape index: {}]   ;;  %s1299_s2 = inlined_call_operand.vmem [shape: f32[1,128], index: 2, kind: input, shape index: {}]   ;;  %s1300_s3 = inlined_call_operand.vmem [shape: f32[512,128], index: 3, kind: output, shape index: {}]  }
   0x1   :  { %s1148_s14 = smov 0  }
   0x2 LB: > { %s32_s15 = sadd.s32 1, %s1118_s13  ;;  %p924_p0 = scmp.ge.s32.totalorder %s1122_s14, 1  ;;  %s1122_s14 = sphi %s1148_s14, %s13_s14   ;;  %s1118_s13 = sphi %s1146_s13, %s1302_s13   ;;  %s1114_s12 = sphi %s1144_s12, %s1301_s12  }
   0x3   : > { %p34_p1 = scmp.ge.s32.totalorder %s32_s15, 2  ;;  %p188_p2 = scmp.lt.s32.totalorder %s1122_s14, 3 }
   0x5   : > { %s1304_s15 = smov (%p34_p1, %s32_s15), 0  ;;  %p189_p3 = pnand %p924_p0, %p188_p2 }
   0x6   : > { %s925_s24 = sshll.u32 (!%p189_p3), %s1114_s12, 5 }
   0x7   : > { %192 = sbr.rel (%p189_p3) target bundleno = 239 (0xef), region = 32  ;;  %p230_p4 = scmp.lt.s32.totalorder (!%p189_p3), %s925_s24, 63 }
   0xc   : > { %v1050_v0 = vld [vmem:[%s1298_s1 + $0x38] sm:$0xff]  ;;  %v1049_v1 = vld [vmem:[%s1298_s1 + $0x30] sm:$0xff]  ;;  %v1048_v2 = vld [vmem:[%s1298_s1 + $0x28] sm:$0xff]  ;;  %s1306_s24 = smov (!%p230_p4, %s925_s24), 63 }
   0xd   : > { %519 = vmatpush.bf16.msra.mxu0 %v1050_v0  ;;  %1051 = vmatpush.bf16.msra.mxu1 %v1050_v0  ;;  %v1047_v3 = vld [vmem:[%s1298_s1 + $0x20] sm:$0xff]  ;;  %v1046_v4 = vld [vmem:[%s1298_s1 + $0x18] sm:$0xff]  ;;  %v1045_v5 = vld [vmem:[%s1298_s1 + $0x10] sm:$0xff]  ;;  %s926_s4 = sshll.u32 %s1306_s24, 2  ;;  %s928_s12 = sshll.u32 %s1306_s24, 3 }
   0xe   : > { %1052 = vmatpush.bf16.msra.mxu2 %v1050_v0  ;;  %1053 = vmatpush.bf16.msra.mxu3 %v1050_v0  ;;  %v1044_v6 = vld [vmem:[%s1298_s1 + $0x8] sm:$0xff]  ;;  %v1043_v7 = vld [vmem:[%s1298_s1] sm:$0xff]  ;;  %s1195_s9 = scalar_lea.vmem %s1297_s0, %s926_s4  ;;  %s1224_s18 = scalar_lea.vmem %s1300_s3, %s928_s12 }
   0xf   : > { %v1027_v8 = vld [vmem:[%s1195_s9] sm:$0xff]  ;;  %v1028_v12 = vld [vmem:[%s1195_s9 + $0x8] sm:$0xff]  ;;  %v1029_v16 = vld [vmem:[%s1195_s9 + $0x10] sm:$0xff] }
  0x10   : > { %v1031_v9 = vld [vmem:[%s1195_s9 + $0x20] sm:$0xff]  ;;  %v1032_v13 = vld [vmem:[%s1195_s9 + $0x28] sm:$0xff]  ;;  %v1033_v17 = vld [vmem:[%s1195_s9 + $0x30] sm:$0xff] }
  0x11   : > { %520 = vmatpush.bf16.msra.mxu0 %v1049_v1  ;;  %1054 = vmatpush.bf16.msra.mxu1 %v1049_v1  ;;  %v1035_v10 = vld [vmem:[%s1195_s9 + $0x40] sm:$0xff]  ;;  %v1036_v14 = vld [vmem:[%s1195_s9 + $0x48] sm:$0xff]  ;;  %v1037_v18 = vld [vmem:[%s1195_s9 + $0x50] sm:$0xff] }
  0x12   : > { %1055 = vmatpush.bf16.msra.mxu2 %v1049_v1  ;;  %1056 = vmatpush.bf16.msra.mxu3 %v1049_v1  ;;  %v1039_v11 = vld [vmem:[%s1195_s9 + $0x60] sm:$0xff]  ;;  %v1040_v15 = vld [vmem:[%s1195_s9 + $0x68] sm:$0xff]  ;;  %v1041_v19 = vld [vmem:[%s1195_s9 + $0x70] sm:$0xff] }
  0x13   : > { %v1030_v20 = vld [vmem:[%s1195_s9 + $0x18] sm:$0xff]  ;;  %v1216_v24 = vld [vmem:[%s1299_s2] ss:$0 sm:$0xff] }
  0x14   : > { %v1034_v21 = vld [vmem:[%s1195_s9 + $0x38] sm:$0xff] }
  0x15   : > { %521 = vmatpush.bf16.msra.mxu0 %v1048_v2  ;;  %1057 = vmatpush.bf16.msra.mxu1 %v1048_v2  ;;  %v1038_v22 = vld [vmem:[%s1195_s9 + $0x58] sm:$0xff] }
  0x16   : > { %1058 = vmatpush.bf16.msra.mxu2 %v1048_v2  ;;  %1059 = vmatpush.bf16.msra.mxu3 %v1048_v2  ;;  %v1042_v23 = vld [vmem:[%s1195_s9 + $0x78] sm:$0xff] }
  0x19   : > { %522 = vmatpush.bf16.msra.mxu0 %v1047_v3  ;;  %1060 = vmatpush.bf16.msra.mxu1 %v1047_v3 }
  0x1a   : > { %1061 = vmatpush.bf16.msra.mxu2 %v1047_v3  ;;  %1062 = vmatpush.bf16.msra.mxu3 %v1047_v3 }
  0x1d   : > { %523 = vmatpush.bf16.msra.mxu0 %v1046_v4  ;;  %1063 = vmatpush.bf16.msra.mxu1 %v1046_v4 }
  0x1e   : > { %1064 = vmatpush.bf16.msra.mxu2 %v1046_v4  ;;  %1065 = vmatpush.bf16.msra.mxu3 %v1046_v4 }
  0x21   : > { %524 = vmatpush.bf16.msra.mxu0 %v1045_v5  ;;  %1066 = vmatpush.bf16.msra.mxu1 %v1045_v5 }
  0x22   : > { %1067 = vmatpush.bf16.msra.mxu2 %v1045_v5  ;;  %1068 = vmatpush.bf16.msra.mxu3 %v1045_v5 }
  0x25   : > { %525 = vmatpush.bf16.msra.mxu0 %v1044_v6  ;;  %1069 = vmatpush.bf16.msra.mxu1 %v1044_v6 }
  0x26   : > { %1070 = vmatpush.bf16.msra.mxu2 %v1044_v6  ;;  %1071 = vmatpush.bf16.msra.mxu3 %v1044_v6 }
  0x29   : > { %526 = vmatpush.bf16.msra.mxu0 %v1043_v7  ;;  %1072 = vmatpush.bf16.msra.mxu1 %v1043_v7 }
  0x2a   : > { %1073 = vmatpush.bf16.msra.mxu2 %v1043_v7  ;;  %1074 = vmatpush.bf16.msra.mxu3 %v1043_v7 }
  0x2c   : > { %527 = vmatmul.bf16.vlgmr.msra.gmra.mxu0 %v1027_v8  ;;  %547 = vmatmul.bf16.vlgmr.msra.gmra.mxu1 %v1031_v9 }
  0x2d   : > { %567 = vmatmul.bf16.vlgmr.msra.gmra.mxu2 %v1035_v10  ;;  %587 = vmatmul.bf16.vlgmr.msra.gmra.mxu3 %v1039_v11 }
  0x3c   : > { %532 = vmatmul.bf16.gmra.mxu0 %v1028_v12  ;;  %552 = vmatmul.bf16.gmra.mxu1 %v1032_v13 }
  0x3d   : > { %572 = vmatmul.bf16.gmra.mxu2 %v1036_v14  ;;  %592 = vmatmul.bf16.gmra.mxu3 %v1040_v15 }
  0x4c   : > { %537 = vmatmul.bf16.gmra.mxu0 %v1029_v16  ;;  %557 = vmatmul.bf16.gmra.mxu1 %v1033_v17 }
  0x4d   : > { %577 = vmatmul.bf16.gmra.mxu2 %v1037_v18  ;;  %597 = vmatmul.bf16.gmra.mxu3 %v1041_v19 }
  0x5c   : > { %542 = vmatmul.bf16.gmra.mxu0 %v1030_v20  ;;  %562 = vmatmul.bf16.gmra.mxu1 %v1034_v21 }
  0x5d   : > { %582 = vmatmul.bf16.gmra.mxu2 %v1038_v22  ;;  %602 = vmatmul.bf16.gmra.mxu3 %v1042_v23 }
  0xa9   : > { %v528_v25 = vpop.f32.mrf.mxu0  ;;  %v548_v26 = vpop.f32.mrf.mxu1 }
  0xaa   : > { %v711_v27 = vadd.f32 %v1216_v24, %v528_v25  ;;  %v719_v28 = vadd.f32 %v1216_v24, %v548_v26 }
  0xac   : > { %v743_v29 = vmax.f32 %v711_v27, 0.0  ;;  %v751_v30 = vmax.f32 %v719_v28, 0.0 }
  0xae   : > { %775 = vst [vmem:[%s1224_s18] sm:$0xff] %v743_v29 }
  0xaf   : > { %783 = vst [vmem:[%s1224_s18 + $0x40] sm:$0xff] %v751_v30 }
  0xb0   : > { %v568_v31 = vpop.f32.mrf.mxu2  ;;  %v588_v32 = vpop.f32.mrf.mxu3 }
  0xb1   : > { %v727_v33 = vadd.f32 %v1216_v24, %v568_v31  ;;  %v735_v34 = vadd.f32 %v1216_v24, %v588_v32  ;;  %v530_v35 = vpop.f32.mrf.mxu0  ;;  %v550_v36 = vpop.f32.mrf.mxu1 }
  0xb2   : > { %v712_v37 = vadd.f32 %v1216_v24, %v530_v35  ;;  %v720_v38 = vadd.f32 %v1216_v24, %v550_v36 }
  0xb3   : > { %v759_v39 = vmax.f32 %v727_v33, 0.0  ;;  %v767_v40 = vmax.f32 %v735_v34, 0.0 }
  0xb4   : > { %v744_v41 = vmax.f32 %v712_v37, 0.0  ;;  %v752_v42 = vmax.f32 %v720_v38, 0.0 }
  0xb5   : > { %791 = vst [vmem:[%s1224_s18 + $0x80] sm:$0xff] %v759_v39 }
  0xb6   : > { %799 = vst [vmem:[%s1224_s18 + $0xc0] sm:$0xff] %v767_v40 }
  0xb7   : > { %776 = vst [vmem:[%s1224_s18 + $0x8] sm:$0xff] %v744_v41 }
  0xb8   : > { %784 = vst [vmem:[%s1224_s18 + $0x48] sm:$0xff] %v752_v42  ;;  %v570_v43 = vpop.f32.mrf.mxu2  ;;  %v590_v44 = vpop.f32.mrf.mxu3 }
  0xb9   : > { %v728_v45 = vadd.f32 %v1216_v24, %v570_v43  ;;  %v736_v46 = vadd.f32 %v1216_v24, %v590_v44  ;;  %v533_v47 = vpop.f32.mrf.mxu0  ;;  %v553_v48 = vpop.f32.mrf.mxu1 }
  0xba   : > { %v713_v49 = vadd.f32 %v1216_v24, %v533_v47  ;;  %v721_v50 = vadd.f32 %v1216_v24, %v553_v48 }
  0xbb   : > { %v760_v51 = vmax.f32 %v728_v45, 0.0  ;;  %v768_v52 = vmax.f32 %v736_v46, 0.0 }
  0xbc   : > { %v745_v53 = vmax.f32 %v713_v49, 0.0  ;;  %v753_v54 = vmax.f32 %v721_v50, 0.0 }
  0xbd   : > { %792 = vst [vmem:[%s1224_s18 + $0x88] sm:$0xff] %v760_v51 }
  0xbe   : > { %800 = vst [vmem:[%s1224_s18 + $0xc8] sm:$0xff] %v768_v52 }
  0xbf   : > { %777 = vst [vmem:[%s1224_s18 + $0x10] sm:$0xff] %v745_v53 }
  0xc0   : > { %785 = vst [vmem:[%s1224_s18 + $0x50] sm:$0xff] %v753_v54  ;;  %v573_v55 = vpop.f32.mrf.mxu2  ;;  %v593_v56 = vpop.f32.mrf.mxu3 }
  0xc1   : > { %v729_v57 = vadd.f32 %v1216_v24, %v573_v55  ;;  %v737_v58 = vadd.f32 %v1216_v24, %v593_v56  ;;  %v535_v59 = vpop.f32.mrf.mxu0  ;;  %v555_v60 = vpop.f32.mrf.mxu1 }
  0xc2   : > { %v714_v61 = vadd.f32 %v1216_v24, %v535_v59  ;;  %v722_v62 = vadd.f32 %v1216_v24, %v555_v60 }
  0xc3   : > { %v761_v63 = vmax.f32 %v729_v57, 0.0  ;;  %v769_v0 = vmax.f32 %v737_v58, 0.0 }
  0xc4   : > { %v746_v1 = vmax.f32 %v714_v61, 0.0  ;;  %v754_v2 = vmax.f32 %v722_v62, 0.0 }
  0xc5   : > { %793 = vst [vmem:[%s1224_s18 + $0x90] sm:$0xff] %v761_v63 }
  0xc6   : > { %801 = vst [vmem:[%s1224_s18 + $0xd0] sm:$0xff] %v769_v0 }
  0xc7   : > { %778 = vst [vmem:[%s1224_s18 + $0x18] sm:$0xff] %v746_v1 }
  0xc8   : > { %786 = vst [vmem:[%s1224_s18 + $0x58] sm:$0xff] %v754_v2  ;;  %v575_v3 = vpop.f32.mrf.mxu2  ;;  %v595_v4 = vpop.f32.mrf.mxu3 }
  0xc9   : > { %v730_v5 = vadd.f32 %v1216_v24, %v575_v3  ;;  %v738_v6 = vadd.f32 %v1216_v24, %v595_v4  ;;  %v538_v7 = vpop.f32.mrf.mxu0  ;;  %v558_v8 = vpop.f32.mrf.mxu1 }
  0xca   : > { %v715_v9 = vadd.f32 %v1216_v24, %v538_v7  ;;  %v723_v10 = vadd.f32 %v1216_v24, %v558_v8 }
  0xcb   : > { %v762_v11 = vmax.f32 %v730_v5, 0.0  ;;  %v770_v12 = vmax.f32 %v738_v6, 0.0 }
  0xcc   : > { %v747_v13 = vmax.f32 %v715_v9, 0.0  ;;  %v755_v14 = vmax.f32 %v723_v10, 0.0 }
  0xcd   : > { %794 = vst [vmem:[%s1224_s18 + $0x98] sm:$0xff] %v762_v11 }
  0xce   : > { %802 = vst [vmem:[%s1224_s18 + $0xd8] sm:$0xff] %v770_v12 }
  0xcf   : > { %779 = vst [vmem:[%s1224_s18 + $0x20] sm:$0xff] %v747_v13 }
  0xd0   : > { %787 = vst [vmem:[%s1224_s18 + $0x60] sm:$0xff] %v755_v14  ;;  %v578_v15 = vpop.f32.mrf.mxu2  ;;  %v598_v16 = vpop.f32.mrf.mxu3 }
  0xd1   : > { %v731_v17 = vadd.f32 %v1216_v24, %v578_v15  ;;  %v739_v18 = vadd.f32 %v1216_v24, %v598_v16  ;;  %v540_v19 = vpop.f32.mrf.mxu0  ;;  %v560_v20 = vpop.f32.mrf.mxu1 }
  0xd2   : > { %v716_v21 = vadd.f32 %v1216_v24, %v540_v19  ;;  %v724_v22 = vadd.f32 %v1216_v24, %v560_v20 }
  0xd3   : > { %v763_v23 = vmax.f32 %v731_v17, 0.0  ;;  %v771_v25 = vmax.f32 %v739_v18, 0.0 }
  0xd4   : > { %v748_v26 = vmax.f32 %v716_v21, 0.0  ;;  %v756_v27 = vmax.f32 %v724_v22, 0.0 }
  0xd5   : > { %795 = vst [vmem:[%s1224_s18 + $0xa0] sm:$0xff] %v763_v23 }
  0xd6   : > { %803 = vst [vmem:[%s1224_s18 + $0xe0] sm:$0xff] %v771_v25 }
  0xd7   : > { %780 = vst [vmem:[%s1224_s18 + $0x28] sm:$0xff] %v748_v26 }
  0xd8   : > { %788 = vst [vmem:[%s1224_s18 + $0x68] sm:$0xff] %v756_v27  ;;  %v580_v28 = vpop.f32.mrf.mxu2  ;;  %v600_v29 = vpop.f32.mrf.mxu3 }
  0xd9   : > { %v732_v30 = vadd.f32 %v1216_v24, %v580_v28  ;;  %v740_v31 = vadd.f32 %v1216_v24, %v600_v29  ;;  %v543_v32 = vpop.f32.mrf.mxu0  ;;  %v563_v33 = vpop.f32.mrf.mxu1 }
  0xda   : > { %v717_v34 = vadd.f32 %v1216_v24, %v543_v32  ;;  %v725_v35 = vadd.f32 %v1216_v24, %v563_v33 }
  0xdb   : > { %v764_v36 = vmax.f32 %v732_v30, 0.0  ;;  %v772_v37 = vmax.f32 %v740_v31, 0.0 }
  0xdc   : > { %v749_v38 = vmax.f32 %v717_v34, 0.0  ;;  %v757_v39 = vmax.f32 %v725_v35, 0.0 }
  0xdd   : > { %796 = vst [vmem:[%s1224_s18 + $0xa8] sm:$0xff] %v764_v36 }
  0xde   : > { %804 = vst [vmem:[%s1224_s18 + $0xe8] sm:$0xff] %v772_v37 }
  0xdf   : > { %781 = vst [vmem:[%s1224_s18 + $0x30] sm:$0xff] %v749_v38 }
  0xe0   : > { %789 = vst [vmem:[%s1224_s18 + $0x70] sm:$0xff] %v757_v39  ;;  %v583_v40 = vpop.f32.mrf.mxu2  ;;  %v603_v41 = vpop.f32.mrf.mxu3 }
  0xe1   : > { %v733_v42 = vadd.f32 %v1216_v24, %v583_v40  ;;  %v741_v43 = vadd.f32 %v1216_v24, %v603_v41  ;;  %v545_v44 = vpop.f32.mrf.mxu0  ;;  %v565_v45 = vpop.f32.mrf.mxu1 }
  0xe2   : > { %v718_v46 = vadd.f32 %v1216_v24, %v545_v44  ;;  %v726_v47 = vadd.f32 %v1216_v24, %v565_v45 }
  0xe3   : > { %v765_v48 = vmax.f32 %v733_v42, 0.0  ;;  %v773_v49 = vmax.f32 %v741_v43, 0.0 }
  0xe4   : > { %v750_v50 = vmax.f32 %v718_v46, 0.0  ;;  %v758_v51 = vmax.f32 %v726_v47, 0.0 }
  0xe5   : > { %797 = vst [vmem:[%s1224_s18 + $0xb0] sm:$0xff] %v765_v48 }
  0xe6   : > { %805 = vst [vmem:[%s1224_s18 + $0xf0] sm:$0xff] %v773_v49 }
  0xe7   : > { %782 = vst [vmem:[%s1224_s18 + $0x38] sm:$0xff] %v750_v50 }
  0xe8   : > { %790 = vst [vmem:[%s1224_s18 + $0x78] sm:$0xff] %v758_v51  ;;  %v585_v52 = vpop.f32.mrf.mxu2  ;;  %v605_v53 = vpop.f32.mrf.mxu3 }
  0xe9   : > { %v734_v54 = vadd.f32 %v1216_v24, %v585_v52  ;;  %v742_v55 = vadd.f32 %v1216_v24, %v605_v53 }
  0xeb   : > { %v766_v56 = vmax.f32 %v734_v54, 0.0  ;;  %v774_v57 = vmax.f32 %v742_v55, 0.0 }
  0xed   : > { %798 = vst [vmem:[%s1224_s18 + $0xb8] sm:$0xff] %v766_v56 }
  0xee   : > { %806 = vst [vmem:[%s1224_s18 + $0xf8] sm:$0xff] %v774_v57 }
  0xef PF: > { %s13_s14 = sadd.s32 1, %s1122_s14   ;;  %s1301_s12 = smov %s1118_s13 }
  0xf0   : > { %p10_p5 = scmp.ge.s32.totalorder %s13_s14, 4   ;;  %s1302_s13 = smov %s1304_s15 }
  0xf2   :  { %12 = sbr.rel (!%p10_p5) target bundleno = 2 (0x2), region = 76 }

// kernel: _lambda_.58
= control target key start
LH: loop header
LB: loop body
LE: loop exit
PB: predicated region body
PF: predicated region fallthrough
CT: control target
= control target key end

     0   :  { %s1290_s15 = smov 0   ;;  %s1292_s16 = smov 0   ;;  %s1480_s0 = inlined_call_operand.vmem [shape: bf16[512,128], index: 0, kind: input, shape index: {}]   ;;  %s1481_s1 = inlined_call_operand.vmem [shape: bf16[128,128], index: 1, kind: input, shape index: {}]   ;;  %s1482_s2 = inlined_call_operand.vmem [shape: f32[1,128], index: 2, kind: input, shape index: {}]   ;;  %s1483_s3 = inlined_call_operand.vmem [shape: f32[512,128], index: 3, kind: input, shape index: {}]   ;;  %s1484_s4 = inlined_call_operand.vmem [shape: f32[512,128], index: 4, kind: output, shape index: {}]  }
   0x1   :  { %s1294_s17 = smov 0  }
   0x2 LB: > { %s33_s18 = sadd.s32 1, %s1259_s16  ;;  %p1063_p0 = scmp.ge.s32.totalorder %s1263_s17, 1  ;;  %s1263_s17 = sphi %s1294_s17, %s14_s17   ;;  %s1259_s16 = sphi %s1292_s16, %s1486_s16   ;;  %s1255_s15 = sphi %s1290_s15, %s1485_s15  }
   0x3   : > { %p35_p1 = scmp.ge.s32.totalorder %s33_s18, 2  ;;  %p229_p2 = scmp.lt.s32.totalorder %s1263_s17, 3 }
   0x5   : > { %s1488_s18 = smov (%p35_p1, %s33_s18), 0  ;;  %p230_p3 = pnand %p1063_p0, %p229_p2 }
   0x6   : > { %s1064_s27 = sshll.u32 (!%p230_p3), %s1255_s15, 5 }
   0x7   : > { %233 = sbr.rel (%p230_p3) target bundleno = 241 (0xf1), region = 36  ;;  %p281_p4 = scmp.lt.s32.totalorder (!%p230_p3), %s1064_s27, 63 }
   0xc   : > { %v1191_v0 = vld [vmem:[%s1481_s1 + $0x38] sm:$0xff]  ;;  %v1190_v1 = vld [vmem:[%s1481_s1 + $0x30] sm:$0xff]  ;;  %v1189_v2 = vld [vmem:[%s1481_s1 + $0x28] sm:$0xff]  ;;  %s1490_s27 = smov (!%p281_p4, %s1064_s27), 63 }
   0xd   : > { %579 = vmatpush.bf16.msra.mxu0 %v1191_v0  ;;  %1192 = vmatpush.bf16.msra.mxu1 %v1191_v0  ;;  %v1188_v3 = vld [vmem:[%s1481_s1 + $0x20] sm:$0xff]  ;;  %v1187_v4 = vld [vmem:[%s1481_s1 + $0x18] sm:$0xff]  ;;  %v1186_v5 = vld [vmem:[%s1481_s1 + $0x10] sm:$0xff]  ;;  %s1065_s8 = sshll.u32 %s1490_s27, 2  ;;  %s1067_s14 = sshll.u32 %s1490_s27, 3 }
   0xe   : > { %1193 = vmatpush.bf16.msra.mxu2 %v1191_v0  ;;  %1194 = vmatpush.bf16.msra.mxu3 %v1191_v0  ;;  %v1185_v6 = vld [vmem:[%s1481_s1 + $0x8] sm:$0xff]  ;;  %v1184_v7 = vld [vmem:[%s1481_s1] sm:$0xff]  ;;  %s1341_s13 = scalar_lea.vmem %s1480_s0, %s1065_s8  ;;  %s1363_s20 = scalar_lea.vmem %s1483_s3, %s1067_s14 }
   0xf   : > { %v1168_v8 = vld [vmem:[%s1341_s13] sm:$0xff]  ;;  %v1169_v12 = vld [vmem:[%s1341_s13 + $0x8] sm:$0xff]  ;;  %v1170_v16 = vld [vmem:[%s1341_s13 + $0x10] sm:$0xff]  ;;  %s1377_s25 = scalar_lea.vmem %s1484_s4, %s1067_s14 }
  0x10   : > { %v1172_v9 = vld [vmem:[%s1341_s13 + $0x20] sm:$0xff]  ;;  %v1173_v13 = vld [vmem:[%s1341_s13 + $0x28] sm:$0xff]  ;;  %v1174_v17 = vld [vmem:[%s1341_s13 + $0x30] sm:$0xff] }
  0x11   : > { %580 = vmatpush.bf16.msra.mxu0 %v1190_v1  ;;  %1195 = vmatpush.bf16.msra.mxu1 %v1190_v1  ;;  %v1176_v10 = vld [vmem:[%s1341_s13 + $0x40] sm:$0xff]  ;;  %v1177_v14 = vld [vmem:[%s1341_s13 + $0x48] sm:$0xff]  ;;  %v1178_v18 = vld [vmem:[%s1341_s13 + $0x50] sm:$0xff] }
  0x12   : > { %1196 = vmatpush.bf16.msra.mxu2 %v1190_v1  ;;  %1197 = vmatpush.bf16.msra.mxu3 %v1190_v1  ;;  %v1180_v11 = vld [vmem:[%s1341_s13 + $0x60] sm:$0xff]  ;;  %v1181_v15 = vld [vmem:[%s1341_s13 + $0x68] sm:$0xff]  ;;  %v1182_v19 = vld [vmem:[%s1341_s13 + $0x70] sm:$0xff] }
  0x13   : > { %v1171_v20 = vld [vmem:[%s1341_s13 + $0x18] sm:$0xff]  ;;  %v1368_v24 = vld [vmem:[%s1482_s2] ss:$0 sm:$0xff]  ;;  %v804_v42 = vld [vmem:[%s1363_s20 + $0x8] sm:$0xff] }
  0x14   : > { %v1175_v21 = vld [vmem:[%s1341_s13 + $0x38] sm:$0xff]  ;;  %v803_v26 = vld [vmem:[%s1363_s20] sm:$0xff]  ;;  %v812_v44 = vld [vmem:[%s1363_s20 + $0x48] sm:$0xff] }
  0x15   : > { %581 = vmatpush.bf16.msra.mxu0 %v1189_v2  ;;  %1198 = vmatpush.bf16.msra.mxu1 %v1189_v2  ;;  %v1179_v22 = vld [vmem:[%s1341_s13 + $0x58] sm:$0xff]  ;;  %v811_v28 = vld [vmem:[%s1363_s20 + $0x40] sm:$0xff]  ;;  %v820_v56 = vld [vmem:[%s1363_s20 + $0x88] sm:$0xff] }
  0x16   : > { %1199 = vmatpush.bf16.msra.mxu2 %v1189_v2  ;;  %1200 = vmatpush.bf16.msra.mxu3 %v1189_v2  ;;  %v1183_v23 = vld [vmem:[%s1341_s13 + $0x78] sm:$0xff]  ;;  %v819_v36 = vld [vmem:[%s1363_s20 + $0x80] sm:$0xff]  ;;  %v828_v58 = vld [vmem:[%s1363_s20 + $0xc8] sm:$0xff] }
  0x17   : > { %v827_v38 = vld [vmem:[%s1363_s20 + $0xc0] sm:$0xff]  ;;  %v805_v62 = vld [vmem:[%s1363_s20 + $0x10] sm:$0xff] }
  0x18   : > { %v813_v0 = vld [vmem:[%s1363_s20 + $0x50] sm:$0xff] }
  0x19   : > { %582 = vmatpush.bf16.msra.mxu0 %v1188_v3  ;;  %1201 = vmatpush.bf16.msra.mxu1 %v1188_v3 }
  0x1a   : > { %1202 = vmatpush.bf16.msra.mxu2 %v1188_v3  ;;  %1203 = vmatpush.bf16.msra.mxu3 %v1188_v3 }
  0x1d   : > { %583 = vmatpush.bf16.msra.mxu0 %v1187_v4  ;;  %1204 = vmatpush.bf16.msra.mxu1 %v1187_v4 }
  0x1e   : > { %1205 = vmatpush.bf16.msra.mxu2 %v1187_v4  ;;  %1206 = vmatpush.bf16.msra.mxu3 %v1187_v4 }
  0x21   : > { %584 = vmatpush.bf16.msra.mxu0 %v1186_v5  ;;  %1207 = vmatpush.bf16.msra.mxu1 %v1186_v5 }
  0x22   : > { %1208 = vmatpush.bf16.msra.mxu2 %v1186_v5  ;;  %1209 = vmatpush.bf16.msra.mxu3 %v1186_v5 }
  0x25   : > { %585 = vmatpush.bf16.msra.mxu0 %v1185_v6  ;;  %1210 = vmatpush.bf16.msra.mxu1 %v1185_v6 }
  0x26   : > { %1211 = vmatpush.bf16.msra.mxu2 %v1185_v6  ;;  %1212 = vmatpush.bf16.msra.mxu3 %v1185_v6 }
  0x29   : > { %586 = vmatpush.bf16.msra.mxu0 %v1184_v7  ;;  %1213 = vmatpush.bf16.msra.mxu1 %v1184_v7 }
  0x2a   : > { %1214 = vmatpush.bf16.msra.mxu2 %v1184_v7  ;;  %1215 = vmatpush.bf16.msra.mxu3 %v1184_v7 }
  0x2c   : > { %587 = vmatmul.bf16.vlgmr.msra.gmra.mxu0 %v1168_v8  ;;  %607 = vmatmul.bf16.vlgmr.msra.gmra.mxu1 %v1172_v9 }
  0x2d   : > { %627 = vmatmul.bf16.vlgmr.msra.gmra.mxu2 %v1176_v10  ;;  %647 = vmatmul.bf16.vlgmr.msra.gmra.mxu3 %v1180_v11 }
  0x3c   : > { %592 = vmatmul.bf16.gmra.mxu0 %v1169_v12  ;;  %612 = vmatmul.bf16.gmra.mxu1 %v1173_v13  ;;  %v821_v12 = vld [vmem:[%s1363_s20 + $0x90] sm:$0xff] }
  0x3d   : > { %632 = vmatmul.bf16.gmra.mxu2 %v1177_v14  ;;  %652 = vmatmul.bf16.gmra.mxu3 %v1181_v15  ;;  %v829_v14 = vld [vmem:[%s1363_s20 + $0xd0] sm:$0xff] }
  0x4c   : > { %597 = vmatmul.bf16.gmra.mxu0 %v1170_v16  ;;  %617 = vmatmul.bf16.gmra.mxu1 %v1174_v17 }
  0x4d   : > { %637 = vmatmul.bf16.gmra.mxu2 %v1178_v18  ;;  %657 = vmatmul.bf16.gmra.mxu3 %v1182_v19  ;;  %v806_v18 = vld [vmem:[%s1363_s20 + $0x18] sm:$0xff] }
  0x5c   : > { %602 = vmatmul.bf16.gmra.mxu0 %v1171_v20  ;;  %622 = vmatmul.bf16.gmra.mxu1 %v1175_v21  ;;  %v814_v20 = vld [vmem:[%s1363_s20 + $0x58] sm:$0xff] }
  0x5d   : > { %642 = vmatmul.bf16.gmra.mxu2 %v1179_v22  ;;  %662 = vmatmul.bf16.gmra.mxu3 %v1183_v23 }
  0xa9   : > { %v588_v25 = vpop.f32.mrf.mxu0  ;;  %v608_v27 = vpop.f32.mrf.mxu1 }
  0xaa   : > { %v771_v29 = vadd.f32 %v1368_v24, %v588_v25  ;;  %v779_v30 = vadd.f32 %v1368_v24, %v608_v27 }
  0xac   : > { %v835_v31 = vadd.f32 %v803_v26, %v771_v29  ;;  %v843_v32 = vadd.f32 %v811_v28, %v779_v30 }
  0xae   : > { %v867_v33 = vmax.f32 %v835_v31, 0.0  ;;  %v875_v34 = vmax.f32 %v843_v32, 0.0 }
  0xb0   : > { %899 = vst [vmem:[%s1377_s25] sm:$0xff] %v867_v33  ;;  %v628_v35 = vpop.f32.mrf.mxu2  ;;  %v648_v37 = vpop.f32.mrf.mxu3  ;;  %v822_v33 = vld [vmem:[%s1363_s20 + $0x98] sm:$0xff] }
  0xb1   : > { %907 = vst [vmem:[%s1377_s25 + $0x40] sm:$0xff] %v875_v34  ;;  %v787_v39 = vadd.f32 %v1368_v24, %v628_v35  ;;  %v795_v40 = vadd.f32 %v1368_v24, %v648_v37  ;;  %v590_v41 = vpop.f32.mrf.mxu0  ;;  %v610_v43 = vpop.f32.mrf.mxu1  ;;  %v830_v35 = vld [vmem:[%s1363_s20 + $0xd8] sm:$0xff] }
  0xb2   : > { %v772_v45 = vadd.f32 %v1368_v24, %v590_v41  ;;  %v780_v46 = vadd.f32 %v1368_v24, %v610_v43  ;;  %v815_v41 = vld [vmem:[%s1363_s20 + $0x60] sm:$0xff] }
  0xb3   : > { %v851_v47 = vadd.f32 %v819_v36, %v787_v39  ;;  %v859_v48 = vadd.f32 %v827_v38, %v795_v40  ;;  %v807_v39 = vld [vmem:[%s1363_s20 + $0x20] sm:$0xff] }
  0xb4   : > { %v836_v49 = vadd.f32 %v804_v42, %v772_v45  ;;  %v844_v50 = vadd.f32 %v812_v44, %v780_v46 }
  0xb5   : > { %v883_v51 = vmax.f32 %v851_v47, 0.0  ;;  %v891_v52 = vmax.f32 %v859_v48, 0.0 }
  0xb6   : > { %v868_v53 = vmax.f32 %v836_v49, 0.0  ;;  %v876_v54 = vmax.f32 %v844_v50, 0.0 }
  0xb7   : > { %915 = vst [vmem:[%s1377_s25 + $0x80] sm:$0xff] %v883_v51 }
  0xb8   : > { %923 = vst [vmem:[%s1377_s25 + $0xc0] sm:$0xff] %v891_v52  ;;  %v630_v55 = vpop.f32.mrf.mxu2  ;;  %v650_v57 = vpop.f32.mrf.mxu3 }
  0xb9   : > { %900 = vst [vmem:[%s1377_s25 + $0x8] sm:$0xff] %v868_v53  ;;  %v788_v59 = vadd.f32 %v1368_v24, %v630_v55  ;;  %v796_v60 = vadd.f32 %v1368_v24, %v650_v57  ;;  %v593_v61 = vpop.f32.mrf.mxu0  ;;  %v613_v63 = vpop.f32.mrf.mxu1  ;;  %v823_v53 = vld [vmem:[%s1363_s20 + $0xa0] sm:$0xff] }
  0xba   : > { %908 = vst [vmem:[%s1377_s25 + $0x48] sm:$0xff] %v876_v54  ;;  %v773_v1 = vadd.f32 %v1368_v24, %v593_v61  ;;  %v781_v2 = vadd.f32 %v1368_v24, %v613_v63  ;;  %v831_v55 = vld [vmem:[%s1363_s20 + $0xe0] sm:$0xff]  ;;  %v816_v61 = vld [vmem:[%s1363_s20 + $0x68] sm:$0xff] }
  0xbb   : > { %v852_v3 = vadd.f32 %v820_v56, %v788_v59  ;;  %v860_v4 = vadd.f32 %v828_v58, %v796_v60  ;;  %v808_v59 = vld [vmem:[%s1363_s20 + $0x28] sm:$0xff] }
  0xbc   : > { %v837_v5 = vadd.f32 %v805_v62, %v773_v1  ;;  %v845_v6 = vadd.f32 %v813_v0, %v781_v2 }
  0xbd   : > { %v884_v7 = vmax.f32 %v852_v3, 0.0  ;;  %v892_v8 = vmax.f32 %v860_v4, 0.0 }
  0xbe   : > { %v869_v9 = vmax.f32 %v837_v5, 0.0  ;;  %v877_v10 = vmax.f32 %v845_v6, 0.0 }
  0xbf   : > { %916 = vst [vmem:[%s1377_s25 + $0x88] sm:$0xff] %v884_v7 }
  0xc0   : > { %924 = vst [vmem:[%s1377_s25 + $0xc8] sm:$0xff] %v892_v8  ;;  %v633_v11 = vpop.f32.mrf.mxu2  ;;  %v653_v13 = vpop.f32.mrf.mxu3 }
  0xc1   : > { %901 = vst [vmem:[%s1377_s25 + $0x10] sm:$0xff] %v869_v9  ;;  %v789_v15 = vadd.f32 %v1368_v24, %v633_v11  ;;  %v797_v16 = vadd.f32 %v1368_v24, %v653_v13  ;;  %v595_v17 = vpop.f32.mrf.mxu0  ;;  %v615_v19 = vpop.f32.mrf.mxu1  ;;  %v824_v9 = vld [vmem:[%s1363_s20 + $0xa8] sm:$0xff] }
  0xc2   : > { %909 = vst [vmem:[%s1377_s25 + $0x50] sm:$0xff] %v877_v10  ;;  %v774_v21 = vadd.f32 %v1368_v24, %v595_v17  ;;  %v782_v22 = vadd.f32 %v1368_v24, %v615_v19  ;;  %v832_v11 = vld [vmem:[%s1363_s20 + $0xe8] sm:$0xff]  ;;  %v817_v17 = vld [vmem:[%s1363_s20 + $0x70] sm:$0xff] }
  0xc3   : > { %v853_v23 = vadd.f32 %v821_v12, %v789_v15  ;;  %v861_v25 = vadd.f32 %v829_v14, %v797_v16  ;;  %v809_v15 = vld [vmem:[%s1363_s20 + $0x30] sm:$0xff] }
  0xc4   : > { %v838_v26 = vadd.f32 %v806_v18, %v774_v21  ;;  %v846_v27 = vadd.f32 %v814_v20, %v782_v22 }
  0xc5   : > { %v885_v28 = vmax.f32 %v853_v23, 0.0  ;;  %v893_v29 = vmax.f32 %v861_v25, 0.0 }
  0xc6   : > { %v870_v30 = vmax.f32 %v838_v26, 0.0  ;;  %v878_v31 = vmax.f32 %v846_v27, 0.0 }
  0xc7   : > { %917 = vst [vmem:[%s1377_s25 + $0x90] sm:$0xff] %v885_v28 }
  0xc8   : > { %925 = vst [vmem:[%s1377_s25 + $0xd0] sm:$0xff] %v893_v29  ;;  %v635_v32 = vpop.f32.mrf.mxu2  ;;  %v655_v34 = vpop.f32.mrf.mxu3 }
  0xc9   : > { %902 = vst [vmem:[%s1377_s25 + $0x18] sm:$0xff] %v870_v30  ;;  %v790_v36 = vadd.f32 %v1368_v24, %v635_v32  ;;  %v798_v37 = vadd.f32 %v1368_v24, %v655_v34  ;;  %v598_v38 = vpop.f32.mrf.mxu0  ;;  %v618_v40 = vpop.f32.mrf.mxu1  ;;  %v825_v30 = vld [vmem:[%s1363_s20 + $0xb0] sm:$0xff] }
  0xca   : > { %910 = vst [vmem:[%s1377_s25 + $0x58] sm:$0xff] %v878_v31  ;;  %v775_v42 = vadd.f32 %v1368_v24, %v598_v38  ;;  %v783_v43 = vadd.f32 %v1368_v24, %v618_v40  ;;  %v833_v32 = vld [vmem:[%s1363_s20 + $0xf0] sm:$0xff]  ;;  %v818_v38 = vld [vmem:[%s1363_s20 + $0x78] sm:$0xff] }
  0xcb   : > { %v854_v44 = vadd.f32 %v822_v33, %v790_v36  ;;  %v862_v45 = vadd.f32 %v830_v35, %v798_v37  ;;  %v810_v36 = vld [vmem:[%s1363_s20 + $0x38] sm:$0xff] }
  0xcc   : > { %v839_v46 = vadd.f32 %v807_v39, %v775_v42  ;;  %v847_v47 = vadd.f32 %v815_v41, %v783_v43 }
  0xcd   : > { %v886_v48 = vmax.f32 %v854_v44, 0.0  ;;  %v894_v49 = vmax.f32 %v862_v45, 0.0 }
  0xce   : > { %v871_v50 = vmax.f32 %v839_v46, 0.0  ;;  %v879_v51 = vmax.f32 %v847_v47, 0.0 }
  0xcf   : > { %918 = vst [vmem:[%s1377_s25 + $0x98] sm:$0xff] %v886_v48 }
  0xd0   : > { %926 = vst [vmem:[%s1377_s25 + $0xd8] sm:$0xff] %v894_v49  ;;  %v638_v52 = vpop.f32.mrf.mxu2  ;;  %v658_v54 = vpop.f32.mrf.mxu3 }
  0xd1   : > { %903 = vst [vmem:[%s1377_s25 + $0x20] sm:$0xff] %v871_v50  ;;  %v791_v56 = vadd.f32 %v1368_v24, %v638_v52  ;;  %v799_v57 = vadd.f32 %v1368_v24, %v658_v54  ;;  %v600_v58 = vpop.f32.mrf.mxu0  ;;  %v620_v60 = vpop.f32.mrf.mxu1  ;;  %v826_v50 = vld [vmem:[%s1363_s20 + $0xb8] sm:$0xff] }
  0xd2   : > { %911 = vst [vmem:[%s1377_s25 + $0x60] sm:$0xff] %v879_v51  ;;  %v776_v62 = vadd.f32 %v1368_v24, %v600_v58  ;;  %v784_v63 = vadd.f32 %v1368_v24, %v620_v60  ;;  %v834_v52 = vld [vmem:[%s1363_s20 + $0xf8] sm:$0xff] }
  0xd3   : > { %v855_v0 = vadd.f32 %v823_v53, %v791_v56  ;;  %v863_v1 = vadd.f32 %v831_v55, %v799_v57 }
  0xd4   : > { %v840_v2 = vadd.f32 %v808_v59, %v776_v62  ;;  %v848_v3 = vadd.f32 %v816_v61, %v784_v63 }
  0xd5   : > { %v887_v4 = vmax.f32 %v855_v0, 0.0  ;;  %v895_v5 = vmax.f32 %v863_v1, 0.0 }
  0xd6   : > { %v872_v6 = vmax.f32 %v840_v2, 0.0  ;;  %v880_v7 = vmax.f32 %v848_v3, 0.0 }
  0xd7   : > { %919 = vst [vmem:[%s1377_s25 + $0xa0] sm:$0xff] %v887_v4 }
  0xd8   : > { %927 = vst [vmem:[%s1377_s25 + $0xe0] sm:$0xff] %v895_v5  ;;  %v640_v8 = vpop.f32.mrf.mxu2  ;;  %v660_v10 = vpop.f32.mrf.mxu3 }
  0xd9   : > { %904 = vst [vmem:[%s1377_s25 + $0x28] sm:$0xff] %v872_v6  ;;  %v792_v12 = vadd.f32 %v1368_v24, %v640_v8  ;;  %v800_v13 = vadd.f32 %v1368_v24, %v660_v10  ;;  %v603_v14 = vpop.f32.mrf.mxu0  ;;  %v623_v16 = vpop.f32.mrf.mxu1 }
  0xda   : > { %912 = vst [vmem:[%s1377_s25 + $0x68] sm:$0xff] %v880_v7  ;;  %v777_v18 = vadd.f32 %v1368_v24, %v603_v14  ;;  %v785_v19 = vadd.f32 %v1368_v24, %v623_v16 }
  0xdb   : > { %v856_v20 = vadd.f32 %v824_v9, %v792_v12  ;;  %v864_v21 = vadd.f32 %v832_v11, %v800_v13 }
  0xdc   : > { %v841_v22 = vadd.f32 %v809_v15, %v777_v18  ;;  %v849_v23 = vadd.f32 %v817_v17, %v785_v19 }
  0xdd   : > { %v888_v25 = vmax.f32 %v856_v20, 0.0  ;;  %v896_v26 = vmax.f32 %v864_v21, 0.0 }
  0xde   : > { %v873_v27 = vmax.f32 %v841_v22, 0.0  ;;  %v881_v28 = vmax.f32 %v849_v23, 0.0 }
  0xdf   : > { %920 = vst [vmem:[%s1377_s25 + $0xa8] sm:$0xff] %v888_v25 }
  0xe0   : > { %928 = vst [vmem:[%s1377_s25 + $0xe8] sm:$0xff] %v896_v26  ;;  %v643_v29 = vpop.f32.mrf.mxu2  ;;  %v663_v31 = vpop.f32.mrf.mxu3 }
  0xe1   : > { %905 = vst [vmem:[%s1377_s25 + $0x30] sm:$0xff] %v873_v27  ;;  %v793_v33 = vadd.f32 %v1368_v24, %v643_v29  ;;  %v801_v34 = vadd.f32 %v1368_v24, %v663_v31  ;;  %v605_v35 = vpop.f32.mrf.mxu0  ;;  %v625_v37 = vpop.f32.mrf.mxu1 }
  0xe2   : > { %913 = vst [vmem:[%s1377_s25 + $0x70] sm:$0xff] %v881_v28  ;;  %v778_v39 = vadd.f32 %v1368_v24, %v605_v35  ;;  %v786_v40 = vadd.f32 %v1368_v24, %v625_v37 }
  0xe3   : > { %v857_v41 = vadd.f32 %v825_v30, %v793_v33  ;;  %v865_v42 = vadd.f32 %v833_v32, %v801_v34 }
  0xe4   : > { %v842_v43 = vadd.f32 %v810_v36, %v778_v39  ;;  %v850_v44 = vadd.f32 %v818_v38, %v786_v40 }
  0xe5   : > { %v889_v45 = vmax.f32 %v857_v41, 0.0  ;;  %v897_v46 = vmax.f32 %v865_v42, 0.0 }
  0xe6   : > { %v874_v47 = vmax.f32 %v842_v43, 0.0  ;;  %v882_v48 = vmax.f32 %v850_v44, 0.0 }
  0xe7   : > { %921 = vst [vmem:[%s1377_s25 + $0xb0] sm:$0xff] %v889_v45 }
  0xe8   : > { %929 = vst [vmem:[%s1377_s25 + $0xf0] sm:$0xff] %v897_v46  ;;  %v645_v49 = vpop.f32.mrf.mxu2  ;;  %v665_v51 = vpop.f32.mrf.mxu3 }
  0xe9   : > { %906 = vst [vmem:[%s1377_s25 + $0x38] sm:$0xff] %v874_v47  ;;  %v794_v53 = vadd.f32 %v1368_v24, %v645_v49  ;;  %v802_v54 = vadd.f32 %v1368_v24, %v665_v51 }
  0xea   : > { %914 = vst [vmem:[%s1377_s25 + $0x78] sm:$0xff] %v882_v48 }
  0xeb   : > { %v858_v55 = vadd.f32 %v826_v50, %v794_v53  ;;  %v866_v56 = vadd.f32 %v834_v52, %v802_v54 }
  0xed   : > { %v890_v57 = vmax.f32 %v858_v55, 0.0  ;;  %v898_v58 = vmax.f32 %v866_v56, 0.0 }
  0xef   : > { %922 = vst [vmem:[%s1377_s25 + $0xb8] sm:$0xff] %v890_v57 }
  0xf0   : > { %930 = vst [vmem:[%s1377_s25 + $0xf8] sm:$0xff] %v898_v58 }
  0xf1 PF: > { %s14_s17 = sadd.s32 1, %s1263_s17   ;;  %s1485_s15 = smov %s1259_s16 }
  0xf2   : > { %p11_p5 = scmp.ge.s32.totalorder %s14_s17, 4   ;;  %s1486_s16 = smov %s1488_s18 }
  0xf4   :  { %13 = sbr.rel (!%p11_p5) target bundleno = 2 (0x2), region = 83 }

// kernel: _lambda_.64
= control target key start
LH: loop header
LB: loop body
LE: loop exit
PB: predicated region body
PF: predicated region fallthrough
CT: control target
= control target key end

     0   :  { %s542_s1 = inlined_call_operand.vmem [shape: bf16[128,128], index: 1, kind: input, shape index: {}]   ;;  %s543_s2 = inlined_call_operand.vmem [shape: f32[1,128], index: 2, kind: input, shape index: {}]   ;;  %s544_s0 = inlined_call_operand.vmem [shape: bf16[128,128], index: 0, kind: input, shape index: {}]   ;;  %s545_s3 = inlined_call_operand.vmem [shape: f32[128,128], index: 3, kind: output, shape index: {}]  }
   0x1   :  { %v397_v0 = vld [vmem:[%s542_s1 + $0x38] sm:$0xff]  ;;  %v396_v1 = vld [vmem:[%s542_s1 + $0x30] sm:$0xff]  ;;  %v395_v2 = vld [vmem:[%s542_s1 + $0x28] sm:$0xff] }
   0x2   :  { %178 = vmatpush.bf16.msra.mxu0 %v397_v0  ;;  %398 = vmatpush.bf16.msra.mxu1 %v397_v0  ;;  %v394_v3 = vld [vmem:[%s542_s1 + $0x20] sm:$0xff]  ;;  %v393_v4 = vld [vmem:[%s542_s1 + $0x18] sm:$0xff]  ;;  %v392_v5 = vld [vmem:[%s542_s1 + $0x10] sm:$0xff] }
   0x3   :  { %399 = vmatpush.bf16.msra.mxu2 %v397_v0  ;;  %400 = vmatpush.bf16.msra.mxu3 %v397_v0  ;;  %v391_v6 = vld [vmem:[%s542_s1 + $0x8] sm:$0xff]  ;;  %v390_v7 = vld [vmem:[%s542_s1] sm:$0xff]  ;;  %v384_v9 = vld [vmem:[%s544_s0 + $0x10] sm:$0xff] }
   0x4   :  { %v382_v8 = vld [vmem:[%s544_s0] sm:$0xff]  ;;  %v388_v11 = vld [vmem:[%s544_s0 + $0x30] sm:$0xff]  ;;  %v383_v12 = vld [vmem:[%s544_s0 + $0x8] sm:$0xff] }
   0x5   :  { %v386_v10 = vld [vmem:[%s544_s0 + $0x20] sm:$0xff]  ;;  %v385_v13 = vld [vmem:[%s544_s0 + $0x18] sm:$0xff]  ;;  %v387_v14 = vld [vmem:[%s544_s0 + $0x28] sm:$0xff] }
   0x6   :  { %179 = vmatpush.bf16.msra.mxu0 %v396_v1  ;;  %401 = vmatpush.bf16.msra.mxu1 %v396_v1  ;;  %v389_v15 = vld [vmem:[%s544_s0 + $0x38] sm:$0xff]  ;;  %v422_v16 = vld [vmem:[%s543_s2] ss:$0 sm:$0xff] }
   0x7   :  { %402 = vmatpush.bf16.msra.mxu2 %v396_v1  ;;  %403 = vmatpush.bf16.msra.mxu3 %v396_v1 }
   0xa   :  { %180 = vmatpush.bf16.msra.mxu0 %v395_v2  ;;  %404 = vmatpush.bf16.msra.mxu1 %v395_v2 }
   0xb   :  { %405 = vmatpush.bf16.msra.mxu2 %v395_v2  ;;  %406 = vmatpush.bf16.msra.mxu3 %v395_v2 }
   0xe   :  { %181 = vmatpush.bf16.msra.mxu0 %v394_v3  ;;  %407 = vmatpush.bf16.msra.mxu1 %v394_v3 }
   0xf   :  { %408 = vmatpush.bf16.msra.mxu2 %v394_v3  ;;  %409 = vmatpush.bf16.msra.mxu3 %v394_v3 }
  0x12   :  { %182 = vmatpush.bf16.msra.mxu0 %v393_v4  ;;  %410 = vmatpush.bf16.msra.mxu1 %v393_v4 }
  0x13   :  { %411 = vmatpush.bf16.msra.mxu2 %v393_v4  ;;  %412 = vmatpush.bf16.msra.mxu3 %v393_v4 }
  0x16   :  { %183 = vmatpush.bf16.msra.mxu0 %v392_v5  ;;  %413 = vmatpush.bf16.msra.mxu1 %v392_v5 }
  0x17   :  { %414 = vmatpush.bf16.msra.mxu2 %v392_v5  ;;  %415 = vmatpush.bf16.msra.mxu3 %v392_v5 }
  0x1a   :  { %184 = vmatpush.bf16.msra.mxu0 %v391_v6  ;;  %416 = vmatpush.bf16.msra.mxu1 %v391_v6 }
  0x1b   :  { %417 = vmatpush.bf16.msra.mxu2 %v391_v6  ;;  %418 = vmatpush.bf16.msra.mxu3 %v391_v6 }
  0x1e   :  { %185 = vmatpush.bf16.msra.mxu0 %v390_v7  ;;  %419 = vmatpush.bf16.msra.mxu1 %v390_v7 }
  0x1f   :  { %420 = vmatpush.bf16.msra.mxu2 %v390_v7  ;;  %421 = vmatpush.bf16.msra.mxu3 %v390_v7 }
  0x21   :  { %186 = vmatmul.bf16.vlgmr.msra.gmra.mxu0 %v382_v8  ;;  %196 = vmatmul.bf16.vlgmr.msra.gmra.mxu1 %v384_v9 }
  0x22   :  { %206 = vmatmul.bf16.vlgmr.msra.gmra.mxu2 %v386_v10  ;;  %216 = vmatmul.bf16.vlgmr.msra.gmra.mxu3 %v388_v11 }
  0x31   :  { %191 = vmatmul.bf16.gmra.mxu0 %v383_v12  ;;  %201 = vmatmul.bf16.gmra.mxu1 %v385_v13 }
  0x32   :  { %211 = vmatmul.bf16.gmra.mxu2 %v387_v14  ;;  %221 = vmatmul.bf16.gmra.mxu3 %v389_v15 }
  0x9e   :  { %v187_v17 = vpop.f32.mrf.mxu0  ;;  %v197_v18 = vpop.f32.mrf.mxu1 }
  0x9f   :  { %v282_v19 = vadd.f32 %v422_v16, %v187_v17  ;;  %v286_v20 = vadd.f32 %v422_v16, %v197_v18 }
  0xa1   :  { %298 = vst [vmem:[%s545_s3] sm:$0xff] %v282_v19 }
  0xa2   :  { %302 = vst [vmem:[%s545_s3 + $0x20] sm:$0xff] %v286_v20 }
  0xa5   :  { %v207_v21 = vpop.f32.mrf.mxu2  ;;  %v217_v22 = vpop.f32.mrf.mxu3 }
  0xa6   :  { %v290_v23 = vadd.f32 %v422_v16, %v207_v21  ;;  %v294_v24 = vadd.f32 %v422_v16, %v217_v22  ;;  %v189_v25 = vpop.f32.mrf.mxu0  ;;  %v199_v26 = vpop.f32.mrf.mxu1 }
  0xa7   :  { %v283_v27 = vadd.f32 %v422_v16, %v189_v25  ;;  %v287_v28 = vadd.f32 %v422_v16, %v199_v26 }
  0xa8   :  { %306 = vst [vmem:[%s545_s3 + $0x40] sm:$0xff] %v290_v23 }
  0xa9   :  { %310 = vst [vmem:[%s545_s3 + $0x60] sm:$0xff] %v294_v24 }
  0xaa   :  { %299 = vst [vmem:[%s545_s3 + $0x8] sm:$0xff] %v283_v27 }
  0xab   :  { %303 = vst [vmem:[%s545_s3 + $0x28] sm:$0xff] %v287_v28 }
  0xad   :  { %v209_v29 = vpop.f32.mrf.mxu2  ;;  %v219_v30 = vpop.f32.mrf.mxu3 }
  0xae   :  { %v291_v31 = vadd.f32 %v422_v16, %v209_v29  ;;  %v295_v32 = vadd.f32 %v422_v16, %v219_v30  ;;  %v192_v33 = vpop.f32.mrf.mxu0  ;;  %v202_v34 = vpop.f32.mrf.mxu1 }
  0xaf   :  { %v284_v35 = vadd.f32 %v422_v16, %v192_v33  ;;  %v288_v36 = vadd.f32 %v422_v16, %v202_v34 }
  0xb0   :  { %307 = vst [vmem:[%s545_s3 + $0x48] sm:$0xff] %v291_v31 }
  0xb1   :  { %311 = vst [vmem:[%s545_s3 + $0x68] sm:$0xff] %v295_v32 }
  0xb2   :  { %300 = vst [vmem:[%s545_s3 + $0x10] sm:$0xff] %v284_v35 }
  0xb3   :  { %304 = vst [vmem:[%s545_s3 + $0x30] sm:$0xff] %v288_v36 }
  0xb5   :  { %v212_v37 = vpop.f32.mrf.mxu2  ;;  %v222_v38 = vpop.f32.mrf.mxu3 }
  0xb6   :  { %v292_v39 = vadd.f32 %v422_v16, %v212_v37  ;;  %v296_v40 = vadd.f32 %v422_v16, %v222_v38  ;;  %v194_v41 = vpop.f32.mrf.mxu0  ;;  %v204_v42 = vpop.f32.mrf.mxu1 }
  0xb7   :  { %v285_v43 = vadd.f32 %v422_v16, %v194_v41  ;;  %v289_v44 = vadd.f32 %v422_v16, %v204_v42 }
  0xb8   :  { %308 = vst [vmem:[%s545_s3 + $0x50] sm:$0xff] %v292_v39 }
  0xb9   :  { %312 = vst [vmem:[%s545_s3 + $0x70] sm:$0xff] %v296_v40 }
  0xba   :  { %301 = vst [vmem:[%s545_s3 + $0x18] sm:$0xff] %v285_v43 }
  0xbb   :  { %305 = vst [vmem:[%s545_s3 + $0x38] sm:$0xff] %v289_v44 }
  0xbd   :  { %v214_v45 = vpop.f32.mrf.mxu2  ;;  %v224_v46 = vpop.f32.mrf.mxu3 }
  0xbe   :  { %v293_v47 = vadd.f32 %v422_v16, %v214_v45  ;;  %v297_v48 = vadd.f32 %v422_v16, %v224_v46 }
  0xc0   :  { %309 = vst [vmem:[%s545_s3 + $0x58] sm:$0xff] %v293_v47 }
  0xc1   :  { %313 = vst [vmem:[%s545_s3 + $0x78] sm:$0xff] %v297_v48 }

// kernel: _lambda_.63
= control target key start
LH: loop header
LB: loop body
LE: loop exit
PB: predicated region body
PF: predicated region fallthrough
CT: control target
= control target key end

     0   :  { %8 = vsyncpa [#allocation4], 0  ;;  %s481_s15 = smov [#allocation3]   ;;  %s601_s0 = inlined_call_operand.vmem [shape: bf16[128,128], index: 0, kind: input, shape index: {}]   ;;  %s602_s1 = inlined_call_operand.vmem [shape: bf16[128,128], index: 1, kind: input, shape index: {}]   ;;  %s603_s2 = inlined_call_operand.hbm [shape: f32[1,128], index: 2, kind: input, shape index: {}]   ;;  %s604_s3 = inlined_call_operand.vmem [shape: f32[128,128], index: 3, kind: output, shape index: {}]  }
   0x1   :  { %s18_s14 = sshll.u32 %s603_s2, 4  ;;  %s20_s16 = sshll.u32 %s481_s15, 4  ;;  %s19_s14 = int_to_ptr.hbm [resolvable:$true] %s18_s14  ;;  %s21_s16 = int_to_ptr.vmem [resolvable:$true] %s20_s16 }
   0x2   :  { %23 = dma.hbm_to_vmem [thread:$0]  %s19_s14, 16, %s21_s16, [#allocation4]  }
   0x3   :  { %479 = dma.done.wait [#allocation4], 16  }
   0x4   :  { %480 = vsyncadd [#allocation4], 4294967280  ;;  %v428_v0 = vld [vmem:[%s602_s1 + $0x38] sm:$0xff]  ;;  %v427_v1 = vld [vmem:[%s602_s1 + $0x30] sm:$0xff] }
   0x5   :  { %192 = vmatpush.bf16.msra.mxu0 %v428_v0  ;;  %429 = vmatpush.bf16.msra.mxu1 %v428_v0  ;;  %v426_v2 = vld [vmem:[%s602_s1 + $0x28] sm:$0xff]  ;;  %v425_v3 = vld [vmem:[%s602_s1 + $0x20] sm:$0xff]  ;;  %v424_v4 = vld [vmem:[%s602_s1 + $0x18] sm:$0xff] }
   0x6   :  { %430 = vmatpush.bf16.msra.mxu2 %v428_v0  ;;  %431 = vmatpush.bf16.msra.mxu3 %v428_v0  ;;  %v423_v5 = vld [vmem:[%s602_s1 + $0x10] sm:$0xff]  ;;  %v422_v6 = vld [vmem:[%s602_s1 + $0x8] sm:$0xff]  ;;  %v421_v7 = vld [vmem:[%s602_s1] sm:$0xff] }
   0x7   :  { %v413_v8 = vld [vmem:[%s601_s0] sm:$0xff]  ;;  %v415_v9 = vld [vmem:[%s601_s0 + $0x10] sm:$0xff]  ;;  %v414_v12 = vld [vmem:[%s601_s0 + $0x8] sm:$0xff] }
   0x8   :  { %v417_v10 = vld [vmem:[%s601_s0 + $0x20] sm:$0xff]  ;;  %v419_v11 = vld [vmem:[%s601_s0 + $0x30] sm:$0xff]  ;;  %v416_v13 = vld [vmem:[%s601_s0 + $0x18] sm:$0xff] }
   0x9   :  { %193 = vmatpush.bf16.msra.mxu0 %v427_v1  ;;  %432 = vmatpush.bf16.msra.mxu1 %v427_v1  ;;  %v418_v14 = vld [vmem:[%s601_s0 + $0x28] sm:$0xff]  ;;  %v420_v15 = vld [vmem:[%s601_s0 + $0x38] sm:$0xff]  ;;  %v454_v16 = vld [vmem:[#allocation3] ss:$0 sm:$0xff] }
   0xa   :  { %433 = vmatpush.bf16.msra.mxu2 %v427_v1  ;;  %434 = vmatpush.bf16.msra.mxu3 %v427_v1 }
   0xd   :  { %194 = vmatpush.bf16.msra.mxu0 %v426_v2  ;;  %435 = vmatpush.bf16.msra.mxu1 %v426_v2 }
   0xe   :  { %436 = vmatpush.bf16.msra.mxu2 %v426_v2  ;;  %437 = vmatpush.bf16.msra.mxu3 %v426_v2 }
  0x11   :  { %195 = vmatpush.bf16.msra.mxu0 %v425_v3  ;;  %438 = vmatpush.bf16.msra.mxu1 %v425_v3 }
  0x12   :  { %439 = vmatpush.bf16.msra.mxu2 %v425_v3  ;;  %440 = vmatpush.bf16.msra.mxu3 %v425_v3 }
  0x15   :  { %196 = vmatpush.bf16.msra.mxu0 %v424_v4  ;;  %441 = vmatpush.bf16.msra.mxu1 %v424_v4 }
  0x16   :  { %442 = vmatpush.bf16.msra.mxu2 %v424_v4  ;;  %443 = vmatpush.bf16.msra.mxu3 %v424_v4 }
  0x19   :  { %197 = vmatpush.bf16.msra.mxu0 %v423_v5  ;;  %444 = vmatpush.bf16.msra.mxu1 %v423_v5 }
  0x1a   :  { %445 = vmatpush.bf16.msra.mxu2 %v423_v5  ;;  %446 = vmatpush.bf16.msra.mxu3 %v423_v5 }
  0x1d   :  { %198 = vmatpush.bf16.msra.mxu0 %v422_v6  ;;  %447 = vmatpush.bf16.msra.mxu1 %v422_v6 }
  0x1e   :  { %448 = vmatpush.bf16.msra.mxu2 %v422_v6  ;;  %449 = vmatpush.bf16.msra.mxu3 %v422_v6 }
  0x21   :  { %199 = vmatpush.bf16.msra.mxu0 %v421_v7  ;;  %450 = vmatpush.bf16.msra.mxu1 %v421_v7 }
  0x22   :  { %451 = vmatpush.bf16.msra.mxu2 %v421_v7  ;;  %452 = vmatpush.bf16.msra.mxu3 %v421_v7 }
  0x24   :  { %200 = vmatmul.bf16.vlgmr.msra.gmra.mxu0 %v413_v8  ;;  %210 = vmatmul.bf16.vlgmr.msra.gmra.mxu1 %v415_v9 }
  0x25   :  { %220 = vmatmul.bf16.vlgmr.msra.gmra.mxu2 %v417_v10  ;;  %230 = vmatmul.bf16.vlgmr.msra.gmra.mxu3 %v419_v11 }
  0x34   :  { %205 = vmatmul.bf16.gmra.mxu0 %v414_v12  ;;  %215 = vmatmul.bf16.gmra.mxu1 %v416_v13 }
  0x35   :  { %225 = vmatmul.bf16.gmra.mxu2 %v418_v14  ;;  %235 = vmatmul.bf16.gmra.mxu3 %v420_v15 }
  0xa1   :  { %v201_v17 = vpop.f32.mrf.mxu0  ;;  %v211_v18 = vpop.f32.mrf.mxu1 }
  0xa2   :  { %v296_v19 = vadd.f32 %v454_v16, %v201_v17  ;;  %v300_v20 = vadd.f32 %v454_v16, %v211_v18 }
  0xa4   :  { %v312_v21 = vmax.f32 %v296_v19, 0.0  ;;  %v316_v22 = vmax.f32 %v300_v20, 0.0 }
  0xa6   :  { %328 = vst [vmem:[%s604_s3] sm:$0xff] %v312_v21 }
  0xa7   :  { %332 = vst [vmem:[%s604_s3 + $0x20] sm:$0xff] %v316_v22 }
  0xa8   :  { %v221_v23 = vpop.f32.mrf.mxu2  ;;  %v231_v24 = vpop.f32.mrf.mxu3 }
  0xa9   :  { %v304_v25 = vadd.f32 %v454_v16, %v221_v23  ;;  %v308_v26 = vadd.f32 %v454_v16, %v231_v24  ;;  %v203_v27 = vpop.f32.mrf.mxu0  ;;  %v213_v28 = vpop.f32.mrf.mxu1 }
  0xaa   :  { %v297_v29 = vadd.f32 %v454_v16, %v203_v27  ;;  %v301_v30 = vadd.f32 %v454_v16, %v213_v28 }
  0xab   :  { %v320_v31 = vmax.f32 %v304_v25, 0.0  ;;  %v324_v32 = vmax.f32 %v308_v26, 0.0 }
  0xac   :  { %v313_v33 = vmax.f32 %v297_v29, 0.0  ;;  %v317_v34 = vmax.f32 %v301_v30, 0.0 }
  0xad   :  { %336 = vst [vmem:[%s604_s3 + $0x40] sm:$0xff] %v320_v31 }
  0xae   :  { %340 = vst [vmem:[%s604_s3 + $0x60] sm:$0xff] %v324_v32 }
  0xaf   :  { %329 = vst [vmem:[%s604_s3 + $0x8] sm:$0xff] %v313_v33 }
  0xb0   :  { %333 = vst [vmem:[%s604_s3 + $0x28] sm:$0xff] %v317_v34  ;;  %v223_v35 = vpop.f32.mrf.mxu2  ;;  %v233_v36 = vpop.f32.mrf.mxu3 }
  0xb1   :  { %v305_v37 = vadd.f32 %v454_v16, %v223_v35  ;;  %v309_v38 = vadd.f32 %v454_v16, %v233_v36  ;;  %v206_v39 = vpop.f32.mrf.mxu0  ;;  %v216_v40 = vpop.f32.mrf.mxu1 }
  0xb2   :  { %v298_v41 = vadd.f32 %v454_v16, %v206_v39  ;;  %v302_v42 = vadd.f32 %v454_v16, %v216_v40 }
  0xb3   :  { %v321_v43 = vmax.f32 %v305_v37, 0.0  ;;  %v325_v44 = vmax.f32 %v309_v38, 0.0 }
  0xb4   :  { %v314_v45 = vmax.f32 %v298_v41, 0.0  ;;  %v318_v46 = vmax.f32 %v302_v42, 0.0 }
  0xb5   :  { %337 = vst [vmem:[%s604_s3 + $0x48] sm:$0xff] %v321_v43 }
  0xb6   :  { %341 = vst [vmem:[%s604_s3 + $0x68] sm:$0xff] %v325_v44 }
  0xb7   :  { %330 = vst [vmem:[%s604_s3 + $0x10] sm:$0xff] %v314_v45 }
  0xb8   :  { %334 = vst [vmem:[%s604_s3 + $0x30] sm:$0xff] %v318_v46  ;;  %v226_v47 = vpop.f32.mrf.mxu2  ;;  %v236_v48 = vpop.f32.mrf.mxu3 }
  0xb9   :  { %v306_v49 = vadd.f32 %v454_v16, %v226_v47  ;;  %v310_v50 = vadd.f32 %v454_v16, %v236_v48  ;;  %v208_v51 = vpop.f32.mrf.mxu0  ;;  %v218_v52 = vpop.f32.mrf.mxu1 }
  0xba   :  { %v299_v53 = vadd.f32 %v454_v16, %v208_v51  ;;  %v303_v54 = vadd.f32 %v454_v16, %v218_v52 }
  0xbb   :  { %v322_v55 = vmax.f32 %v306_v49, 0.0  ;;  %v326_v56 = vmax.f32 %v310_v50, 0.0 }
  0xbc   :  { %v315_v57 = vmax.f32 %v299_v53, 0.0  ;;  %v319_v58 = vmax.f32 %v303_v54, 0.0 }
  0xbd   :  { %338 = vst [vmem:[%s604_s3 + $0x50] sm:$0xff] %v322_v55 }
  0xbe   :  { %342 = vst [vmem:[%s604_s3 + $0x70] sm:$0xff] %v326_v56 }
  0xbf   :  { %331 = vst [vmem:[%s604_s3 + $0x18] sm:$0xff] %v315_v57 }
  0xc0   :  { %335 = vst [vmem:[%s604_s3 + $0x38] sm:$0xff] %v319_v58  ;;  %v228_v59 = vpop.f32.mrf.mxu2  ;;  %v238_v60 = vpop.f32.mrf.mxu3 }
  0xc1   :  { %v307_v61 = vadd.f32 %v454_v16, %v228_v59  ;;  %v311_v62 = vadd.f32 %v454_v16, %v238_v60 }
  0xc3   :  { %v323_v63 = vmax.f32 %v307_v61, 0.0  ;;  %v327_v0 = vmax.f32 %v311_v62, 0.0 }
  0xc5   :  { %339 = vst [vmem:[%s604_s3 + $0x58] sm:$0xff] %v323_v63 }
  0xc6   :  { %343 = vst [vmem:[%s604_s3 + $0x78] sm:$0xff] %v327_v0 }
  0xc7   :  { %348 = vsyncpa [#allocation4], 1 }

// kernel: _lambda_.65
= control target key start
LH: loop header
LB: loop body
LE: loop exit
PB: predicated region body
PF: predicated region fallthrough
CT: control target
= control target key end

     0   :  { %s664_s1 = inlined_call_operand.vmem [shape: bf16[128,128], index: 1, kind: input, shape index: {}]   ;;  %s665_s2 = inlined_call_operand.vmem [shape: f32[1,128], index: 2, kind: input, shape index: {}]   ;;  %s666_s0 = inlined_call_operand.vmem [shape: bf16[128,128], index: 0, kind: input, shape index: {}]   ;;  %s667_s3 = inlined_call_operand.vmem [shape: f32[128,128], index: 3, kind: input, shape index: {}]   ;;  %s668_s4 = inlined_call_operand.vmem [shape: f32[128,128], index: 4, kind: output, shape index: {}]  }
   0x1   :  { %v448_v0 = vld [vmem:[%s664_s1 + $0x38] sm:$0xff]  ;;  %v447_v1 = vld [vmem:[%s664_s1 + $0x30] sm:$0xff]  ;;  %v446_v2 = vld [vmem:[%s664_s1 + $0x28] sm:$0xff] }
   0x2   :  { %181 = vmatpush.bf16.msra.mxu0 %v448_v0  ;;  %449 = vmatpush.bf16.msra.mxu1 %v448_v0  ;;  %v445_v3 = vld [vmem:[%s664_s1 + $0x20] sm:$0xff]  ;;  %v444_v4 = vld [vmem:[%s664_s1 + $0x18] sm:$0xff]  ;;  %v443_v5 = vld [vmem:[%s664_s1 + $0x10] sm:$0xff] }
   0x3   :  { %450 = vmatpush.bf16.msra.mxu2 %v448_v0  ;;  %451 = vmatpush.bf16.msra.mxu3 %v448_v0  ;;  %v442_v6 = vld [vmem:[%s664_s1 + $0x8] sm:$0xff]  ;;  %v441_v7 = vld [vmem:[%s664_s1] sm:$0xff]  ;;  %v435_v9 = vld [vmem:[%s666_s0 + $0x10] sm:$0xff] }
   0x4   :  { %v433_v8 = vld [vmem:[%s666_s0] sm:$0xff]  ;;  %v439_v11 = vld [vmem:[%s666_s0 + $0x30] sm:$0xff]  ;;  %v434_v12 = vld [vmem:[%s666_s0 + $0x8] sm:$0xff] }
   0x5   :  { %v437_v10 = vld [vmem:[%s666_s0 + $0x20] sm:$0xff]  ;;  %v436_v13 = vld [vmem:[%s666_s0 + $0x18] sm:$0xff]  ;;  %v438_v14 = vld [vmem:[%s666_s0 + $0x28] sm:$0xff] }
   0x6   :  { %182 = vmatpush.bf16.msra.mxu0 %v447_v1  ;;  %452 = vmatpush.bf16.msra.mxu1 %v447_v1  ;;  %v440_v15 = vld [vmem:[%s666_s0 + $0x38] sm:$0xff]  ;;  %v550_v16 = vld [vmem:[%s665_s2] ss:$0 sm:$0xff]  ;;  %v302_v34 = vld [vmem:[%s667_s3 + $0x8] sm:$0xff] }
   0x7   :  { %453 = vmatpush.bf16.msra.mxu2 %v447_v1  ;;  %454 = vmatpush.bf16.msra.mxu3 %v447_v1  ;;  %v301_v18 = vld [vmem:[%s667_s3] sm:$0xff]  ;;  %v306_v36 = vld [vmem:[%s667_s3 + $0x28] sm:$0xff]  ;;  %v303_v54 = vld [vmem:[%s667_s3 + $0x10] sm:$0xff] }
   0x8   :  { %v305_v20 = vld [vmem:[%s667_s3 + $0x20] sm:$0xff]  ;;  %v310_v48 = vld [vmem:[%s667_s3 + $0x48] sm:$0xff]  ;;  %v307_v56 = vld [vmem:[%s667_s3 + $0x30] sm:$0xff] }
   0x9   :  { %v309_v28 = vld [vmem:[%s667_s3 + $0x40] sm:$0xff]  ;;  %v314_v50 = vld [vmem:[%s667_s3 + $0x68] sm:$0xff] }
   0xa   :  { %183 = vmatpush.bf16.msra.mxu0 %v446_v2  ;;  %455 = vmatpush.bf16.msra.mxu1 %v446_v2  ;;  %v313_v30 = vld [vmem:[%s667_s3 + $0x60] sm:$0xff] }
   0xb   :  { %456 = vmatpush.bf16.msra.mxu2 %v446_v2  ;;  %457 = vmatpush.bf16.msra.mxu3 %v446_v2 }
   0xe   :  { %184 = vmatpush.bf16.msra.mxu0 %v445_v3  ;;  %458 = vmatpush.bf16.msra.mxu1 %v445_v3 }
   0xf   :  { %459 = vmatpush.bf16.msra.mxu2 %v445_v3  ;;  %460 = vmatpush.bf16.msra.mxu3 %v445_v3 }
  0x12   :  { %185 = vmatpush.bf16.msra.mxu0 %v444_v4  ;;  %461 = vmatpush.bf16.msra.mxu1 %v444_v4 }
  0x13   :  { %462 = vmatpush.bf16.msra.mxu2 %v444_v4  ;;  %463 = vmatpush.bf16.msra.mxu3 %v444_v4  ;;  %v311_v4 = vld [vmem:[%s667_s3 + $0x50] sm:$0xff] }
  0x16   :  { %186 = vmatpush.bf16.msra.mxu0 %v443_v5  ;;  %464 = vmatpush.bf16.msra.mxu1 %v443_v5 }
  0x17   :  { %465 = vmatpush.bf16.msra.mxu2 %v443_v5  ;;  %466 = vmatpush.bf16.msra.mxu3 %v443_v5 }
  0x1a   :  { %187 = vmatpush.bf16.msra.mxu0 %v442_v6  ;;  %467 = vmatpush.bf16.msra.mxu1 %v442_v6 }
  0x1b   :  { %468 = vmatpush.bf16.msra.mxu2 %v442_v6  ;;  %469 = vmatpush.bf16.msra.mxu3 %v442_v6  ;;  %v315_v6 = vld [vmem:[%s667_s3 + $0x70] sm:$0xff] }
  0x1e   :  { %188 = vmatpush.bf16.msra.mxu0 %v441_v7  ;;  %470 = vmatpush.bf16.msra.mxu1 %v441_v7 }
  0x1f   :  { %471 = vmatpush.bf16.msra.mxu2 %v441_v7  ;;  %472 = vmatpush.bf16.msra.mxu3 %v441_v7 }
  0x21   :  { %189 = vmatmul.bf16.vlgmr.msra.gmra.mxu0 %v433_v8  ;;  %199 = vmatmul.bf16.vlgmr.msra.gmra.mxu1 %v435_v9 }
  0x22   :  { %209 = vmatmul.bf16.vlgmr.msra.gmra.mxu2 %v437_v10  ;;  %219 = vmatmul.bf16.vlgmr.msra.gmra.mxu3 %v439_v11  ;;  %v304_v10 = vld [vmem:[%s667_s3 + $0x18] sm:$0xff] }
  0x31   :  { %194 = vmatmul.bf16.gmra.mxu0 %v434_v12  ;;  %204 = vmatmul.bf16.gmra.mxu1 %v436_v13  ;;  %v308_v12 = vld [vmem:[%s667_s3 + $0x38] sm:$0xff] }
  0x32   :  { %214 = vmatmul.bf16.gmra.mxu2 %v438_v14  ;;  %224 = vmatmul.bf16.gmra.mxu3 %v440_v15 }
  0x9e   :  { %v190_v17 = vpop.f32.mrf.mxu0  ;;  %v200_v19 = vpop.f32.mrf.mxu1 }
  0x9f   :  { %v285_v21 = vadd.f32 %v550_v16, %v190_v17  ;;  %v289_v22 = vadd.f32 %v550_v16, %v200_v19 }
  0xa1   :  { %v317_v23 = vadd.f32 %v301_v18, %v285_v21  ;;  %v321_v24 = vadd.f32 %v305_v20, %v289_v22 }
  0xa3   :  { %v333_v25 = vmax.f32 %v317_v23, 0.0  ;;  %v337_v26 = vmax.f32 %v321_v24, 0.0 }
  0xa5   :  { %349 = vst [vmem:[%s668_s4] sm:$0xff] %v333_v25  ;;  %v210_v27 = vpop.f32.mrf.mxu2  ;;  %v220_v29 = vpop.f32.mrf.mxu3  ;;  %v312_v25 = vld [vmem:[%s667_s3 + $0x58] sm:$0xff] }
  0xa6   :  { %353 = vst [vmem:[%s668_s4 + $0x20] sm:$0xff] %v337_v26  ;;  %v293_v31 = vadd.f32 %v550_v16, %v210_v27  ;;  %v297_v32 = vadd.f32 %v550_v16, %v220_v29  ;;  %v192_v33 = vpop.f32.mrf.mxu0  ;;  %v202_v35 = vpop.f32.mrf.mxu1  ;;  %v316_v27 = vld [vmem:[%s667_s3 + $0x78] sm:$0xff] }
  0xa7   :  { %v286_v37 = vadd.f32 %v550_v16, %v192_v33  ;;  %v290_v38 = vadd.f32 %v550_v16, %v202_v35 }
  0xa8   :  { %v325_v39 = vadd.f32 %v309_v28, %v293_v31  ;;  %v329_v40 = vadd.f32 %v313_v30, %v297_v32 }
  0xa9   :  { %v318_v41 = vadd.f32 %v302_v34, %v286_v37  ;;  %v322_v42 = vadd.f32 %v306_v36, %v290_v38 }
  0xaa   :  { %v341_v43 = vmax.f32 %v325_v39, 0.0  ;;  %v345_v44 = vmax.f32 %v329_v40, 0.0 }
  0xab   :  { %v334_v45 = vmax.f32 %v318_v41, 0.0  ;;  %v338_v46 = vmax.f32 %v322_v42, 0.0 }
  0xac   :  { %357 = vst [vmem:[%s668_s4 + $0x40] sm:$0xff] %v341_v43 }
  0xad   :  { %361 = vst [vmem:[%s668_s4 + $0x60] sm:$0xff] %v345_v44  ;;  %v212_v47 = vpop.f32.mrf.mxu2  ;;  %v222_v49 = vpop.f32.mrf.mxu3 }
  0xae   :  { %350 = vst [vmem:[%s668_s4 + $0x8] sm:$0xff] %v334_v45  ;;  %v294_v51 = vadd.f32 %v550_v16, %v212_v47  ;;  %v298_v52 = vadd.f32 %v550_v16, %v222_v49  ;;  %v195_v53 = vpop.f32.mrf.mxu0  ;;  %v205_v55 = vpop.f32.mrf.mxu1 }
  0xaf   :  { %354 = vst [vmem:[%s668_s4 + $0x28] sm:$0xff] %v338_v46  ;;  %v287_v57 = vadd.f32 %v550_v16, %v195_v53  ;;  %v291_v58 = vadd.f32 %v550_v16, %v205_v55 }
  0xb0   :  { %v326_v59 = vadd.f32 %v310_v48, %v294_v51  ;;  %v330_v60 = vadd.f32 %v314_v50, %v298_v52 }
  0xb1   :  { %v319_v61 = vadd.f32 %v303_v54, %v287_v57  ;;  %v323_v62 = vadd.f32 %v307_v56, %v291_v58 }
  0xb2   :  { %v342_v63 = vmax.f32 %v326_v59, 0.0  ;;  %v346_v0 = vmax.f32 %v330_v60, 0.0 }
  0xb3   :  { %v335_v1 = vmax.f32 %v319_v61, 0.0  ;;  %v339_v2 = vmax.f32 %v323_v62, 0.0 }
  0xb4   :  { %358 = vst [vmem:[%s668_s4 + $0x48] sm:$0xff] %v342_v63 }
  0xb5   :  { %362 = vst [vmem:[%s668_s4 + $0x68] sm:$0xff] %v346_v0  ;;  %v215_v3 = vpop.f32.mrf.mxu2  ;;  %v225_v5 = vpop.f32.mrf.mxu3 }
  0xb6   :  { %351 = vst [vmem:[%s668_s4 + $0x10] sm:$0xff] %v335_v1  ;;  %v295_v7 = vadd.f32 %v550_v16, %v215_v3  ;;  %v299_v8 = vadd.f32 %v550_v16, %v225_v5  ;;  %v197_v9 = vpop.f32.mrf.mxu0  ;;  %v207_v11 = vpop.f32.mrf.mxu1 }
  0xb7   :  { %355 = vst [vmem:[%s668_s4 + $0x30] sm:$0xff] %v339_v2  ;;  %v288_v13 = vadd.f32 %v550_v16, %v197_v9  ;;  %v292_v14 = vadd.f32 %v550_v16, %v207_v11 }
  0xb8   :  { %v327_v15 = vadd.f32 %v311_v4, %v295_v7  ;;  %v331_v17 = vadd.f32 %v315_v6, %v299_v8 }
  0xb9   :  { %v320_v18 = vadd.f32 %v304_v10, %v288_v13  ;;  %v324_v19 = vadd.f32 %v308_v12, %v292_v14 }
  0xba   :  { %v343_v20 = vmax.f32 %v327_v15, 0.0  ;;  %v347_v21 = vmax.f32 %v331_v17, 0.0 }
  0xbb   :  { %v336_v22 = vmax.f32 %v320_v18, 0.0  ;;  %v340_v23 = vmax.f32 %v324_v19, 0.0 }
  0xbc   :  { %359 = vst [vmem:[%s668_s4 + $0x50] sm:$0xff] %v343_v20 }
  0xbd   :  { %363 = vst [vmem:[%s668_s4 + $0x70] sm:$0xff] %v347_v21  ;;  %v217_v24 = vpop.f32.mrf.mxu2  ;;  %v227_v26 = vpop.f32.mrf.mxu3 }
  0xbe   :  { %352 = vst [vmem:[%s668_s4 + $0x18] sm:$0xff] %v336_v22  ;;  %v296_v28 = vadd.f32 %v550_v16, %v217_v24  ;;  %v300_v29 = vadd.f32 %v550_v16, %v227_v26 }
  0xbf   :  { %356 = vst [vmem:[%s668_s4 + $0x38] sm:$0xff] %v340_v23 }
  0xc0   :  { %v328_v30 = vadd.f32 %v312_v25, %v296_v28  ;;  %v332_v31 = vadd.f32 %v316_v27, %v300_v29 }
  0xc2   :  { %v344_v32 = vmax.f32 %v328_v30, 0.0  ;;  %v348_v33 = vmax.f32 %v332_v31, 0.0 }
  0xc4   :  { %360 = vst [vmem:[%s668_s4 + $0x58] sm:$0xff] %v344_v32 }
  0xc5   :  { %364 = vst [vmem:[%s668_s4 + $0x78] sm:$0xff] %v348_v33 }

// kernel: _lambda_.68
= control target key start
LH: loop header
LB: loop body
LE: loop exit
PB: predicated region body
PF: predicated region fallthrough
CT: control target
= control target key end

     0   :  { %s280_s1 = inlined_call_operand.vmem [shape: bf16[128,128], index: 1, kind: input, shape index: {}]   ;;  %s281_s2 = inlined_call_operand.vmem [shape: f32[1,128], index: 2, kind: input, shape index: {}]   ;;  %s282_s0 = inlined_call_operand.vmem [shape: bf16[32,128], index: 0, kind: input, shape index: {}]   ;;  %s283_s3 = inlined_call_operand.vmem [shape: f32[32,128], index: 3, kind: output, shape index: {}]  }
   0x1   :  { %v205_v0 = vld [vmem:[%s280_s1 + $0x38] sm:$0xff]  ;;  %v204_v1 = vld [vmem:[%s280_s1 + $0x30] sm:$0xff]  ;;  %v203_v2 = vld [vmem:[%s280_s1 + $0x28] sm:$0xff] }
   0x2   :  { %106 = vmatpush.bf16.msra.mxu0 %v205_v0  ;;  %206 = vmatpush.bf16.msra.mxu1 %v205_v0  ;;  %v202_v3 = vld [vmem:[%s280_s1 + $0x20] sm:$0xff]  ;;  %v201_v4 = vld [vmem:[%s280_s1 + $0x18] sm:$0xff]  ;;  %v200_v5 = vld [vmem:[%s280_s1 + $0x10] sm:$0xff] }
   0x3   :  { %v199_v6 = vld [vmem:[%s280_s1 + $0x8] sm:$0xff]  ;;  %v198_v7 = vld [vmem:[%s280_s1] sm:$0xff] }
   0x4   :  { %v196_v8 = vld [vmem:[%s282_s0] sm:$0xff]  ;;  %v197_v9 = vld [vmem:[%s282_s0 + $0x8] sm:$0xff] }
   0x5   :  { %v214_v10 = vld [vmem:[%s281_s2] ss:$0 sm:$0xff] }
   0x6   :  { %107 = vmatpush.bf16.msra.mxu0 %v204_v1  ;;  %207 = vmatpush.bf16.msra.mxu1 %v204_v1 }
   0xa   :  { %108 = vmatpush.bf16.msra.mxu0 %v203_v2  ;;  %208 = vmatpush.bf16.msra.mxu1 %v203_v2 }
   0xe   :  { %109 = vmatpush.bf16.msra.mxu0 %v202_v3  ;;  %209 = vmatpush.bf16.msra.mxu1 %v202_v3 }
  0x12   :  { %110 = vmatpush.bf16.msra.mxu0 %v201_v4  ;;  %210 = vmatpush.bf16.msra.mxu1 %v201_v4 }
  0x16   :  { %111 = vmatpush.bf16.msra.mxu0 %v200_v5  ;;  %211 = vmatpush.bf16.msra.mxu1 %v200_v5 }
  0x1a   :  { %112 = vmatpush.bf16.msra.mxu0 %v199_v6  ;;  %212 = vmatpush.bf16.msra.mxu1 %v199_v6 }
  0x1e   :  { %113 = vmatpush.bf16.msra.mxu0 %v198_v7  ;;  %213 = vmatpush.bf16.msra.mxu1 %v198_v7 }
  0x21   :  { %114 = vmatmul.bf16.vlgmr.msra.gmra.mxu0 %v196_v8  ;;  %119 = vmatmul.bf16.vlgmr.msra.gmra.mxu1 %v197_v9 }
  0x9e   :  { %v115_v11 = vpop.f32.mrf.mxu0  ;;  %v120_v12 = vpop.f32.mrf.mxu1 }
  0x9f   :  { %v144_v13 = vadd.f32 %v214_v10, %v115_v11  ;;  %v146_v14 = vadd.f32 %v214_v10, %v120_v12 }
  0xa1   :  { %148 = vst [vmem:[%s283_s3] sm:$0xff] %v144_v13 }
  0xa2   :  { %150 = vst [vmem:[%s283_s3 + $0x10] sm:$0xff] %v146_v14 }
  0xa6   :  { %v117_v15 = vpop.f32.mrf.mxu0  ;;  %v122_v16 = vpop.f32.mrf.mxu1 }
  0xa7   :  { %v145_v17 = vadd.f32 %v214_v10, %v117_v15  ;;  %v147_v18 = vadd.f32 %v214_v10, %v122_v16 }
  0xa9   :  { %149 = vst [vmem:[%s283_s3 + $0x8] sm:$0xff] %v145_v17 }
  0xaa   :  { %151 = vst [vmem:[%s283_s3 + $0x18] sm:$0xff] %v147_v18 }

// kernel: _lambda_.66
= control target key start
LH: loop header
LB: loop body
LE: loop exit
PB: predicated region body
PF: predicated region fallthrough
CT: control target
= control target key end

     0   :  { %s558_s1 = inlined_call_operand.vmem [shape: bf16[128,128], index: 1, kind: input, shape index: {}]   ;;  %s559_s2 = inlined_call_operand.vmem [shape: f32[1,128], index: 2, kind: input, shape index: {}]   ;;  %s560_s0 = inlined_call_operand.vmem [shape: bf16[128,128], index: 0, kind: input, shape index: {}]   ;;  %s561_s3 = inlined_call_operand.vmem [shape: f32[128,128], index: 3, kind: output, shape index: {}]  }
   0x1   :  { %v413_v0 = vld [vmem:[%s558_s1 + $0x38] sm:$0xff]  ;;  %v412_v1 = vld [vmem:[%s558_s1 + $0x30] sm:$0xff]  ;;  %v411_v2 = vld [vmem:[%s558_s1 + $0x28] sm:$0xff] }
   0x2   :  { %178 = vmatpush.bf16.msra.mxu0 %v413_v0  ;;  %414 = vmatpush.bf16.msra.mxu1 %v413_v0  ;;  %v410_v3 = vld [vmem:[%s558_s1 + $0x20] sm:$0xff]  ;;  %v409_v4 = vld [vmem:[%s558_s1 + $0x18] sm:$0xff]  ;;  %v408_v5 = vld [vmem:[%s558_s1 + $0x10] sm:$0xff] }
   0x3   :  { %415 = vmatpush.bf16.msra.mxu2 %v413_v0  ;;  %416 = vmatpush.bf16.msra.mxu3 %v413_v0  ;;  %v407_v6 = vld [vmem:[%s558_s1 + $0x8] sm:$0xff]  ;;  %v406_v7 = vld [vmem:[%s558_s1] sm:$0xff]  ;;  %v400_v9 = vld [vmem:[%s560_s0 + $0x10] sm:$0xff] }
   0x4   :  { %v398_v8 = vld [vmem:[%s560_s0] sm:$0xff]  ;;  %v404_v11 = vld [vmem:[%s560_s0 + $0x30] sm:$0xff]  ;;  %v399_v12 = vld [vmem:[%s560_s0 + $0x8] sm:$0xff] }
   0x5   :  { %v402_v10 = vld [vmem:[%s560_s0 + $0x20] sm:$0xff]  ;;  %v401_v13 = vld [vmem:[%s560_s0 + $0x18] sm:$0xff]  ;;  %v403_v14 = vld [vmem:[%s560_s0 + $0x28] sm:$0xff] }
   0x6   :  { %179 = vmatpush.bf16.msra.mxu0 %v412_v1  ;;  %417 = vmatpush.bf16.msra.mxu1 %v412_v1  ;;  %v405_v15 = vld [vmem:[%s560_s0 + $0x38] sm:$0xff]  ;;  %v438_v16 = vld [vmem:[%s559_s2] ss:$0 sm:$0xff] }
   0x7   :  { %418 = vmatpush.bf16.msra.mxu2 %v412_v1  ;;  %419 = vmatpush.bf16.msra.mxu3 %v412_v1 }
   0xa   :  { %180 = vmatpush.bf16.msra.mxu0 %v411_v2  ;;  %420 = vmatpush.bf16.msra.mxu1 %v411_v2 }
   0xb   :  { %421 = vmatpush.bf16.msra.mxu2 %v411_v2  ;;  %422 = vmatpush.bf16.msra.mxu3 %v411_v2 }
   0xe   :  { %181 = vmatpush.bf16.msra.mxu0 %v410_v3  ;;  %423 = vmatpush.bf16.msra.mxu1 %v410_v3 }
   0xf   :  { %424 = vmatpush.bf16.msra.mxu2 %v410_v3  ;;  %425 = vmatpush.bf16.msra.mxu3 %v410_v3 }
  0x12   :  { %182 = vmatpush.bf16.msra.mxu0 %v409_v4  ;;  %426 = vmatpush.bf16.msra.mxu1 %v409_v4 }
  0x13   :  { %427 = vmatpush.bf16.msra.mxu2 %v409_v4  ;;  %428 = vmatpush.bf16.msra.mxu3 %v409_v4 }
  0x16   :  { %183 = vmatpush.bf16.msra.mxu0 %v408_v5  ;;  %429 = vmatpush.bf16.msra.mxu1 %v408_v5 }
  0x17   :  { %430 = vmatpush.bf16.msra.mxu2 %v408_v5  ;;  %431 = vmatpush.bf16.msra.mxu3 %v408_v5 }
  0x1a   :  { %184 = vmatpush.bf16.msra.mxu0 %v407_v6  ;;  %432 = vmatpush.bf16.msra.mxu1 %v407_v6 }
  0x1b   :  { %433 = vmatpush.bf16.msra.mxu2 %v407_v6  ;;  %434 = vmatpush.bf16.msra.mxu3 %v407_v6 }
  0x1e   :  { %185 = vmatpush.bf16.msra.mxu0 %v406_v7  ;;  %435 = vmatpush.bf16.msra.mxu1 %v406_v7 }
  0x1f   :  { %436 = vmatpush.bf16.msra.mxu2 %v406_v7  ;;  %437 = vmatpush.bf16.msra.mxu3 %v406_v7 }
  0x21   :  { %186 = vmatmul.bf16.vlgmr.msra.gmra.mxu0 %v398_v8  ;;  %196 = vmatmul.bf16.vlgmr.msra.gmra.mxu1 %v400_v9 }
  0x22   :  { %206 = vmatmul.bf16.vlgmr.msra.gmra.mxu2 %v402_v10  ;;  %216 = vmatmul.bf16.vlgmr.msra.gmra.mxu3 %v404_v11 }
  0x31   :  { %191 = vmatmul.bf16.gmra.mxu0 %v399_v12  ;;  %201 = vmatmul.bf16.gmra.mxu1 %v401_v13 }
  0x32   :  { %211 = vmatmul.bf16.gmra.mxu2 %v403_v14  ;;  %221 = vmatmul.bf16.gmra.mxu3 %v405_v15 }
  0x9e   :  { %v187_v17 = vpop.f32.mrf.mxu0  ;;  %v197_v18 = vpop.f32.mrf.mxu1 }
  0x9f   :  { %v282_v19 = vadd.f32 %v438_v16, %v187_v17  ;;  %v286_v20 = vadd.f32 %v438_v16, %v197_v18 }
  0xa1   :  { %v298_v21 = vmax.f32 %v282_v19, 0.0  ;;  %v302_v22 = vmax.f32 %v286_v20, 0.0 }
  0xa3   :  { %314 = vst [vmem:[%s561_s3] sm:$0xff] %v298_v21 }
  0xa4   :  { %318 = vst [vmem:[%s561_s3 + $0x20] sm:$0xff] %v302_v22 }
  0xa5   :  { %v207_v23 = vpop.f32.mrf.mxu2  ;;  %v217_v24 = vpop.f32.mrf.mxu3 }
  0xa6   :  { %v290_v25 = vadd.f32 %v438_v16, %v207_v23  ;;  %v294_v26 = vadd.f32 %v438_v16, %v217_v24  ;;  %v189_v27 = vpop.f32.mrf.mxu0  ;;  %v199_v28 = vpop.f32.mrf.mxu1 }
  0xa7   :  { %v283_v29 = vadd.f32 %v438_v16, %v189_v27  ;;  %v287_v30 = vadd.f32 %v438_v16, %v199_v28 }
  0xa8   :  { %v306_v31 = vmax.f32 %v290_v25, 0.0  ;;  %v310_v32 = vmax.f32 %v294_v26, 0.0 }
  0xa9   :  { %v299_v33 = vmax.f32 %v283_v29, 0.0  ;;  %v303_v34 = vmax.f32 %v287_v30, 0.0 }
  0xaa   :  { %322 = vst [vmem:[%s561_s3 + $0x40] sm:$0xff] %v306_v31 }
  0xab   :  { %326 = vst [vmem:[%s561_s3 + $0x60] sm:$0xff] %v310_v32 }
  0xac   :  { %315 = vst [vmem:[%s561_s3 + $0x8] sm:$0xff] %v299_v33 }
  0xad   :  { %319 = vst [vmem:[%s561_s3 + $0x28] sm:$0xff] %v303_v34  ;;  %v209_v35 = vpop.f32.mrf.mxu2  ;;  %v219_v36 = vpop.f32.mrf.mxu3 }
  0xae   :  { %v291_v37 = vadd.f32 %v438_v16, %v209_v35  ;;  %v295_v38 = vadd.f32 %v438_v16, %v219_v36  ;;  %v192_v39 = vpop.f32.mrf.mxu0  ;;  %v202_v40 = vpop.f32.mrf.mxu1 }
  0xaf   :  { %v284_v41 = vadd.f32 %v438_v16, %v192_v39  ;;  %v288_v42 = vadd.f32 %v438_v16, %v202_v40 }
  0xb0   :  { %v307_v43 = vmax.f32 %v291_v37, 0.0  ;;  %v311_v44 = vmax.f32 %v295_v38, 0.0 }
  0xb1   :  { %v300_v45 = vmax.f32 %v284_v41, 0.0  ;;  %v304_v46 = vmax.f32 %v288_v42, 0.0 }
  0xb2   :  { %323 = vst [vmem:[%s561_s3 + $0x48] sm:$0xff] %v307_v43 }
  0xb3   :  { %327 = vst [vmem:[%s561_s3 + $0x68] sm:$0xff] %v311_v44 }
  0xb4   :  { %316 = vst [vmem:[%s561_s3 + $0x10] sm:$0xff] %v300_v45 }
  0xb5   :  { %320 = vst [vmem:[%s561_s3 + $0x30] sm:$0xff] %v304_v46  ;;  %v212_v47 = vpop.f32.mrf.mxu2  ;;  %v222_v48 = vpop.f32.mrf.mxu3 }
  0xb6   :  { %v292_v49 = vadd.f32 %v438_v16, %v212_v47  ;;  %v296_v50 = vadd.f32 %v438_v16, %v222_v48  ;;  %v194_v51 = vpop.f32.mrf.mxu0  ;;  %v204_v52 = vpop.f32.mrf.mxu1 }
  0xb7   :  { %v285_v53 = vadd.f32 %v438_v16, %v194_v51  ;;  %v289_v54 = vadd.f32 %v438_v16, %v204_v52 }
  0xb8   :  { %v308_v55 = vmax.f32 %v292_v49, 0.0  ;;  %v312_v56 = vmax.f32 %v296_v50, 0.0 }
  0xb9   :  { %v301_v57 = vmax.f32 %v285_v53, 0.0  ;;  %v305_v58 = vmax.f32 %v289_v54, 0.0 }
  0xba   :  { %324 = vst [vmem:[%s561_s3 + $0x50] sm:$0xff] %v308_v55 }
  0xbb   :  { %328 = vst [vmem:[%s561_s3 + $0x70] sm:$0xff] %v312_v56 }
  0xbc   :  { %317 = vst [vmem:[%s561_s3 + $0x18] sm:$0xff] %v301_v57 }
  0xbd   :  { %321 = vst [vmem:[%s561_s3 + $0x38] sm:$0xff] %v305_v58  ;;  %v214_v59 = vpop.f32.mrf.mxu2  ;;  %v224_v60 = vpop.f32.mrf.mxu3 }
  0xbe   :  { %v293_v61 = vadd.f32 %v438_v16, %v214_v59  ;;  %v297_v62 = vadd.f32 %v438_v16, %v224_v60 }
  0xc0   :  { %v309_v63 = vmax.f32 %v293_v61, 0.0  ;;  %v313_v0 = vmax.f32 %v297_v62, 0.0 }
  0xc2   :  { %325 = vst [vmem:[%s561_s3 + $0x58] sm:$0xff] %v309_v63 }
  0xc3   :  { %329 = vst [vmem:[%s561_s3 + $0x78] sm:$0xff] %v313_v0 }

// kernel: _lambda_.69
= control target key start
LH: loop header
LB: loop body
LE: loop exit
PB: predicated region body
PF: predicated region fallthrough
CT: control target
= control target key end

     0   :  { %9 = vsyncpa [#allocation4], 0  ;;  %s272_s18 = smov [#allocation3]   ;;  %s355_s0 = inlined_call_operand.vmem [shape: bf16[32,128], index: 0, kind: input, shape index: {}]   ;;  %s356_s1 = inlined_call_operand.vmem [shape: bf16[128,128], index: 1, kind: input, shape index: {}]   ;;  %s357_s2 = inlined_call_operand.hbm [shape: f32[1,128], index: 2, kind: input, shape index: {}]   ;;  %s358_s3 = inlined_call_operand.vmem [shape: f32[32,128], index: 3, kind: input, shape index: {}]   ;;  %s359_s4 = inlined_call_operand.vmem [shape: f32[32,128], index: 4, kind: output, shape index: {}]  }
   0x1   :  { %s19_s17 = sshll.u32 %s357_s2, 4  ;;  %s21_s19 = sshll.u32 %s272_s18, 4  ;;  %s20_s17 = int_to_ptr.hbm [resolvable:$true] %s19_s17  ;;  %s22_s19 = int_to_ptr.vmem [resolvable:$true] %s21_s19 }
   0x2   :  { %24 = dma.hbm_to_vmem [thread:$0]  %s20_s17, 16, %s22_s19, [#allocation4]  }
   0x3   :  { %270 = dma.done.wait [#allocation4], 16  }
   0x4   :  { %271 = vsyncadd [#allocation4], 4294967280  ;;  %v235_v0 = vld [vmem:[%s356_s1 + $0x38] sm:$0xff]  ;;  %v234_v1 = vld [vmem:[%s356_s1 + $0x30] sm:$0xff] }
   0x5   :  { %123 = vmatpush.bf16.msra.mxu0 %v235_v0  ;;  %236 = vmatpush.bf16.msra.mxu1 %v235_v0  ;;  %v233_v2 = vld [vmem:[%s356_s1 + $0x28] sm:$0xff]  ;;  %v232_v3 = vld [vmem:[%s356_s1 + $0x20] sm:$0xff]  ;;  %v231_v4 = vld [vmem:[%s356_s1 + $0x18] sm:$0xff] }
   0x6   :  { %v230_v5 = vld [vmem:[%s356_s1 + $0x10] sm:$0xff]  ;;  %v229_v6 = vld [vmem:[%s356_s1 + $0x8] sm:$0xff]  ;;  %v228_v7 = vld [vmem:[%s356_s1] sm:$0xff] }
   0x7   :  { %v226_v8 = vld [vmem:[%s355_s0] sm:$0xff]  ;;  %v227_v9 = vld [vmem:[%s355_s0 + $0x8] sm:$0xff]  ;;  %v167_v14 = vld [vmem:[%s358_s3 + $0x10] sm:$0xff] }
   0x8   :  { %v245_v10 = vld [vmem:[#allocation3] ss:$0 sm:$0xff]  ;;  %v166_v22 = vld [vmem:[%s358_s3 + $0x8] sm:$0xff]  ;;  %v168_v24 = vld [vmem:[%s358_s3 + $0x18] sm:$0xff] }
   0x9   :  { %124 = vmatpush.bf16.msra.mxu0 %v234_v1  ;;  %237 = vmatpush.bf16.msra.mxu1 %v234_v1  ;;  %v165_v12 = vld [vmem:[%s358_s3] sm:$0xff] }
   0xd   :  { %125 = vmatpush.bf16.msra.mxu0 %v233_v2  ;;  %238 = vmatpush.bf16.msra.mxu1 %v233_v2 }
  0x11   :  { %126 = vmatpush.bf16.msra.mxu0 %v232_v3  ;;  %239 = vmatpush.bf16.msra.mxu1 %v232_v3 }
  0x15   :  { %127 = vmatpush.bf16.msra.mxu0 %v231_v4  ;;  %240 = vmatpush.bf16.msra.mxu1 %v231_v4 }
  0x19   :  { %128 = vmatpush.bf16.msra.mxu0 %v230_v5  ;;  %241 = vmatpush.bf16.msra.mxu1 %v230_v5 }
  0x1d   :  { %129 = vmatpush.bf16.msra.mxu0 %v229_v6  ;;  %242 = vmatpush.bf16.msra.mxu1 %v229_v6 }
  0x21   :  { %130 = vmatpush.bf16.msra.mxu0 %v228_v7  ;;  %243 = vmatpush.bf16.msra.mxu1 %v228_v7 }
  0x24   :  { %131 = vmatmul.bf16.vlgmr.msra.gmra.mxu0 %v226_v8  ;;  %136 = vmatmul.bf16.vlgmr.msra.gmra.mxu1 %v227_v9 }
  0xa1   :  { %v132_v11 = vpop.f32.mrf.mxu0  ;;  %v137_v13 = vpop.f32.mrf.mxu1 }
  0xa2   :  { %v161_v15 = vadd.f32 %v245_v10, %v132_v11  ;;  %v163_v16 = vadd.f32 %v245_v10, %v137_v13 }
  0xa4   :  { %v169_v17 = vadd.f32 %v165_v12, %v161_v15  ;;  %v171_v18 = vadd.f32 %v167_v14, %v163_v16 }
  0xa6   :  { %v173_v19 = vmax.f32 %v169_v17, 0.0  ;;  %v175_v20 = vmax.f32 %v171_v18, 0.0 }
  0xa8   :  { %177 = vst [vmem:[%s359_s4] sm:$0xff] %v173_v19 }
  0xa9   :  { %179 = vst [vmem:[%s359_s4 + $0x10] sm:$0xff] %v175_v20  ;;  %v134_v21 = vpop.f32.mrf.mxu0  ;;  %v139_v23 = vpop.f32.mrf.mxu1 }
  0xaa   :  { %v162_v25 = vadd.f32 %v245_v10, %v134_v21  ;;  %v164_v26 = vadd.f32 %v245_v10, %v139_v23 }
  0xac   :  { %v170_v27 = vadd.f32 %v166_v22, %v162_v25  ;;  %v172_v28 = vadd.f32 %v168_v24, %v164_v26 }
  0xae   :  { %v174_v29 = vmax.f32 %v170_v27, 0.0  ;;  %v176_v30 = vmax.f32 %v172_v28, 0.0 }
  0xb0   :  { %178 = vst [vmem:[%s359_s4 + $0x8] sm:$0xff] %v174_v29 }
  0xb1   :  { %180 = vst [vmem:[%s359_s4 + $0x18] sm:$0xff] %v176_v30 }
  0xb2   :  { %185 = vsyncpa [#allocation4], 1 }

// kernel: _lambda_.67
= control target key start
LH: loop header
LB: loop body
LE: loop exit
PB: predicated region body
PF: predicated region fallthrough
CT: control target
= control target key end

     0   :  { %8 = vsyncpa [#allocation4], 0  ;;  %s410_s15 = smov [#allocation3]   ;;  %s518_s0 = inlined_call_operand.vmem [shape: bf16[32,256], index: 0, kind: input, shape index: {}]   ;;  %s519_s1 = inlined_call_operand.vmem [shape: bf16[256,128], index: 1, kind: input, shape index: {}]   ;;  %s520_s2 = inlined_call_operand.hbm [shape: f32[1,128], index: 2, kind: input, shape index: {}]   ;;  %s521_s3 = inlined_call_operand.vmem [shape: f32[32,128], index: 3, kind: output, shape index: {}]  }
   0x1   :  { %s18_s14 = sshll.u32 %s520_s2, 4  ;;  %s20_s16 = sshll.u32 %s410_s15, 4  ;;  %s19_s14 = int_to_ptr.hbm [resolvable:$true] %s18_s14  ;;  %s21_s16 = int_to_ptr.vmem [resolvable:$true] %s20_s16 }
   0x2   :  { %23 = dma.hbm_to_vmem [thread:$0]  %s19_s14, 16, %s21_s16, [#allocation4]  }
   0x3   :  { %408 = dma.done.wait [#allocation4], 16  }
   0x4   :  { %409 = vsyncadd [#allocation4], 4294967280  ;;  %v357_v0 = vld [vmem:[%s519_s1 + $0x38] sm:$0xff]  ;;  %v356_v2 = vld [vmem:[%s519_s1 + $0x30] sm:$0xff] }
   0x5   :  { %v365_v1 = vld [vmem:[%s519_s1 + $0x78] sm:$0xff]  ;;  %192 = vmatpush.bf16.msra.mxu0 %v357_v0  ;;  %366 = vmatpush.bf16.msra.mxu2 %v357_v0  ;;  %v364_v3 = vld [vmem:[%s519_s1 + $0x70] sm:$0xff]  ;;  %v355_v4 = vld [vmem:[%s519_s1 + $0x28] sm:$0xff] }
   0x6   :  { %211 = vmatpush.bf16.msra.mxu1 %v365_v1  ;;  %374 = vmatpush.bf16.msra.mxu3 %v365_v1  ;;  %v363_v5 = vld [vmem:[%s519_s1 + $0x68] sm:$0xff]  ;;  %v354_v6 = vld [vmem:[%s519_s1 + $0x20] sm:$0xff]  ;;  %v353_v8 = vld [vmem:[%s519_s1 + $0x18] sm:$0xff] }
   0x7   :  { %v362_v7 = vld [vmem:[%s519_s1 + $0x60] sm:$0xff]  ;;  %v361_v9 = vld [vmem:[%s519_s1 + $0x58] sm:$0xff]  ;;  %v352_v10 = vld [vmem:[%s519_s1 + $0x10] sm:$0xff] }
   0x8   :  { %v360_v11 = vld [vmem:[%s519_s1 + $0x50] sm:$0xff]  ;;  %v351_v12 = vld [vmem:[%s519_s1 + $0x8] sm:$0xff]  ;;  %v350_v14 = vld [vmem:[%s519_s1] sm:$0xff] }
   0x9   :  { %193 = vmatpush.bf16.msra.mxu0 %v356_v2  ;;  %367 = vmatpush.bf16.msra.mxu2 %v356_v2  ;;  %v359_v13 = vld [vmem:[%s519_s1 + $0x48] sm:$0xff]  ;;  %v358_v15 = vld [vmem:[%s519_s1 + $0x40] sm:$0xff]  ;;  %v276_v18 = vld [vmem:[%s518_s0 + $0x10] sm:$0xf] }
   0xa   :  { %212 = vmatpush.bf16.msra.mxu1 %v364_v3  ;;  %375 = vmatpush.bf16.msra.mxu3 %v364_v3  ;;  %v268_v16 = vld [vmem:[%s518_s0] sm:$0xf]  ;;  %v347_v17 = vld [vmem:[%s518_s0 + $0x4] sm:$0xf0]  ;;  %v349_v19 = vld [vmem:[%s518_s0 + $0x14] sm:$0xf0] }
   0xb   :  { %v346_v20 = vld [vmem:[%s518_s0 + $0x4] sm:$0xf]  ;;  %v270_v21 = vld [vmem:[%s518_s0 + $0x8] sm:$0xf0]  ;;  %v348_v22 = vld [vmem:[%s518_s0 + $0x14] sm:$0xf]  ;;  %v269_v24 = vor.u32 %v347_v17, %v268_v16  ;;  %v277_v25 = vor.u32 %v349_v19, %v276_v18 }
   0xc   :  { %v278_v23 = vld [vmem:[%s518_s0 + $0x18] sm:$0xf0]  ;;  %v273_v26 = vor.u32 %v346_v20, %v270_v21  ;;  %v383_v29 = vld [vmem:[#allocation3] ss:$0 sm:$0xff] }
   0xd   :  { %194 = vmatpush.bf16.msra.mxu0 %v355_v4  ;;  %368 = vmatpush.bf16.msra.mxu2 %v355_v4  ;;  %v281_v27 = vor.u32 %v348_v22, %v278_v23 }
   0xe   :  { %213 = vmatpush.bf16.msra.mxu1 %v363_v5  ;;  %376 = vmatpush.bf16.msra.mxu3 %v363_v5 }
  0x11   :  { %195 = vmatpush.bf16.msra.mxu0 %v354_v6  ;;  %369 = vmatpush.bf16.msra.mxu2 %v354_v6 }
  0x12   :  { %214 = vmatpush.bf16.msra.mxu1 %v362_v7  ;;  %377 = vmatpush.bf16.msra.mxu3 %v362_v7 }
  0x15   :  { %196 = vmatpush.bf16.msra.mxu0 %v353_v8  ;;  %370 = vmatpush.bf16.msra.mxu2 %v353_v8 }
  0x16   :  { %215 = vmatpush.bf16.msra.mxu1 %v361_v9  ;;  %378 = vmatpush.bf16.msra.mxu3 %v361_v9 }
  0x19   :  { %197 = vmatpush.bf16.msra.mxu0 %v352_v10  ;;  %371 = vmatpush.bf16.msra.mxu2 %v352_v10 }
  0x1a   :  { %216 = vmatpush.bf16.msra.mxu1 %v360_v11  ;;  %379 = vmatpush.bf16.msra.mxu3 %v360_v11 }
  0x1d   :  { %198 = vmatpush.bf16.msra.mxu0 %v351_v12  ;;  %372 = vmatpush.bf16.msra.mxu2 %v351_v12 }
  0x1e   :  { %217 = vmatpush.bf16.msra.mxu1 %v359_v13  ;;  %380 = vmatpush.bf16.msra.mxu3 %v359_v13 }
  0x21   :  { %199 = vmatpush.bf16.msra.mxu0 %v350_v14  ;;  %373 = vmatpush.bf16.msra.mxu2 %v350_v14 }
  0x22   :  { %218 = vmatpush.bf16.msra.mxu1 %v358_v15  ;;  %381 = vmatpush.bf16.msra.mxu3 %v358_v15 }
  0x24   :  { %200 = vmatmul.bf16.vlgmr.msra.gmra.mxu0 %v269_v24  ;;  %205 = vmatmul.bf16.vlgmr.msra.gmra.mxu2 %v277_v25 }
  0x25   :  { %219 = vmatmul.bf16.vlgmr.msra.gmra.mxu1 %v273_v26  ;;  %224 = vmatmul.bf16.vlgmr.msra.gmra.mxu3 %v281_v27 }
  0xa1   :  { %v201_v28 = vpop.f32.mrf.mxu0 }
  0xa2   :  { %v220_v30 = vpop.f32.mrf.mxu1 }
  0xa3   :  { %v221_v31 = vadd.f32 %v220_v30, %v201_v28 }
  0xa5   :  { %v249_v32 = vadd.f32 %v383_v29, %v221_v31 }
  0xa7   :  { %v253_v33 = vmax.f32 %v249_v32, 0.0  ;;  %v206_v34 = vpop.f32.mrf.mxu2 }
  0xa8   :  { %v225_v35 = vpop.f32.mrf.mxu3 }
  0xa9   :  { %257 = vst [vmem:[%s521_s3] sm:$0xff] %v253_v33  ;;  %v226_v36 = vadd.f32 %v225_v35, %v206_v34  ;;  %v203_v37 = vpop.f32.mrf.mxu0 }
  0xaa   :  { %v222_v38 = vpop.f32.mrf.mxu1 }
  0xab   :  { %v251_v39 = vadd.f32 %v383_v29, %v226_v36  ;;  %v223_v40 = vadd.f32 %v222_v38, %v203_v37 }
  0xad   :  { %v255_v41 = vmax.f32 %v251_v39, 0.0  ;;  %v250_v42 = vadd.f32 %v383_v29, %v223_v40 }
  0xaf   :  { %259 = vst [vmem:[%s521_s3 + $0x10] sm:$0xff] %v255_v41  ;;  %v254_v43 = vmax.f32 %v250_v42, 0.0  ;;  %v208_v44 = vpop.f32.mrf.mxu2 }
  0xb0   :  { %v227_v45 = vpop.f32.mrf.mxu3 }
  0xb1   :  { %258 = vst [vmem:[%s521_s3 + $0x8] sm:$0xff] %v254_v43  ;;  %v228_v46 = vadd.f32 %v227_v45, %v208_v44 }
  0xb3   :  { %v252_v47 = vadd.f32 %v383_v29, %v228_v46 }
  0xb5   :  { %v256_v48 = vmax.f32 %v252_v47, 0.0 }
  0xb7   :  { %260 = vst [vmem:[%s521_s3 + $0x18] sm:$0xff] %v256_v48 }
  0xb8   :  { %265 = vsyncpa [#allocation4], 1 }

// kernel: _lambda_.70
= control target key start
LH: loop header
LB: loop body
LE: loop exit
PB: predicated region body
PF: predicated region fallthrough
CT: control target
= control target key end

     0   :  { %s284_s1 = inlined_call_operand.vmem [shape: bf16[128,128], index: 1, kind: input, shape index: {}]   ;;  %s285_s2 = inlined_call_operand.vmem [shape: f32[1,128], index: 2, kind: input, shape index: {}]   ;;  %s286_s0 = inlined_call_operand.vmem [shape: bf16[32,128], index: 0, kind: input, shape index: {}]   ;;  %s287_s3 = inlined_call_operand.vmem [shape: f32[32,128], index: 3, kind: output, shape index: {}]  }
   0x1   :  { %v209_v0 = vld [vmem:[%s284_s1 + $0x38] sm:$0xff]  ;;  %v208_v1 = vld [vmem:[%s284_s1 + $0x30] sm:$0xff]  ;;  %v207_v2 = vld [vmem:[%s284_s1 + $0x28] sm:$0xff] }
   0x2   :  { %106 = vmatpush.bf16.msra.mxu0 %v209_v0  ;;  %210 = vmatpush.bf16.msra.mxu1 %v209_v0  ;;  %v206_v3 = vld [vmem:[%s284_s1 + $0x20] sm:$0xff]  ;;  %v205_v4 = vld [vmem:[%s284_s1 + $0x18] sm:$0xff]  ;;  %v204_v5 = vld [vmem:[%s284_s1 + $0x10] sm:$0xff] }
   0x3   :  { %v203_v6 = vld [vmem:[%s284_s1 + $0x8] sm:$0xff]  ;;  %v202_v7 = vld [vmem:[%s284_s1] sm:$0xff] }
   0x4   :  { %v200_v8 = vld [vmem:[%s286_s0] sm:$0xff]  ;;  %v201_v9 = vld [vmem:[%s286_s0 + $0x8] sm:$0xff] }
   0x5   :  { %v218_v10 = vld [vmem:[%s285_s2] ss:$0 sm:$0xff] }
   0x6   :  { %107 = vmatpush.bf16.msra.mxu0 %v208_v1  ;;  %211 = vmatpush.bf16.msra.mxu1 %v208_v1 }
   0xa   :  { %108 = vmatpush.bf16.msra.mxu0 %v207_v2  ;;  %212 = vmatpush.bf16.msra.mxu1 %v207_v2 }
   0xe   :  { %109 = vmatpush.bf16.msra.mxu0 %v206_v3  ;;  %213 = vmatpush.bf16.msra.mxu1 %v206_v3 }
  0x12   :  { %110 = vmatpush.bf16.msra.mxu0 %v205_v4  ;;  %214 = vmatpush.bf16.msra.mxu1 %v205_v4 }
  0x16   :  { %111 = vmatpush.bf16.msra.mxu0 %v204_v5  ;;  %215 = vmatpush.bf16.msra.mxu1 %v204_v5 }
  0x1a   :  { %112 = vmatpush.bf16.msra.mxu0 %v203_v6  ;;  %216 = vmatpush.bf16.msra.mxu1 %v203_v6 }
  0x1e   :  { %113 = vmatpush.bf16.msra.mxu0 %v202_v7  ;;  %217 = vmatpush.bf16.msra.mxu1 %v202_v7 }
  0x21   :  { %114 = vmatmul.bf16.vlgmr.msra.gmra.mxu0 %v200_v8  ;;  %119 = vmatmul.bf16.vlgmr.msra.gmra.mxu1 %v201_v9 }
  0x9e   :  { %v115_v11 = vpop.f32.mrf.mxu0  ;;  %v120_v12 = vpop.f32.mrf.mxu1 }
  0x9f   :  { %v144_v13 = vadd.f32 %v218_v10, %v115_v11  ;;  %v146_v14 = vadd.f32 %v218_v10, %v120_v12 }
  0xa1   :  { %v148_v15 = vmax.f32 %v144_v13, 0.0  ;;  %v150_v16 = vmax.f32 %v146_v14, 0.0 }
  0xa3   :  { %152 = vst [vmem:[%s287_s3] sm:$0xff] %v148_v15 }
  0xa4   :  { %154 = vst [vmem:[%s287_s3 + $0x10] sm:$0xff] %v150_v16 }
  0xa6   :  { %v117_v17 = vpop.f32.mrf.mxu0  ;;  %v122_v18 = vpop.f32.mrf.mxu1 }
  0xa7   :  { %v145_v19 = vadd.f32 %v218_v10, %v117_v17  ;;  %v147_v20 = vadd.f32 %v218_v10, %v122_v18 }
  0xa9   :  { %v149_v21 = vmax.f32 %v145_v19, 0.0  ;;  %v151_v22 = vmax.f32 %v147_v20, 0.0 }
  0xab   :  { %153 = vst [vmem:[%s287_s3 + $0x8] sm:$0xff] %v149_v21 }
  0xac   :  { %155 = vst [vmem:[%s287_s3 + $0x18] sm:$0xff] %v151_v22 }

// kernel: _lambda_.72
= control target key start
LH: loop header
LB: loop body
LE: loop exit
PB: predicated region body
PF: predicated region fallthrough
CT: control target
= control target key end

     0   :  { %8 = vsyncpa [#allocation4], 0  ;;  %s217_s15 = smov [#allocation3]   ;;  %s274_s0 = inlined_call_operand.vmem [shape: bf16[16,128], index: 0, kind: input, shape index: {}]   ;;  %s275_s1 = inlined_call_operand.vmem [shape: bf16[128,128], index: 1, kind: input, shape index: {}]   ;;  %s276_s2 = inlined_call_operand.hbm [shape: f32[1,128], index: 2, kind: input, shape index: {}]   ;;  %s277_s3 = inlined_call_operand.vmem [shape: f32[16,128], index: 3, kind: output, shape index: {}]  }
   0x1   :  { %s18_s14 = sshll.u32 %s276_s2, 4  ;;  %s20_s16 = sshll.u32 %s217_s15, 4  ;;  %s19_s14 = int_to_ptr.hbm [resolvable:$true] %s18_s14  ;;  %s21_s16 = int_to_ptr.vmem [resolvable:$true] %s20_s16 }
   0x2   :  { %23 = dma.hbm_to_vmem [thread:$0]  %s19_s14, 16, %s21_s16, [#allocation4]  }
   0x3   :  { %215 = dma.done.wait [#allocation4], 16  }
   0x4   :  { %216 = vsyncadd [#allocation4], 4294967280  ;;  %v188_v0 = vld [vmem:[%s275_s1 + $0x38] sm:$0xff]  ;;  %v187_v1 = vld [vmem:[%s275_s1 + $0x30] sm:$0xff] }
   0x5   :  { %108 = vmatpush.bf16.msra.mxu0 %v188_v0  ;;  %v186_v2 = vld [vmem:[%s275_s1 + $0x28] sm:$0xff]  ;;  %v185_v3 = vld [vmem:[%s275_s1 + $0x20] sm:$0xff]  ;;  %v184_v4 = vld [vmem:[%s275_s1 + $0x18] sm:$0xff] }
   0x6   :  { %v183_v5 = vld [vmem:[%s275_s1 + $0x10] sm:$0xff]  ;;  %v182_v6 = vld [vmem:[%s275_s1 + $0x8] sm:$0xff]  ;;  %v181_v7 = vld [vmem:[%s275_s1] sm:$0xff] }
   0x7   :  { %v180_v8 = vld [vmem:[%s274_s0] sm:$0xff] }
   0x8   :  { %v190_v9 = vld [vmem:[#allocation3] ss:$0 sm:$0xff] }
   0x9   :  { %109 = vmatpush.bf16.msra.mxu0 %v187_v1 }
   0xd   :  { %110 = vmatpush.bf16.msra.mxu0 %v186_v2 }
  0x11   :  { %111 = vmatpush.bf16.msra.mxu0 %v185_v3 }
  0x15   :  { %112 = vmatpush.bf16.msra.mxu0 %v184_v4 }
  0x19   :  { %113 = vmatpush.bf16.msra.mxu0 %v183_v5 }
  0x1d   :  { %114 = vmatpush.bf16.msra.mxu0 %v182_v6 }
  0x21   :  { %115 = vmatpush.bf16.msra.mxu0 %v181_v7 }
  0x24   :  { %116 = vmatmul.bf16.vlgmr.msra.gmra.mxu0 %v180_v8 }
  0xa1   :  { %v117_v10 = vpop.f32.mrf.mxu0 }
  0xa2   :  { %v135_v11 = vadd.f32 %v190_v9, %v117_v10 }
  0xa4   :  { %137 = vst [vmem:[%s277_s3] sm:$0xff] %v135_v11 }
  0xa9   :  { %v119_v12 = vpop.f32.mrf.mxu0 }
  0xaa   :  { %v136_v13 = vadd.f32 %v190_v9, %v119_v12 }
  0xac   :  { %138 = vst [vmem:[%s277_s3 + $0x8] sm:$0xff] %v136_v13 }
  0xad   :  { %143 = vsyncpa [#allocation4], 1 }

// kernel: _lambda_.71
= control target key start
LH: loop header
LB: loop body
LE: loop exit
PB: predicated region body
PF: predicated region fallthrough
CT: control target
= control target key end

     0   :  { %s554_s1 = inlined_call_operand.vmem [shape: bf16[384,128], index: 1, kind: input, shape index: {}]   ;;  %s555_s0 = inlined_call_operand.vmem [shape: bf16[16,384], index: 0, kind: input, shape index: {}]   ;;  %s556_s2 = inlined_call_operand.vmem [shape: f32[1,128], index: 2, kind: input, shape index: {}]   ;;  %s557_s3 = inlined_call_operand.vmem [shape: f32[16,128], index: 3, kind: output, shape index: {}]  }
   0x1   :  { %v417_v0 = vld [vmem:[%s554_s1 + $0x38] sm:$0xff]  ;;  %v416_v3 = vld [vmem:[%s554_s1 + $0x30] sm:$0xff]  ;;  %v415_v6 = vld [vmem:[%s554_s1 + $0x28] sm:$0xff] }
   0x2   :  { %v425_v1 = vld [vmem:[%s554_s1 + $0x78] sm:$0xff]  ;;  %234 = vmatpush.bf16.msra.mxu0 %v417_v0  ;;  %v424_v4 = vld [vmem:[%s554_s1 + $0x70] sm:$0xff]  ;;  %v423_v7 = vld [vmem:[%s554_s1 + $0x68] sm:$0xff] }
   0x3   :  { %v433_v2 = vld [vmem:[%s554_s1 + $0xb8] sm:$0xff]  ;;  %248 = vmatpush.bf16.msra.mxu1 %v425_v1  ;;  %v432_v5 = vld [vmem:[%s554_s1 + $0xb0] sm:$0xff]  ;;  %v431_v8 = vld [vmem:[%s554_s1 + $0xa8] sm:$0xff] }
   0x4   :  { %262 = vmatpush.bf16.msra.mxu2 %v433_v2  ;;  %v414_v9 = vld [vmem:[%s554_s1 + $0x20] sm:$0xff]  ;;  %v413_v12 = vld [vmem:[%s554_s1 + $0x18] sm:$0xff]  ;;  %v412_v15 = vld [vmem:[%s554_s1 + $0x10] sm:$0xff] }
   0x5   :  { %v422_v10 = vld [vmem:[%s554_s1 + $0x60] sm:$0xff]  ;;  %v421_v13 = vld [vmem:[%s554_s1 + $0x58] sm:$0xff]  ;;  %v420_v16 = vld [vmem:[%s554_s1 + $0x50] sm:$0xff] }
   0x6   :  { %235 = vmatpush.bf16.msra.mxu0 %v416_v3  ;;  %v430_v11 = vld [vmem:[%s554_s1 + $0xa0] sm:$0xff]  ;;  %v429_v14 = vld [vmem:[%s554_s1 + $0x98] sm:$0xff]  ;;  %v428_v17 = vld [vmem:[%s554_s1 + $0x90] sm:$0xff] }
   0x7   :  { %249 = vmatpush.bf16.msra.mxu1 %v424_v4  ;;  %v411_v18 = vld [vmem:[%s554_s1 + $0x8] sm:$0xff]  ;;  %v410_v21 = vld [vmem:[%s554_s1] sm:$0xff]  ;;  %v303_v26 = vld [vmem:[%s555_s0 + $0xc] sm:$0xf0] }
   0x8   :  { %263 = vmatpush.bf16.msra.mxu2 %v432_v5  ;;  %v419_v19 = vld [vmem:[%s554_s1 + $0x48] sm:$0xff]  ;;  %v418_v22 = vld [vmem:[%s554_s1 + $0x40] sm:$0xff]  ;;  %v409_v29 = vld [vmem:[%s555_s0 + $0x10] sm:$0xf0] }
   0x9   :  { %v427_v20 = vld [vmem:[%s554_s1 + $0x88] sm:$0xff]  ;;  %v301_v23 = vld [vmem:[%s555_s0] sm:$0xf]  ;;  %v407_v25 = vld [vmem:[%s555_s0 + $0x4] sm:$0xf] }
   0xa   :  { %236 = vmatpush.bf16.msra.mxu0 %v415_v6  ;;  %v408_v24 = vld [vmem:[%s555_s0 + $0x8] sm:$0xf0]  ;;  %v426_v27 = vld [vmem:[%s554_s1 + $0x80] sm:$0xff]  ;;  %v309_v28 = vld [vmem:[%s555_s0 + $0x8] sm:$0xf]  ;;  %v306_v31 = vor.u32 %v407_v25, %v303_v26 }
   0xb   :  { %250 = vmatpush.bf16.msra.mxu1 %v423_v7  ;;  %v302_v30 = vor.u32 %v408_v24, %v301_v23  ;;  %v310_v32 = vor.u32 %v409_v29, %v309_v28  ;;  %v434_v36 = vld [vmem:[%s556_s2] ss:$0 sm:$0xff] }
   0xc   :  { %264 = vmatpush.bf16.msra.mxu2 %v431_v8 }
   0xe   :  { %237 = vmatpush.bf16.msra.mxu0 %v414_v9 }
   0xf   :  { %251 = vmatpush.bf16.msra.mxu1 %v422_v10 }
  0x10   :  { %265 = vmatpush.bf16.msra.mxu2 %v430_v11 }
  0x12   :  { %238 = vmatpush.bf16.msra.mxu0 %v413_v12 }
  0x13   :  { %252 = vmatpush.bf16.msra.mxu1 %v421_v13 }
  0x14   :  { %266 = vmatpush.bf16.msra.mxu2 %v429_v14 }
  0x16   :  { %239 = vmatpush.bf16.msra.mxu0 %v412_v15 }
  0x17   :  { %253 = vmatpush.bf16.msra.mxu1 %v420_v16 }
  0x18   :  { %267 = vmatpush.bf16.msra.mxu2 %v428_v17 }
  0x1a   :  { %240 = vmatpush.bf16.msra.mxu0 %v411_v18 }
  0x1b   :  { %254 = vmatpush.bf16.msra.mxu1 %v419_v19 }
  0x1c   :  { %268 = vmatpush.bf16.msra.mxu2 %v427_v20 }
  0x1e   :  { %241 = vmatpush.bf16.msra.mxu0 %v410_v21 }
  0x1f   :  { %255 = vmatpush.bf16.msra.mxu1 %v418_v22 }
  0x20   :  { %269 = vmatpush.bf16.msra.mxu2 %v426_v27 }
  0x21   :  { %242 = vmatmul.bf16.vlgmr.msra.gmra.mxu0 %v302_v30 }
  0x22   :  { %256 = vmatmul.bf16.vlgmr.msra.gmra.mxu1 %v306_v31 }
  0x23   :  { %270 = vmatmul.bf16.vlgmr.msra.gmra.mxu2 %v310_v32 }
  0x9e   :  { %v243_v33 = vpop.f32.mrf.mxu0 }
  0x9f   :  { %v257_v34 = vpop.f32.mrf.mxu1 }
  0xa0   :  { %v258_v35 = vadd.f32 %v257_v34, %v243_v33 }
  0xa6   :  { %v271_v37 = vpop.f32.mrf.mxu2  ;;  %v245_v40 = vpop.f32.mrf.mxu0 }
  0xa7   :  { %v272_v38 = vadd.f32 %v271_v37, %v258_v35  ;;  %v259_v41 = vpop.f32.mrf.mxu1 }
  0xa8   :  { %v260_v43 = vadd.f32 %v259_v41, %v245_v40 }
  0xa9   :  { %v289_v39 = vadd.f32 %v434_v36, %v272_v38 }
  0xab   :  { %v291_v42 = vmax.f32 %v289_v39, 0.0 }
  0xad   :  { %293 = vst [vmem:[%s557_s3] sm:$0xff] %v291_v42 }
  0xae   :  { %v273_v44 = vpop.f32.mrf.mxu2 }
  0xaf   :  { %v274_v45 = vadd.f32 %v273_v44, %v260_v43 }
  0xb1   :  { %v290_v46 = vadd.f32 %v434_v36, %v274_v45 }
  0xb3   :  { %v292_v47 = vmax.f32 %v290_v46, 0.0 }
  0xb5   :  { %294 = vst [vmem:[%s557_s3 + $0x8] sm:$0xff] %v292_v47 }

// kernel: _lambda_.73
= control target key start
LH: loop header
LB: loop body
LE: loop exit
PB: predicated region body
PF: predicated region fallthrough
CT: control target
= control target key end

     0   :  { %s251_s1 = inlined_call_operand.vmem [shape: bf16[128,128], index: 1, kind: input, shape index: {}]   ;;  %s252_s2 = inlined_call_operand.vmem [shape: f32[1,128], index: 2, kind: input, shape index: {}]   ;;  %s253_s0 = inlined_call_operand.vmem [shape: bf16[16,128], index: 0, kind: input, shape index: {}]   ;;  %s254_s3 = inlined_call_operand.vmem [shape: f32[16,128], index: 3, kind: input, shape index: {}]   ;;  %s255_s4 = inlined_call_operand.vmem [shape: f32[16,128], index: 4, kind: output, shape index: {}]  }
   0x1   :  { %v182_v0 = vld [vmem:[%s251_s1 + $0x38] sm:$0xff]  ;;  %v181_v1 = vld [vmem:[%s251_s1 + $0x30] sm:$0xff]  ;;  %v180_v2 = vld [vmem:[%s251_s1 + $0x28] sm:$0xff] }
   0x2   :  { %97 = vmatpush.bf16.msra.mxu0 %v182_v0  ;;  %v179_v3 = vld [vmem:[%s251_s1 + $0x20] sm:$0xff]  ;;  %v178_v4 = vld [vmem:[%s251_s1 + $0x18] sm:$0xff]  ;;  %v177_v5 = vld [vmem:[%s251_s1 + $0x10] sm:$0xff] }
   0x3   :  { %v176_v6 = vld [vmem:[%s251_s1 + $0x8] sm:$0xff]  ;;  %v175_v7 = vld [vmem:[%s251_s1] sm:$0xff] }
   0x4   :  { %v174_v8 = vld [vmem:[%s253_s0] sm:$0xff]  ;;  %v127_v16 = vld [vmem:[%s254_s3 + $0x8] sm:$0xff] }
   0x5   :  { %v183_v9 = vld [vmem:[%s252_s2] ss:$0 sm:$0xff] }
   0x6   :  { %98 = vmatpush.bf16.msra.mxu0 %v181_v1  ;;  %v126_v11 = vld [vmem:[%s254_s3] sm:$0xff] }
   0xa   :  { %99 = vmatpush.bf16.msra.mxu0 %v180_v2 }
   0xe   :  { %100 = vmatpush.bf16.msra.mxu0 %v179_v3 }
  0x12   :  { %101 = vmatpush.bf16.msra.mxu0 %v178_v4 }
  0x16   :  { %102 = vmatpush.bf16.msra.mxu0 %v177_v5 }
  0x1a   :  { %103 = vmatpush.bf16.msra.mxu0 %v176_v6 }
  0x1e   :  { %104 = vmatpush.bf16.msra.mxu0 %v175_v7 }
  0x21   :  { %105 = vmatmul.bf16.vlgmr.msra.gmra.mxu0 %v174_v8 }
  0x9e   :  { %v106_v10 = vpop.f32.mrf.mxu0 }
  0x9f   :  { %v124_v12 = vadd.f32 %v183_v9, %v106_v10 }
  0xa1   :  { %v128_v13 = vadd.f32 %v126_v11, %v124_v12 }
  0xa3   :  { %v130_v14 = vmax.f32 %v128_v13, 0.0 }
  0xa5   :  { %132 = vst [vmem:[%s255_s4] sm:$0xff] %v130_v14 }
  0xa6   :  { %v108_v15 = vpop.f32.mrf.mxu0 }
  0xa7   :  { %v125_v17 = vadd.f32 %v183_v9, %v108_v15 }
  0xa9   :  { %v129_v18 = vadd.f32 %v127_v16, %v125_v17 }
  0xab   :  { %v131_v19 = vmax.f32 %v129_v18, 0.0 }
  0xad   :  { %133 = vst [vmem:[%s255_s4 + $0x8] sm:$0xff] %v131_v19 }

// kernel: _lambda_.91
= control target key start
LH: loop header
LB: loop body
LE: loop exit
PB: predicated region body
PF: predicated region fallthrough
CT: control target
= control target key end

     0   :  { %s711_s1 = inlined_call_operand.vmem [shape: bf16[512,128], index: 1, kind: input, shape index: {}]   ;;  %s712_s0 = inlined_call_operand.vmem [shape: bf16[16,512], index: 0, kind: input, shape index: {}]   ;;  %s713_s2 = inlined_call_operand.vmem [shape: f32[1,128], index: 2, kind: input, shape index: {}]   ;;  %s714_s3 = inlined_call_operand.vmem [shape: f32[16,128], index: 3, kind: output, shape index: {}]  }
   0x1   :  { %v536_v0 = vld [vmem:[%s711_s1 + $0x38] sm:$0xff]  ;;  %v535_v4 = vld [vmem:[%s711_s1 + $0x30] sm:$0xff]  ;;  %v534_v8 = vld [vmem:[%s711_s1 + $0x28] sm:$0xff] }
   0x2   :  { %v544_v1 = vld [vmem:[%s711_s1 + $0x78] sm:$0xff]  ;;  %302 = vmatpush.bf16.msra.mxu0 %v536_v0  ;;  %v543_v5 = vld [vmem:[%s711_s1 + $0x70] sm:$0xff]  ;;  %v542_v9 = vld [vmem:[%s711_s1 + $0x68] sm:$0xff] }
   0x3   :  { %v552_v2 = vld [vmem:[%s711_s1 + $0xb8] sm:$0xff]  ;;  %316 = vmatpush.bf16.msra.mxu1 %v544_v1  ;;  %v551_v6 = vld [vmem:[%s711_s1 + $0xb0] sm:$0xff]  ;;  %v550_v10 = vld [vmem:[%s711_s1 + $0xa8] sm:$0xff] }
   0x4   :  { %v560_v3 = vld [vmem:[%s711_s1 + $0xf8] sm:$0xff]  ;;  %330 = vmatpush.bf16.msra.mxu2 %v552_v2  ;;  %v559_v7 = vld [vmem:[%s711_s1 + $0xf0] sm:$0xff]  ;;  %v558_v11 = vld [vmem:[%s711_s1 + $0xe8] sm:$0xff] }
   0x5   :  { %344 = vmatpush.bf16.msra.mxu3 %v560_v3  ;;  %v533_v12 = vld [vmem:[%s711_s1 + $0x20] sm:$0xff]  ;;  %v532_v16 = vld [vmem:[%s711_s1 + $0x18] sm:$0xff]  ;;  %v531_v20 = vld [vmem:[%s711_s1 + $0x10] sm:$0xff] }
   0x6   :  { %303 = vmatpush.bf16.msra.mxu0 %v535_v4  ;;  %v541_v13 = vld [vmem:[%s711_s1 + $0x60] sm:$0xff]  ;;  %v540_v17 = vld [vmem:[%s711_s1 + $0x58] sm:$0xff]  ;;  %v539_v21 = vld [vmem:[%s711_s1 + $0x50] sm:$0xff] }
   0x7   :  { %317 = vmatpush.bf16.msra.mxu1 %v543_v5  ;;  %v549_v14 = vld [vmem:[%s711_s1 + $0xa0] sm:$0xff]  ;;  %v548_v18 = vld [vmem:[%s711_s1 + $0x98] sm:$0xff]  ;;  %v547_v22 = vld [vmem:[%s711_s1 + $0x90] sm:$0xff] }
   0x8   :  { %331 = vmatpush.bf16.msra.mxu2 %v551_v6  ;;  %v557_v15 = vld [vmem:[%s711_s1 + $0xe0] sm:$0xff]  ;;  %v556_v19 = vld [vmem:[%s711_s1 + $0xd8] sm:$0xff]  ;;  %v555_v23 = vld [vmem:[%s711_s1 + $0xd0] sm:$0xff] }
   0x9   :  { %345 = vmatpush.bf16.msra.mxu3 %v559_v7  ;;  %v530_v24 = vld [vmem:[%s711_s1 + $0x8] sm:$0xff]  ;;  %v529_v28 = vld [vmem:[%s711_s1] sm:$0xff]  ;;  %v527_v33 = vld [vmem:[%s712_s0 + $0xc] sm:$0xf0] }
   0xa   :  { %304 = vmatpush.bf16.msra.mxu0 %v534_v8  ;;  %v538_v25 = vld [vmem:[%s711_s1 + $0x48] sm:$0xff]  ;;  %v537_v29 = vld [vmem:[%s711_s1 + $0x40] sm:$0xff]  ;;  %v385_v35 = vld [vmem:[%s712_s0 + $0x10] sm:$0xf0] }
   0xb   :  { %318 = vmatpush.bf16.msra.mxu1 %v542_v9  ;;  %v546_v26 = vld [vmem:[%s711_s1 + $0x88] sm:$0xff]  ;;  %v545_v30 = vld [vmem:[%s711_s1 + $0x80] sm:$0xff]  ;;  %v528_v37 = vld [vmem:[%s712_s0 + $0x14] sm:$0xf0] }
   0xc   :  { %332 = vmatpush.bf16.msra.mxu2 %v550_v10  ;;  %v554_v27 = vld [vmem:[%s711_s1 + $0xc8] sm:$0xff]  ;;  %v553_v31 = vld [vmem:[%s711_s1 + $0xc0] sm:$0xff]  ;;  %v393_v39 = vld [vmem:[%s712_s0 + $0x18] sm:$0xf0] }
   0xd   :  { %346 = vmatpush.bf16.msra.mxu3 %v558_v11  ;;  %v383_v32 = vld [vmem:[%s712_s0] sm:$0xf]  ;;  %v525_v34 = vld [vmem:[%s712_s0 + $0x4] sm:$0xf]  ;;  %v391_v36 = vld [vmem:[%s712_s0 + $0x8] sm:$0xf] }
   0xe   :  { %305 = vmatpush.bf16.msra.mxu0 %v533_v12  ;;  %v526_v38 = vld [vmem:[%s712_s0 + $0xc] sm:$0xf]  ;;  %v384_v40 = vor.u32 %v527_v33, %v383_v32  ;;  %v388_v41 = vor.u32 %v525_v34, %v385_v35  ;;  %v392_v42 = vor.u32 %v528_v37, %v391_v36  ;;  %v561_v50 = vld [vmem:[%s713_s2] ss:$0 sm:$0xff] }
   0xf   :  { %319 = vmatpush.bf16.msra.mxu1 %v541_v13  ;;  %v396_v43 = vor.u32 %v526_v38, %v393_v39 }
  0x10   :  { %333 = vmatpush.bf16.msra.mxu2 %v549_v14 }
  0x11   :  { %347 = vmatpush.bf16.msra.mxu3 %v557_v15 }
  0x12   :  { %306 = vmatpush.bf16.msra.mxu0 %v532_v16 }
  0x13   :  { %320 = vmatpush.bf16.msra.mxu1 %v540_v17 }
  0x14   :  { %334 = vmatpush.bf16.msra.mxu2 %v548_v18 }
  0x15   :  { %348 = vmatpush.bf16.msra.mxu3 %v556_v19 }
  0x16   :  { %307 = vmatpush.bf16.msra.mxu0 %v531_v20 }
  0x17   :  { %321 = vmatpush.bf16.msra.mxu1 %v539_v21 }
  0x18   :  { %335 = vmatpush.bf16.msra.mxu2 %v547_v22 }
  0x19   :  { %349 = vmatpush.bf16.msra.mxu3 %v555_v23 }
  0x1a   :  { %308 = vmatpush.bf16.msra.mxu0 %v530_v24 }
  0x1b   :  { %322 = vmatpush.bf16.msra.mxu1 %v538_v25 }
  0x1c   :  { %336 = vmatpush.bf16.msra.mxu2 %v546_v26 }
  0x1d   :  { %350 = vmatpush.bf16.msra.mxu3 %v554_v27 }
  0x1e   :  { %309 = vmatpush.bf16.msra.mxu0 %v529_v28 }
  0x1f   :  { %323 = vmatpush.bf16.msra.mxu1 %v537_v29 }
  0x20   :  { %337 = vmatpush.bf16.msra.mxu2 %v545_v30 }
  0x21   :  { %351 = vmatpush.bf16.msra.mxu3 %v553_v31  ;;  %310 = vmatmul.bf16.vlgmr.msra.gmra.mxu0 %v384_v40 }
  0x22   :  { %324 = vmatmul.bf16.vlgmr.msra.gmra.mxu1 %v388_v41 }
  0x23   :  { %338 = vmatmul.bf16.vlgmr.msra.gmra.mxu2 %v392_v42 }
  0x24   :  { %352 = vmatmul.bf16.vlgmr.msra.gmra.mxu3 %v396_v43 }
  0x9e   :  { %v311_v44 = vpop.f32.mrf.mxu0 }
  0x9f   :  { %v325_v45 = vpop.f32.mrf.mxu1 }
  0xa0   :  { %v326_v46 = vadd.f32 %v325_v45, %v311_v44 }
  0xa6   :  { %v339_v47 = vpop.f32.mrf.mxu2  ;;  %v313_v52 = vpop.f32.mrf.mxu0 }
  0xa7   :  { %v353_v48 = vpop.f32.mrf.mxu3  ;;  %v340_v49 = vadd.f32 %v339_v47, %v326_v46  ;;  %v327_v53 = vpop.f32.mrf.mxu1 }
  0xa8   :  { %v328_v56 = vadd.f32 %v327_v53, %v313_v52 }
  0xa9   :  { %v354_v51 = vadd.f32 %v353_v48, %v340_v49 }
  0xab   :  { %v371_v54 = vadd.f32 %v561_v50, %v354_v51 }
  0xad   :  { %v373_v55 = vmax.f32 %v371_v54, 0.0 }
  0xae   :  { %v341_v57 = vpop.f32.mrf.mxu2 }
  0xaf   :  { %375 = vst [vmem:[%s714_s3] sm:$0xff] %v373_v55  ;;  %v342_v58 = vadd.f32 %v341_v57, %v328_v56  ;;  %v355_v59 = vpop.f32.mrf.mxu3 }
  0xb1   :  { %v356_v60 = vadd.f32 %v355_v59, %v342_v58 }
  0xb3   :  { %v372_v61 = vadd.f32 %v561_v50, %v356_v60 }
  0xb5   :  { %v374_v62 = vmax.f32 %v372_v61, 0.0 }
  0xb7   :  { %376 = vst [vmem:[%s714_s3 + $0x8] sm:$0xff] %v374_v62 }

// kernel: _lambda_.90
= control target key start
LH: loop header
LB: loop body
LE: loop exit
PB: predicated region body
PF: predicated region fallthrough
CT: control target
= control target key end

     0   :  { %s1112_s12 = smov 0   ;;  %s1114_s13 = smov 0   ;;  %s1265_s0 = inlined_call_operand.vmem [shape: bf16[2048,128], index: 0, kind: input, shape index: {}]   ;;  %s1266_s1 = inlined_call_operand.vmem [shape: bf16[128,128], index: 1, kind: input, shape index: {}]   ;;  %s1267_s2 = inlined_call_operand.vmem [shape: f32[1,128], index: 2, kind: input, shape index: {}]   ;;  %s1268_s3 = inlined_call_operand.vmem [shape: f32[2048,128], index: 3, kind: output, shape index: {}]  }
   0x1   :  { %s1116_s14 = smov 0  }
   0x2 LB: > { %s32_s15 = sadd.s32 1, %s1086_s13  ;;  %p892_p0 = scmp.ge.s32.totalorder %s1090_s14, 1  ;;  %s1090_s14 = sphi %s1116_s14, %s13_s14   ;;  %s1086_s13 = sphi %s1114_s13, %s1270_s13   ;;  %s1082_s12 = sphi %s1112_s12, %s1269_s12  }
   0x3   : > { %p34_p1 = scmp.ge.s32.totalorder %s32_s15, 8  ;;  %p188_p2 = scmp.lt.s32.totalorder %s1090_s14, 9 }
   0x5   : > { %s1272_s15 = smov (%p34_p1, %s32_s15), 0  ;;  %p189_p3 = pnand %p892_p0, %p188_p2 }
   0x6   : > { %s893_s24 = sshll.u32 (!%p189_p3), %s1082_s12, 5 }
   0x7   : > { %192 = sbr.rel (%p189_p3) target bundleno = 237 (0xed), region = 32  ;;  %p230_p4 = scmp.lt.s32.totalorder (!%p189_p3), %s893_s24, 255 }
   0xc   : > { %v1018_v0 = vld [vmem:[%s1266_s1 + $0x38] sm:$0xff]  ;;  %v1017_v1 = vld [vmem:[%s1266_s1 + $0x30] sm:$0xff]  ;;  %v1016_v2 = vld [vmem:[%s1266_s1 + $0x28] sm:$0xff]  ;;  %s1274_s24 = smov (!%p230_p4, %s893_s24), 255 }
   0xd   : > { %519 = vmatpush.bf16.msra.mxu0 %v1018_v0  ;;  %1019 = vmatpush.bf16.msra.mxu1 %v1018_v0  ;;  %v1015_v3 = vld [vmem:[%s1266_s1 + $0x20] sm:$0xff]  ;;  %v1014_v4 = vld [vmem:[%s1266_s1 + $0x18] sm:$0xff]  ;;  %v1013_v5 = vld [vmem:[%s1266_s1 + $0x10] sm:$0xff]  ;;  %s894_s4 = sshll.u32 %s1274_s24, 2  ;;  %s896_s10 = sshll.u32 %s1274_s24, 3 }
   0xe   : > { %1020 = vmatpush.bf16.msra.mxu2 %v1018_v0  ;;  %1021 = vmatpush.bf16.msra.mxu3 %v1018_v0  ;;  %v1012_v6 = vld [vmem:[%s1266_s1 + $0x8] sm:$0xff]  ;;  %v1011_v7 = vld [vmem:[%s1266_s1] sm:$0xff]  ;;  %s1163_s9 = scalar_lea.vmem %s1265_s0, %s894_s4  ;;  %s1190_s18 = scalar_lea.vmem %s1268_s3, %s896_s10 }
   0xf   : > { %v995_v8 = vld [vmem:[%s1163_s9] sm:$0xff]  ;;  %v996_v12 = vld [vmem:[%s1163_s9 + $0x8] sm:$0xff]  ;;  %v997_v16 = vld [vmem:[%s1163_s9 + $0x10] sm:$0xff] }
  0x10   : > { %v999_v9 = vld [vmem:[%s1163_s9 + $0x20] sm:$0xff]  ;;  %v1000_v13 = vld [vmem:[%s1163_s9 + $0x28] sm:$0xff]  ;;  %v1001_v17 = vld [vmem:[%s1163_s9 + $0x30] sm:$0xff] }
  0x11   : > { %520 = vmatpush.bf16.msra.mxu0 %v1017_v1  ;;  %1022 = vmatpush.bf16.msra.mxu1 %v1017_v1  ;;  %v1003_v10 = vld [vmem:[%s1163_s9 + $0x40] sm:$0xff]  ;;  %v1004_v14 = vld [vmem:[%s1163_s9 + $0x48] sm:$0xff]  ;;  %v1005_v18 = vld [vmem:[%s1163_s9 + $0x50] sm:$0xff] }
  0x12   : > { %1023 = vmatpush.bf16.msra.mxu2 %v1017_v1  ;;  %1024 = vmatpush.bf16.msra.mxu3 %v1017_v1  ;;  %v1007_v11 = vld [vmem:[%s1163_s9 + $0x60] sm:$0xff]  ;;  %v1008_v15 = vld [vmem:[%s1163_s9 + $0x68] sm:$0xff]  ;;  %v1009_v19 = vld [vmem:[%s1163_s9 + $0x70] sm:$0xff] }
  0x13   : > { %v998_v20 = vld [vmem:[%s1163_s9 + $0x18] sm:$0xff]  ;;  %v1185_v24 = vld [vmem:[%s1267_s2] ss:$0 sm:$0xff] }
  0x14   : > { %v1002_v21 = vld [vmem:[%s1163_s9 + $0x38] sm:$0xff] }
  0x15   : > { %521 = vmatpush.bf16.msra.mxu0 %v1016_v2  ;;  %1025 = vmatpush.bf16.msra.mxu1 %v1016_v2  ;;  %v1006_v22 = vld [vmem:[%s1163_s9 + $0x58] sm:$0xff] }
  0x16   : > { %1026 = vmatpush.bf16.msra.mxu2 %v1016_v2  ;;  %1027 = vmatpush.bf16.msra.mxu3 %v1016_v2  ;;  %v1010_v23 = vld [vmem:[%s1163_s9 + $0x78] sm:$0xff] }
  0x19   : > { %522 = vmatpush.bf16.msra.mxu0 %v1015_v3  ;;  %1028 = vmatpush.bf16.msra.mxu1 %v1015_v3 }
  0x1a   : > { %1029 = vmatpush.bf16.msra.mxu2 %v1015_v3  ;;  %1030 = vmatpush.bf16.msra.mxu3 %v1015_v3 }
  0x1d   : > { %523 = vmatpush.bf16.msra.mxu0 %v1014_v4  ;;  %1031 = vmatpush.bf16.msra.mxu1 %v1014_v4 }
  0x1e   : > { %1032 = vmatpush.bf16.msra.mxu2 %v1014_v4  ;;  %1033 = vmatpush.bf16.msra.mxu3 %v1014_v4 }
  0x21   : > { %524 = vmatpush.bf16.msra.mxu0 %v1013_v5  ;;  %1034 = vmatpush.bf16.msra.mxu1 %v1013_v5 }
  0x22   : > { %1035 = vmatpush.bf16.msra.mxu2 %v1013_v5  ;;  %1036 = vmatpush.bf16.msra.mxu3 %v1013_v5 }
  0x25   : > { %525 = vmatpush.bf16.msra.mxu0 %v1012_v6  ;;  %1037 = vmatpush.bf16.msra.mxu1 %v1012_v6 }
  0x26   : > { %1038 = vmatpush.bf16.msra.mxu2 %v1012_v6  ;;  %1039 = vmatpush.bf16.msra.mxu3 %v1012_v6 }
  0x29   : > { %526 = vmatpush.bf16.msra.mxu0 %v1011_v7  ;;  %1040 = vmatpush.bf16.msra.mxu1 %v1011_v7 }
  0x2a   : > { %1041 = vmatpush.bf16.msra.mxu2 %v1011_v7  ;;  %1042 = vmatpush.bf16.msra.mxu3 %v1011_v7 }
  0x2c   : > { %527 = vmatmul.bf16.vlgmr.msra.gmra.mxu0 %v995_v8  ;;  %547 = vmatmul.bf16.vlgmr.msra.gmra.mxu1 %v999_v9 }
  0x2d   : > { %567 = vmatmul.bf16.vlgmr.msra.gmra.mxu2 %v1003_v10  ;;  %587 = vmatmul.bf16.vlgmr.msra.gmra.mxu3 %v1007_v11 }
  0x3c   : > { %532 = vmatmul.bf16.gmra.mxu0 %v996_v12  ;;  %552 = vmatmul.bf16.gmra.mxu1 %v1000_v13 }
  0x3d   : > { %572 = vmatmul.bf16.gmra.mxu2 %v1004_v14  ;;  %592 = vmatmul.bf16.gmra.mxu3 %v1008_v15 }
  0x4c   : > { %537 = vmatmul.bf16.gmra.mxu0 %v997_v16  ;;  %557 = vmatmul.bf16.gmra.mxu1 %v1001_v17 }
  0x4d   : > { %577 = vmatmul.bf16.gmra.mxu2 %v1005_v18  ;;  %597 = vmatmul.bf16.gmra.mxu3 %v1009_v19 }
  0x5c   : > { %542 = vmatmul.bf16.gmra.mxu0 %v998_v20  ;;  %562 = vmatmul.bf16.gmra.mxu1 %v1002_v21 }
  0x5d   : > { %582 = vmatmul.bf16.gmra.mxu2 %v1006_v22  ;;  %602 = vmatmul.bf16.gmra.mxu3 %v1010_v23 }
  0xa9   : > { %v528_v25 = vpop.f32.mrf.mxu0  ;;  %v548_v26 = vpop.f32.mrf.mxu1 }
  0xaa   : > { %v711_v27 = vadd.f32 %v1185_v24, %v528_v25  ;;  %v719_v28 = vadd.f32 %v1185_v24, %v548_v26 }
  0xac   : > { %743 = vst [vmem:[%s1190_s18] sm:$0xff] %v711_v27 }
  0xad   : > { %751 = vst [vmem:[%s1190_s18 + $0x40] sm:$0xff] %v719_v28 }
  0xb0   : > { %v568_v29 = vpop.f32.mrf.mxu2  ;;  %v588_v30 = vpop.f32.mrf.mxu3 }
  0xb1   : > { %v727_v31 = vadd.f32 %v1185_v24, %v568_v29  ;;  %v735_v32 = vadd.f32 %v1185_v24, %v588_v30  ;;  %v530_v33 = vpop.f32.mrf.mxu0  ;;  %v550_v34 = vpop.f32.mrf.mxu1 }
  0xb2   : > { %v712_v35 = vadd.f32 %v1185_v24, %v530_v33  ;;  %v720_v36 = vadd.f32 %v1185_v24, %v550_v34 }
  0xb3   : > { %759 = vst [vmem:[%s1190_s18 + $0x80] sm:$0xff] %v727_v31 }
  0xb4   : > { %767 = vst [vmem:[%s1190_s18 + $0xc0] sm:$0xff] %v735_v32 }
  0xb5   : > { %744 = vst [vmem:[%s1190_s18 + $0x8] sm:$0xff] %v712_v35 }
  0xb6   : > { %752 = vst [vmem:[%s1190_s18 + $0x48] sm:$0xff] %v720_v36 }
  0xb8   : > { %v570_v37 = vpop.f32.mrf.mxu2  ;;  %v590_v38 = vpop.f32.mrf.mxu3 }
  0xb9   : > { %v728_v39 = vadd.f32 %v1185_v24, %v570_v37  ;;  %v736_v40 = vadd.f32 %v1185_v24, %v590_v38  ;;  %v533_v41 = vpop.f32.mrf.mxu0  ;;  %v553_v42 = vpop.f32.mrf.mxu1 }
  0xba   : > { %v713_v43 = vadd.f32 %v1185_v24, %v533_v41  ;;  %v721_v44 = vadd.f32 %v1185_v24, %v553_v42 }
  0xbb   : > { %760 = vst [vmem:[%s1190_s18 + $0x88] sm:$0xff] %v728_v39 }
  0xbc   : > { %768 = vst [vmem:[%s1190_s18 + $0xc8] sm:$0xff] %v736_v40 }
  0xbd   : > { %745 = vst [vmem:[%s1190_s18 + $0x10] sm:$0xff] %v713_v43 }
  0xbe   : > { %753 = vst [vmem:[%s1190_s18 + $0x50] sm:$0xff] %v721_v44 }
  0xc0   : > { %v573_v45 = vpop.f32.mrf.mxu2  ;;  %v593_v46 = vpop.f32.mrf.mxu3 }
  0xc1   : > { %v729_v47 = vadd.f32 %v1185_v24, %v573_v45  ;;  %v737_v48 = vadd.f32 %v1185_v24, %v593_v46  ;;  %v535_v49 = vpop.f32.mrf.mxu0  ;;  %v555_v50 = vpop.f32.mrf.mxu1 }
  0xc2   : > { %v714_v51 = vadd.f32 %v1185_v24, %v535_v49  ;;  %v722_v52 = vadd.f32 %v1185_v24, %v555_v50 }
  0xc3   : > { %761 = vst [vmem:[%s1190_s18 + $0x90] sm:$0xff] %v729_v47 }
  0xc4   : > { %769 = vst [vmem:[%s1190_s18 + $0xd0] sm:$0xff] %v737_v48 }
  0xc5   : > { %746 = vst [vmem:[%s1190_s18 + $0x18] sm:$0xff] %v714_v51 }
  0xc6   : > { %754 = vst [vmem:[%s1190_s18 + $0x58] sm:$0xff] %v722_v52 }
  0xc8   : > { %v575_v53 = vpop.f32.mrf.mxu2  ;;  %v595_v54 = vpop.f32.mrf.mxu3 }
  0xc9   : > { %v730_v55 = vadd.f32 %v1185_v24, %v575_v53  ;;  %v738_v56 = vadd.f32 %v1185_v24, %v595_v54  ;;  %v538_v57 = vpop.f32.mrf.mxu0  ;;  %v558_v58 = vpop.f32.mrf.mxu1 }
  0xca   : > { %v715_v59 = vadd.f32 %v1185_v24, %v538_v57  ;;  %v723_v60 = vadd.f32 %v1185_v24, %v558_v58 }
  0xcb   : > { %762 = vst [vmem:[%s1190_s18 + $0x98] sm:$0xff] %v730_v55 }
  0xcc   : > { %770 = vst [vmem:[%s1190_s18 + $0xd8] sm:$0xff] %v738_v56 }
  0xcd   : > { %747 = vst [vmem:[%s1190_s18 + $0x20] sm:$0xff] %v715_v59 }
  0xce   : > { %755 = vst [vmem:[%s1190_s18 + $0x60] sm:$0xff] %v723_v60 }
  0xd0   : > { %v578_v61 = vpop.f32.mrf.mxu2  ;;  %v598_v62 = vpop.f32.mrf.mxu3 }
  0xd1   : > { %v731_v63 = vadd.f32 %v1185_v24, %v578_v61  ;;  %v739_v0 = vadd.f32 %v1185_v24, %v598_v62  ;;  %v540_v1 = vpop.f32.mrf.mxu0  ;;  %v560_v2 = vpop.f32.mrf.mxu1 }
  0xd2   : > { %v716_v3 = vadd.f32 %v1185_v24, %v540_v1  ;;  %v724_v4 = vadd.f32 %v1185_v24, %v560_v2 }
  0xd3   : > { %763 = vst [vmem:[%s1190_s18 + $0xa0] sm:$0xff] %v731_v63 }
  0xd4   : > { %771 = vst [vmem:[%s1190_s18 + $0xe0] sm:$0xff] %v739_v0 }
  0xd5   : > { %748 = vst [vmem:[%s1190_s18 + $0x28] sm:$0xff] %v716_v3 }
  0xd6   : > { %756 = vst [vmem:[%s1190_s18 + $0x68] sm:$0xff] %v724_v4 }
  0xd8   : > { %v580_v5 = vpop.f32.mrf.mxu2  ;;  %v600_v6 = vpop.f32.mrf.mxu3 }
  0xd9   : > { %v732_v7 = vadd.f32 %v1185_v24, %v580_v5  ;;  %v740_v8 = vadd.f32 %v1185_v24, %v600_v6  ;;  %v543_v9 = vpop.f32.mrf.mxu0  ;;  %v563_v10 = vpop.f32.mrf.mxu1 }
  0xda   : > { %v717_v11 = vadd.f32 %v1185_v24, %v543_v9  ;;  %v725_v12 = vadd.f32 %v1185_v24, %v563_v10 }
  0xdb   : > { %764 = vst [vmem:[%s1190_s18 + $0xa8] sm:$0xff] %v732_v7 }
  0xdc   : > { %772 = vst [vmem:[%s1190_s18 + $0xe8] sm:$0xff] %v740_v8 }
  0xdd   : > { %749 = vst [vmem:[%s1190_s18 + $0x30] sm:$0xff] %v717_v11 }
  0xde   : > { %757 = vst [vmem:[%s1190_s18 + $0x70] sm:$0xff] %v725_v12 }
  0xe0   : > { %v583_v13 = vpop.f32.mrf.mxu2  ;;  %v603_v14 = vpop.f32.mrf.mxu3 }
  0xe1   : > { %v733_v15 = vadd.f32 %v1185_v24, %v583_v13  ;;  %v741_v16 = vadd.f32 %v1185_v24, %v603_v14  ;;  %v545_v17 = vpop.f32.mrf.mxu0  ;;  %v565_v18 = vpop.f32.mrf.mxu1 }
  0xe2   : > { %v718_v19 = vadd.f32 %v1185_v24, %v545_v17  ;;  %v726_v20 = vadd.f32 %v1185_v24, %v565_v18 }
  0xe3   : > { %765 = vst [vmem:[%s1190_s18 + $0xb0] sm:$0xff] %v733_v15 }
  0xe4   : > { %773 = vst [vmem:[%s1190_s18 + $0xf0] sm:$0xff] %v741_v16 }
  0xe5   : > { %750 = vst [vmem:[%s1190_s18 + $0x38] sm:$0xff] %v718_v19 }
  0xe6   : > { %758 = vst [vmem:[%s1190_s18 + $0x78] sm:$0xff] %v726_v20 }
  0xe8   : > { %v585_v21 = vpop.f32.mrf.mxu2  ;;  %v605_v22 = vpop.f32.mrf.mxu3 }
  0xe9   : > { %v734_v23 = vadd.f32 %v1185_v24, %v585_v21  ;;  %v742_v25 = vadd.f32 %v1185_v24, %v605_v22 }
  0xeb   : > { %766 = vst [vmem:[%s1190_s18 + $0xb8] sm:$0xff] %v734_v23 }
  0xec   : > { %774 = vst [vmem:[%s1190_s18 + $0xf8] sm:$0xff] %v742_v25 }
  0xed PF: > { %s13_s14 = sadd.s32 1, %s1090_s14   ;;  %s1269_s12 = smov %s1086_s13 }
  0xee   : > { %p10_p5 = scmp.ge.s32.totalorder %s13_s14, 10   ;;  %s1270_s13 = smov %s1272_s15 }
  0xf0   :  { %12 = sbr.rel (!%p10_p5) target bundleno = 2 (0x2), region = 76 }

</bundles_post_ra>
